<compile_context>
chip_gen: v7x
topology: tpu7x:2x2x1
jax: 0.10.0
libtpu: 0.0.40
codegen_flags: <defaults>
</compile_context>

<pallas_src>
import jax
import jax.numpy as jnp
from jax import lax
from jax.experimental import pallas as pl
from jax.experimental.pallas import tpu as pltpu

# ---- small but module-consistent hyper-parameters -------------------------
B = 4          # batch
S = 8          # seq_len
N = S * B      # flattened rows (seq-major: row = s*B + b)
IN_DIM = 8     # input_dim
D = 32         # d_model
H = 4          # nhead
DH = D // H    # head dim (8 -> sublane-aligned slices of wo)
FF = 2048      # dim_feedforward (nn.TransformerEncoderLayer default)
L = 2          # num_layers
C = 5          # num_classes
EPS = 1e-5     # nn.LayerNorm eps


def _layer_norm(x, gamma, beta):
    mu = jnp.mean(x, axis=-1, keepdims=True)
    xc = x - mu
    var = jnp.mean(xc * xc, axis=-1, keepdims=True)
    return xc * lax.rsqrt(var + EPS) * gamma + beta


# ---------------------------------------------------------------------------
# Kernel body: one grid step == one encoder layer (+ prologue / epilogue).
# ---------------------------------------------------------------------------
def _transformer_kernel(
    x_ref, posb_ref, wp_ref, mask_ref,
    wqkv_ref, bqkv_ref, wo_ref, bo_ref,
    g1_ref, be1_ref,
    w1_ref, b1_ref, w2_ref, b2_ref,
    g2_ref, be2_ref,
    pool_ref, wfc_ref, bfc_ref,
    out_ref,
    h_ref,                     # persistent VMEM scratch: hidden state (N, D)
):
    l = pl.program_id(0)

    # ---- input projection + (pos_embedding + input_proj bias), first step --
    @pl.when(l == 0)
    def _():
        h_ref[...] = (jnp.dot(x_ref[...], wp_ref[...],
                              preferred_element_type=jnp.float32)
                      + posb_ref[...])

    h = h_ref[...]                                               # (N, D) f32

    # ---- fused QKV projection (Q scale folded into weights host-side) ------
    qkv = (jnp.dot(h, wqkv_ref[...], preferred_element_type=jnp.float32)
           + bqkv_ref[...])                                      # (N, 3D)

    # ---- per-head masked attention, accumulated through the out-projection -
    attn = jnp.zeros((N, D), jnp.float32)
    for hh in range(H):
        qh = qkv[:, hh * DH:(hh + 1) * DH]                       # (N, DH)
        kh = qkv[:, D + hh * DH:D + (hh + 1) * DH]
        vh = qkv[:, 2 * D + hh * DH:2 * D + (hh + 1) * DH]
        sc = lax.dot_general(qh, kh, (((1,), (1,)), ((), ())),
                             preferred_element_type=jnp.float32)  # (N, N) f32
        sc = sc + mask_ref[...]                                   # 0 / -1e30
        sc = sc - jnp.max(sc, axis=-1, keepdims=True)
        p = jnp.exp(sc)
        p = p / jnp.sum(p, axis=-1, keepdims=True)                # exact softmax
        oh = jnp.dot(p, vh, preferred_element_type=jnp.float32)   # (N, DH)
        # 8-row sublane slice of wo: no lane concat of the heads.
        attn = attn + jnp.dot(oh, wo_ref[hh * DH:(hh + 1) * DH, :],
                              preferred_element_type=jnp.float32)
    attn = attn + bo_ref[...]
    h = _layer_norm(h + attn, g1_ref[...], be1_ref[...])

    # ---- feed forward (relu): bf16 weights, f32 accumulation ----------------
    f = (jnp.dot(h.astype(jnp.bfloat16), w1_ref[...],
                 preferred_element_type=jnp.float32) + b1_ref[...])
    f = jnp.maximum(f, 0.0)
    f = (jnp.dot(f.astype(jnp.bfloat16), w2_ref[...],
                 preferred_element_type=jnp.float32) + b2_ref[...])
    h = _layer_norm(h + f, g2_ref[...], be2_ref[...])
    h_ref[...] = h

    # ---- mean over sequence (one (B,N)x(N,D) matmul) + fc, last step -------
    @pl.when(l == L - 1)
    def _():
        pooled = jnp.dot(pool_ref[...], h, preferred_element_type=jnp.float32)
        out_ref[...] = (jnp.dot(pooled, wfc_ref[...],
                                preferred_element_type=jnp.float32)
                        + bfc_ref[...])


# ---------------------------------------------------------------------------
# Wrapper: layout plumbing + single pallas_call with grid=(L,).
# ---------------------------------------------------------------------------
def _layer_spec(rows, cols):
    # Per-layer tensor (L, rows, cols): pick layer l, squeeze the leading dim.
    return pl.BlockSpec((pl.Squeezed(), rows, cols), lambda l: (l, 0, 0))


def _const_spec(rows, cols):
    # Layer-invariant tensor: same block every step (copied into VMEM once).
    return pl.BlockSpec((rows, cols), lambda l: (0, 0))


def time_series_transformer(x, kp):
    """x: (B, S, IN_DIM) float32. kp: kernel-layout parameter dict."""
    xs = jnp.transpose(x, (1, 0, 2)).reshape(N, IN_DIM)        # seq-major rows

    inputs = [
        xs, kp["posb"], kp["wp"], kp["mask"],
        kp["wqkv"], kp["bqkv"], kp["wo"], kp["bo"],
        kp["g1"], kp["be1"],
        kp["w1"], kp["b1"], kp["w2"], kp["b2"],
        kp["g2"], kp["be2"],
        kp["pool"], kp["wfc"], kp["bfc"],
    ]
    in_specs = [
        _const_spec(N, IN_DIM),          # x (seq-major rows)
        _const_spec(N, D),               # pos_embedding + input_proj bias
        _const_spec(IN_DIM, D),          # input_proj weight
        _const_spec(N, N),               # additive block-diagonal mask
        _layer_spec(D, 3 * D),           # packed QKV weight (Q pre-scaled)
        _layer_spec(1, 3 * D),           # packed QKV bias
        _layer_spec(D, D),               # out_proj weight
        _layer_spec(1, D),               # out_proj bias
        _layer_spec(1, D),               # ln1 gamma
        _layer_spec(1, D),               # ln1 beta
        _layer_spec(D, FF),              # linear1 weight (bf16)
        _layer_spec(1, FF),              # linear1 bias
        _layer_spec(FF, D),              # linear2 weight (bf16)
        _layer_spec(1, D),               # linear2 bias
        _layer_spec(1, D),               # ln2 gamma
        _layer_spec(1, D),               # ln2 beta
        _const_spec(B, N),               # mean-over-seq pooling matrix
        _const_spec(D, C),               # fc weight
        _const_spec(1, C),               # fc bias
    ]
    return pl.pallas_call(
        _transformer_kernel,
        out_shape=jax.ShapeDtypeStruct((B, C), jnp.float32),
        grid_spec=pltpu.PrefetchScalarGridSpec(
            num_scalar_prefetch=0,
            grid=(L,),
            in_specs=in_specs,
            out_specs=pl.BlockSpec((B, C), lambda l: (0, 0)),
            scratch_shapes=[pltpu.VMEM((N, D), jnp.float32)],
        ),
        compiler_params=pltpu.CompilerParams(
            dimension_semantics=("arbitrary",)),
    )(*inputs)


# ---------------------------------------------------------------------------
# Deterministic parameter init (PyTorch shapes) + conversion to kernel layout.
# ---------------------------------------------------------------------------
def init_params(key):
    ks = jax.random.split(key, 6)

    def rnd(k, shape, scale=0.05):
        return (scale * jax.random.normal(k, shape)).astype(jnp.float32)

    p = {
        "pos": rnd(ks[0], (1, S, D), 1.0),      # nn.Parameter(torch.randn(1, S, D))
        "wp": rnd(ks[1], (D, IN_DIM)),          # input_proj
        "bp": rnd(ks[2], (D,)),
        "wfc": rnd(ks[3], (C, D)),              # fc
        "bfc": rnd(ks[4], (C,)),
        "layers": [],
    }
    lkeys = jax.random.split(ks[5], L)
    for l in range(L):
        lk = jax.random.split(lkeys[l], 8)
        p["layers"].append({
            "in_w": rnd(lk[0], (3 * D, D)),     # MultiheadAttention in_proj
            "in_b": rnd(lk[1], (3 * D,)),
            "out_w": rnd(lk[2], (D, D)),        # out_proj
            "out_b": rnd(lk[3], (D,)),
            "w1": rnd(lk[4], (FF, D)),          # linear1
            "b1": rnd(lk[5], (FF,)),
            "w2": rnd(lk[6], (D, FF)),          # linear2
            "b2": rnd(lk[7], (D,)),
            "g1": jnp.ones((D,), jnp.float32),  # LayerNorm defaults
            "be1": jnp.zeros((D,), jnp.float32),
            "g2": jnp.ones((D,), jnp.float32),
            "be2": jnp.zeros((D,), jnp.float32),
        })
    return p


def to_kernel_params(p):
    scale = 1.0 / float(DH) ** 0.5

    def stack(fn):
        return jnp.stack([fn(lp) for lp in p["layers"]], axis=0)

    # pos_embedding + input_proj bias folded into one (N, D) additive tensor.
    posb = p["pos"].reshape(S, 1, D) + p["bp"].reshape(1, 1, D)
    posb = jnp.broadcast_to(posb, (S, B, D)).reshape(N, D)

    # mean-over-sequence as a (B, N) averaging matrix (seq-major rows).
    col = jnp.arange(N)
    pool = (col[None, :] % B == jnp.arange(B)[:, None]).astype(jnp.float32) / S

    # block-diagonal additive mask: rows interact iff same sequence position.
    row_s = jnp.arange(N)[:, None] // B
    col_s = jnp.arange(N)[None, :] // B
    mask = jnp.where(row_s == col_s, 0.0, -1e30).astype(jnp.float32)

    def qkv_w(lp):
        w = lp["in_w"].T                         # (D, 3D): cols 0:D produce Q
        return w.at[:, :D].multiply(scale)       # fold 1/sqrt(DH) into Q

    def qkv_b(lp):
        b = lp["in_b"].at[:D].multiply(scale)
        return b.reshape(1, 3 * D)

    return {
        "posb": posb,
        "wp": p["wp"].T,                                     # (IN_DIM, D)
        "mask": mask,                                        # (N, N)
        "wqkv": stack(qkv_w),                                # (L, D, 3D)
        "bqkv": stack(qkv_b),                                # (L, 1, 3D)
        "wo": stack(lambda lp: lp["out_w"].T),               # (L, D, D)
        "bo": stack(lambda lp: lp["out_b"].reshape(1, D)),
        "g1": stack(lambda lp: lp["g1"].reshape(1, D)),
        "be1": stack(lambda lp: lp["be1"].reshape(1, D)),
        "w1": stack(lambda lp: lp["w1"].T).astype(jnp.bfloat16),   # (L, D, FF)
        "b1": stack(lambda lp: lp["b1"].reshape(1, FF)),
        "w2": stack(lambda lp: lp["w2"].T).astype(jnp.bfloat16),   # (L, FF, D)
        "b2": stack(lambda lp: lp["b2"].reshape(1, D)),
        "g2": stack(lambda lp: lp["g2"].reshape(1, D)),
        "be2": stack(lambda lp: lp["be2"].reshape(1, D)),
        "pool": pool,                                        # (B, N)
        "wfc": p["wfc"].T,                                   # (D, C)
        "bfc": p["bfc"].reshape(1, C),
    }


# Pure-JAX f32 reference reproducing the PyTorch semantics (for validation).
def reference_forward(x, p):
    h = jnp.einsum("bsi,di->bsd", x, p["wp"]) + p["bp"] + p["pos"]
    for lp in p["layers"]:
        qkv = jnp.einsum("bsd,ed->bse", h, lp["in_w"]) + lp["in_b"]
        q, k, v = jnp.split(qkv, 3, axis=-1)
        qh = q.reshape(B, S, H, DH)
        kh = k.reshape(B, S, H, DH)
        vh = v.reshape(B, S, H, DH)
        scores = jnp.einsum("ishd,jshd->shij", qh, kh) / (float(DH) ** 0.5)
        attn = jax.nn.softmax(scores, axis=-1)
        o = jnp.einsum("shij,jshd->ishd", attn, vh).reshape(B, S, D)
        o = jnp.einsum("bsd,ed->bse", o, lp["out_w"]) + lp["out_b"]
        h = _layer_norm(h + o, lp["g1"], lp["be1"])
        f = jax.nn.relu(jnp.einsum("bsd,fd->bsf", h, lp["w1"]) + lp["b1"])
        f = jnp.einsum("bsf,df->bsd", f, lp["w2"]) + lp["b2"]
        h = _layer_norm(h + f, lp["g2"], lp["be2"])
    pooled = h.mean(axis=1)
    return jnp.einsum("bd,cd->bc", pooled, p["wfc"]) + p["bfc"]


if __name__ == "__main__":
    key = jax.random.PRNGKey(0)
    pkey, xkey = jax.random.split(key)
    params = init_params(pkey)
    x = jax.random.normal(xkey, (B, S, IN_DIM), dtype=jnp.float32)

    kp = to_kernel_params(params)
    out = jax.block_until_ready(jax.jit(time_series_transformer)(x, kp))

    ref = jax.block_until_ready(reference_forward(x, params))
    err = float(jnp.max(jnp.abs(out - ref)))
    assert out.shape == (B, C), out.shape
    # bf16 FF weights vs f32 reference: expected max error ~1e-3.
    assert err < 2e-2, f"max abs diff vs reference: {err}"
    print("KERNEL_OK")
</pallas_src>

<mosaic_0001>
module attributes {stable_mosaic.version = 11 : i64} {
  func.func @_transformer_kernel(%arg0: i32, %arg1: memref<32x8xf32, #tpu.memory_space<vmem>>, %arg2: memref<32x32xf32, #tpu.memory_space<vmem>>, %arg3: memref<8x32xf32, #tpu.memory_space<vmem>>, %arg4: memref<32x32xf32, #tpu.memory_space<vmem>>, %arg5: memref<1x32x96xf32, #tpu.memory_space<vmem>>, %arg6: memref<1x1x96xf32, #tpu.memory_space<vmem>>, %arg7: memref<1x32x32xf32, #tpu.memory_space<vmem>>, %arg8: memref<1x1x32xf32, #tpu.memory_space<vmem>>, %arg9: memref<1x1x32xf32, #tpu.memory_space<vmem>>, %arg10: memref<1x1x32xf32, #tpu.memory_space<vmem>>, %arg11: memref<1x32x2048xbf16, #tpu.memory_space<vmem>>, %arg12: memref<1x1x2048xf32, #tpu.memory_space<vmem>>, %arg13: memref<1x2048x32xbf16, #tpu.memory_space<vmem>>, %arg14: memref<1x1x32xf32, #tpu.memory_space<vmem>>, %arg15: memref<1x1x32xf32, #tpu.memory_space<vmem>>, %arg16: memref<1x1x32xf32, #tpu.memory_space<vmem>>, %arg17: memref<4x32xf32, #tpu.memory_space<vmem>>, %arg18: memref<32x5xf32, #tpu.memory_space<vmem>>, %arg19: memref<1x5xf32, #tpu.memory_space<vmem>>, %arg20: memref<4x5xf32, #tpu.memory_space<vmem>>, %arg21: memref<32x32xf32, #tpu.memory_space<vmem>>) attributes {dimension_semantics = [#tpu.dimension_semantics<arbitrary>], iteration_bounds = array<i64: 2>, scalar_prefetch = 0 : i64, scratch_operands = 1 : i64, tpu.core_type = #tpu.core_type<tc>, window_params = [{pipeline_mode = #tpu.pipeline_mode<synchronous>, transform_indices = @transform_0, window_bounds = array<i64: 32, 8>}, {pipeline_mode = #tpu.pipeline_mode<synchronous>, transform_indices = @transform_1, window_bounds = array<i64: 32, 32>}, {pipeline_mode = #tpu.pipeline_mode<synchronous>, transform_indices = @transform_2, window_bounds = array<i64: 8, 32>}, {pipeline_mode = #tpu.pipeline_mode<synchronous>, transform_indices = @transform_3, window_bounds = array<i64: 32, 32>}, {transform_indices = @transform_4, window_bounds = array<i64: 1, 32, 96>}, {transform_indices = @transform_5, window_bounds = array<i64: 1, 1, 96>}, {transform_indices = @transform_6, window_bounds = array<i64: 1, 32, 32>}, {transform_indices = @transform_7, window_bounds = array<i64: 1, 1, 32>}, {transform_indices = @transform_8, window_bounds = array<i64: 1, 1, 32>}, {transform_indices = @transform_9, window_bounds = array<i64: 1, 1, 32>}, {transform_indices = @transform_10, window_bounds = array<i64: 1, 32, 2048>}, {transform_indices = @transform_11, window_bounds = array<i64: 1, 1, 2048>}, {transform_indices = @transform_12, window_bounds = array<i64: 1, 2048, 32>}, {transform_indices = @transform_13, window_bounds = array<i64: 1, 1, 32>}, {transform_indices = @transform_14, window_bounds = array<i64: 1, 1, 32>}, {transform_indices = @transform_15, window_bounds = array<i64: 1, 1, 32>}, {pipeline_mode = #tpu.pipeline_mode<synchronous>, transform_indices = @transform_16, window_bounds = array<i64: 4, 32>}, {pipeline_mode = #tpu.pipeline_mode<synchronous>, transform_indices = @transform_17, window_bounds = array<i64: 32, 5>}, {pipeline_mode = #tpu.pipeline_mode<synchronous>, transform_indices = @transform_18, window_bounds = array<i64: 1, 5>}, {pipeline_mode = #tpu.pipeline_mode<synchronous>, transform_indices = @transform_19, window_bounds = array<i64: 4, 5>}]} {
    %c0_i32 = arith.constant 0 : i32
    %0 = arith.cmpi eq, %arg0, %c0_i32 : i32
    %1 = arith.extui %0 : i1 to i32
    %c0_i32_0 = arith.constant 0 : i32
    %2 = arith.cmpi ne, %1, %c0_i32_0 : i32
    scf.if %2 {
      %c0_89 = arith.constant 0 : index
      %c0_90 = arith.constant 0 : index
      %168 = vector.load %arg1[%c0_89, %c0_90] : memref<32x8xf32, #tpu.memory_space<vmem>>, vector<32x8xf32>
      %c0_91 = arith.constant 0 : index
      %c0_92 = arith.constant 0 : index
      %169 = vector.load %arg3[%c0_91, %c0_92] : memref<8x32xf32, #tpu.memory_space<vmem>>, vector<8x32xf32>
      %cst_93 = arith.constant dense<0.000000e+00> : vector<32x32xf32>
      %170 = tpu.matmul %168, %169, %cst_93 {dimension_numbers = #tpu.dot_dimension_numbers<[1], [0], [0], [1], [0, 0, 1, 1], [], []>} : vector<32x8xf32>, vector<8x32xf32>, vector<32x32xf32> -> vector<32x32xf32>
      %c0_94 = arith.constant 0 : index
      %c0_95 = arith.constant 0 : index
      %171 = vector.load %arg2[%c0_94, %c0_95] : memref<32x32xf32, #tpu.memory_space<vmem>>, vector<32x32xf32>
      %172 = arith.addf %170, %171 : vector<32x32xf32>
      %c0_96 = arith.constant 0 : index
      %c0_97 = arith.constant 0 : index
      %173 = vector.load %arg21[%c0_96, %c0_97] : memref<32x32xf32, #tpu.memory_space<vmem>>, vector<32x32xf32>
      tpu.vector_store %arg21[%c0_96, %c0_97], %172 {strides = array<i32>} : memref<32x32xf32, #tpu.memory_space<vmem>>, vector<32x32xf32>,
    } else {
    }
    %c0 = arith.constant 0 : index
    %c0_1 = arith.constant 0 : index
    %3 = vector.load %arg21[%c0, %c0_1] : memref<32x32xf32, #tpu.memory_space<vmem>>, vector<32x32xf32>
    %c0_2 = arith.constant 0 : index
    %c0_3 = arith.constant 0 : index
    %c0_4 = arith.constant 0 : index
    %4 = vector.load %arg5[%c0_2, %c0_3, %c0_4] : memref<1x32x96xf32, #tpu.memory_space<vmem>>, vector<1x32x96xf32>
    %5 = vector.shape_cast %4 : vector<1x32x96xf32> to vector<32x96xf32>
    %cst = arith.constant dense<0.000000e+00> : vector<32x96xf32>
    %6 = tpu.matmul %3, %5, %cst {dimension_numbers = #tpu.dot_dimension_numbers<[1], [0], [0], [1], [0, 0, 1, 1], [], []>} : vector<32x32xf32>, vector<32x96xf32>, vector<32x96xf32> -> vector<32x96xf32>
    %c0_5 = arith.constant 0 : index
    %c0_6 = arith.constant 0 : index
    %c0_7 = arith.constant 0 : index
    %7 = vector.load %arg6[%c0_5, %c0_6, %c0_7] : memref<1x1x96xf32, #tpu.memory_space<vmem>>, vector<1x1x96xf32>
    %8 = vector.shape_cast %7 : vector<1x1x96xf32> to vector<1x96xf32>
    %9 = vector.broadcast %8 : vector<1x96xf32> to vector<32x96xf32>
    %10 = arith.addf %6, %9 : vector<32x96xf32>
    %cst_8 = arith.constant 0.000000e+00 : f32
    %11 = vector.broadcast %cst_8 : f32 to vector<32x32xf32>
    %12 = vector.extract_strided_slice %10 {offsets = [0, 0], sizes = [32, 8], strides = [1, 1]} : vector<32x96xf32> to vector<32x8xf32>
    %13 = vector.extract_strided_slice %10 {offsets = [0, 32], sizes = [32, 8], strides = [1, 1]} : vector<32x96xf32> to vector<32x8xf32>
    %14 = vector.extract_strided_slice %10 {offsets = [0, 64], sizes = [32, 8], strides = [1, 1]} : vector<32x96xf32> to vector<32x8xf32>
    %cst_9 = arith.constant dense<0.000000e+00> : vector<32x32xf32>
    %15 = tpu.matmul %12, %13, %cst_9 {dimension_numbers = #tpu.dot_dimension_numbers<[1], [1], [0], [0], [0, 0, 1, 0], [], []>} : vector<32x8xf32>, vector<32x8xf32>, vector<32x32xf32> -> vector<32x32xf32>
    %c0_10 = arith.constant 0 : index
    %c0_11 = arith.constant 0 : index
    %16 = vector.load %arg4[%c0_10, %c0_11] : memref<32x32xf32, #tpu.memory_space<vmem>>, vector<32x32xf32>
    %17 = arith.addf %15, %16 : vector<32x32xf32>
    %cst_12 = arith.constant dense<0xFF800000> : vector<32xf32>
    %18 = vector.multi_reduction <maximumf>, %17, %cst_12 [1] : vector<32x32xf32> to vector<32xf32>
    %19 = vector.shape_cast %18 : vector<32xf32> to vector<32x1xf32>
    %20 = vector.broadcast %19 : vector<32x1xf32> to vector<32x32xf32>
    %21 = arith.subf %17, %20 : vector<32x32xf32>
    %22 = math.exp %21 : vector<32x32xf32>
    %cst_13 = arith.constant dense<0.000000e+00> : vector<32xf32>
    %23 = vector.multi_reduction <add>, %22, %cst_13 [1] : vector<32x32xf32> to vector<32xf32>
    %24 = vector.shape_cast %23 : vector<32xf32> to vector<32x1xf32>
    %25 = vector.broadcast %24 : vector<32x1xf32> to vector<32x32xf32>
    %26 = arith.divf %22, %25 : vector<32x32xf32>
    %cst_14 = arith.constant dense<0.000000e+00> : vector<32x8xf32>
    %27 = tpu.matmul %26, %14, %cst_14 {dimension_numbers = #tpu.dot_dimension_numbers<[1], [0], [0], [1], [0, 0, 1, 1], [], []>} : vector<32x32xf32>, vector<32x8xf32>, vector<32x8xf32> -> vector<32x8xf32>
    %c0_15 = arith.constant 0 : index
    %c0_16 = arith.constant 0 : index
    %c0_17 = arith.constant 0 : index
    %28 = vector.load %arg7[%c0_15, %c0_16, %c0_17] : memref<1x32x32xf32, #tpu.memory_space<vmem>>, vector<1x8x32xf32>
    %29 = vector.shape_cast %28 : vector<1x8x32xf32> to vector<8x32xf32>
    %cst_18 = arith.constant dense<0.000000e+00> : vector<32x32xf32>
    %30 = tpu.matmul %27, %29, %cst_18 {dimension_numbers = #tpu.dot_dimension_numbers<[1], [0], [0], [1], [0, 0, 1, 1], [], []>} : vector<32x8xf32>, vector<8x32xf32>, vector<32x32xf32> -> vector<32x32xf32>
    %31 = arith.addf %11, %30 : vector<32x32xf32>
    %32 = vector.extract_strided_slice %10 {offsets = [0, 8], sizes = [32, 8], strides = [1, 1]} : vector<32x96xf32> to vector<32x8xf32>
    %33 = vector.extract_strided_slice %10 {offsets = [0, 40], sizes = [32, 8], strides = [1, 1]} : vector<32x96xf32> to vector<32x8xf32>
    %34 = vector.extract_strided_slice %10 {offsets = [0, 72], sizes = [32, 8], strides = [1, 1]} : vector<32x96xf32> to vector<32x8xf32>
    %cst_19 = arith.constant dense<0.000000e+00> : vector<32x32xf32>
    %35 = tpu.matmul %32, %33, %cst_19 {dimension_numbers = #tpu.dot_dimension_numbers<[1], [1], [0], [0], [0, 0, 1, 0], [], []>} : vector<32x8xf32>, vector<32x8xf32>, vector<32x32xf32> -> vector<32x32xf32>
    %c0_20 = arith.constant 0 : index
    %c0_21 = arith.constant 0 : index
    %36 = vector.load %arg4[%c0_20, %c0_21] : memref<32x32xf32, #tpu.memory_space<vmem>>, vector<32x32xf32>
    %37 = arith.addf %35, %36 : vector<32x32xf32>
    %cst_22 = arith.constant dense<0xFF800000> : vector<32xf32>
    %38 = vector.multi_reduction <maximumf>, %37, %cst_22 [1] : vector<32x32xf32> to vector<32xf32>
    %39 = vector.shape_cast %38 : vector<32xf32> to vector<32x1xf32>
    %40 = vector.broadcast %39 : vector<32x1xf32> to vector<32x32xf32>
    %41 = arith.subf %37, %40 : vector<32x32xf32>
    %42 = math.exp %41 : vector<32x32xf32>
    %cst_23 = arith.constant dense<0.000000e+00> : vector<32xf32>
    %43 = vector.multi_reduction <add>, %42, %cst_23 [1] : vector<32x32xf32> to vector<32xf32>
    %44 = vector.shape_cast %43 : vector<32xf32> to vector<32x1xf32>
    %45 = vector.broadcast %44 : vector<32x1xf32> to vector<32x32xf32>
    %46 = arith.divf %42, %45 : vector<32x32xf32>
    %cst_24 = arith.constant dense<0.000000e+00> : vector<32x8xf32>
    %47 = tpu.matmul %46, %34, %cst_24 {dimension_numbers = #tpu.dot_dimension_numbers<[1], [0], [0], [1], [0, 0, 1, 1], [], []>} : vector<32x32xf32>, vector<32x8xf32>, vector<32x8xf32> -> vector<32x8xf32>
    %c0_25 = arith.constant 0 : index
    %c8 = arith.constant 8 : index
    %c0_26 = arith.constant 0 : index
    %48 = vector.load %arg7[%c0_25, %c8, %c0_26] : memref<1x32x32xf32, #tpu.memory_space<vmem>>, vector<1x8x32xf32>
    %49 = vector.shape_cast %48 : vector<1x8x32xf32> to vector<8x32xf32>
    %cst_27 = arith.constant dense<0.000000e+00> : vector<32x32xf32>
    %50 = tpu.matmul %47, %49, %cst_27 {dimension_numbers = #tpu.dot_dimension_numbers<[1], [0], [0], [1], [0, 0, 1, 1], [], []>} : vector<32x8xf32>, vector<8x32xf32>, vector<32x32xf32> -> vector<32x32xf32>
    %51 = arith.addf %31, %50 : vector<32x32xf32>
    %52 = vector.extract_strided_slice %10 {offsets = [0, 16], sizes = [32, 8], strides = [1, 1]} : vector<32x96xf32> to vector<32x8xf32>
    %53 = vector.extract_strided_slice %10 {offsets = [0, 48], sizes = [32, 8], strides = [1, 1]} : vector<32x96xf32> to vector<32x8xf32>
    %54 = vector.extract_strided_slice %10 {offsets = [0, 80], sizes = [32, 8], strides = [1, 1]} : vector<32x96xf32> to vector<32x8xf32>
    %cst_28 = arith.constant dense<0.000000e+00> : vector<32x32xf32>
    %55 = tpu.matmul %52, %53, %cst_28 {dimension_numbers = #tpu.dot_dimension_numbers<[1], [1], [0], [0], [0, 0, 1, 0], [], []>} : vector<32x8xf32>, vector<32x8xf32>, vector<32x32xf32> -> vector<32x32xf32>
    %c0_29 = arith.constant 0 : index
    %c0_30 = arith.constant 0 : index
    %56 = vector.load %arg4[%c0_29, %c0_30] : memref<32x32xf32, #tpu.memory_space<vmem>>, vector<32x32xf32>
    %57 = arith.addf %55, %56 : vector<32x32xf32>
    %cst_31 = arith.constant dense<0xFF800000> : vector<32xf32>
    %58 = vector.multi_reduction <maximumf>, %57, %cst_31 [1] : vector<32x32xf32> to vector<32xf32>
    %59 = vector.shape_cast %58 : vector<32xf32> to vector<32x1xf32>
    %60 = vector.broadcast %59 : vector<32x1xf32> to vector<32x32xf32>
    %61 = arith.subf %57, %60 : vector<32x32xf32>
    %62 = math.exp %61 : vector<32x32xf32>
    %cst_32 = arith.constant dense<0.000000e+00> : vector<32xf32>
    %63 = vector.multi_reduction <add>, %62, %cst_32 [1] : vector<32x32xf32> to vector<32xf32>
    %64 = vector.shape_cast %63 : vector<32xf32> to vector<32x1xf32>
    %65 = vector.broadcast %64 : vector<32x1xf32> to vector<32x32xf32>
    %66 = arith.divf %62, %65 : vector<32x32xf32>
    %cst_33 = arith.constant dense<0.000000e+00> : vector<32x8xf32>
    %67 = tpu.matmul %66, %54, %cst_33 {dimension_numbers = #tpu.dot_dimension_numbers<[1], [0], [0], [1], [0, 0, 1, 1], [], []>} : vector<32x32xf32>, vector<32x8xf32>, vector<32x8xf32> -> vector<32x8xf32>
    %c0_34 = arith.constant 0 : index
    %c16 = arith.constant 16 : index
    %c0_35 = arith.constant 0 : index
    %68 = vector.load %arg7[%c0_34, %c16, %c0_35] : memref<1x32x32xf32, #tpu.memory_space<vmem>>, vector<1x8x32xf32>
    %69 = vector.shape_cast %68 : vector<1x8x32xf32> to vector<8x32xf32>
    %cst_36 = arith.constant dense<0.000000e+00> : vector<32x32xf32>
    %70 = tpu.matmul %67, %69, %cst_36 {dimension_numbers = #tpu.dot_dimension_numbers<[1], [0], [0], [1], [0, 0, 1, 1], [], []>} : vector<32x8xf32>, vector<8x32xf32>, vector<32x32xf32> -> vector<32x32xf32>
    %71 = arith.addf %51, %70 : vector<32x32xf32>
    %72 = vector.extract_strided_slice %10 {offsets = [0, 24], sizes = [32, 8], strides = [1, 1]} : vector<32x96xf32> to vector<32x8xf32>
    %73 = vector.extract_strided_slice %10 {offsets = [0, 56], sizes = [32, 8], strides = [1, 1]} : vector<32x96xf32> to vector<32x8xf32>
    %74 = vector.extract_strided_slice %10 {offsets = [0, 88], sizes = [32, 8], strides = [1, 1]} : vector<32x96xf32> to vector<32x8xf32>
    %cst_37 = arith.constant dense<0.000000e+00> : vector<32x32xf32>
    %75 = tpu.matmul %72, %73, %cst_37 {dimension_numbers = #tpu.dot_dimension_numbers<[1], [1], [0], [0], [0, 0, 1, 0], [], []>} : vector<32x8xf32>, vector<32x8xf32>, vector<32x32xf32> -> vector<32x32xf32>
    %c0_38 = arith.constant 0 : index
    %c0_39 = arith.constant 0 : index
    %76 = vector.load %arg4[%c0_38, %c0_39] : memref<32x32xf32, #tpu.memory_space<vmem>>, vector<32x32xf32>
    %77 = arith.addf %75, %76 : vector<32x32xf32>
    %cst_40 = arith.constant dense<0xFF800000> : vector<32xf32>
    %78 = vector.multi_reduction <maximumf>, %77, %cst_40 [1] : vector<32x32xf32> to vector<32xf32>
    %79 = vector.shape_cast %78 : vector<32xf32> to vector<32x1xf32>
    %80 = vector.broadcast %79 : vector<32x1xf32> to vector<32x32xf32>
    %81 = arith.subf %77, %80 : vector<32x32xf32>
    %82 = math.exp %81 : vector<32x32xf32>
    %cst_41 = arith.constant dense<0.000000e+00> : vector<32xf32>
    %83 = vector.multi_reduction <add>, %82, %cst_41 [1] : vector<32x32xf32> to vector<32xf32>
    %84 = vector.shape_cast %83 : vector<32xf32> to vector<32x1xf32>
    %85 = vector.broadcast %84 : vector<32x1xf32> to vector<32x32xf32>
    %86 = arith.divf %82, %85 : vector<32x32xf32>
    %cst_42 = arith.constant dense<0.000000e+00> : vector<32x8xf32>
    %87 = tpu.matmul %86, %74, %cst_42 {dimension_numbers = #tpu.dot_dimension_numbers<[1], [0], [0], [1], [0, 0, 1, 1], [], []>} : vector<32x32xf32>, vector<32x8xf32>, vector<32x8xf32> -> vector<32x8xf32>
    %c0_43 = arith.constant 0 : index
    %c24 = arith.constant 24 : index
    %c0_44 = arith.constant 0 : index
    %88 = vector.load %arg7[%c0_43, %c24, %c0_44] : memref<1x32x32xf32, #tpu.memory_space<vmem>>, vector<1x8x32xf32>
    %89 = vector.shape_cast %88 : vector<1x8x32xf32> to vector<8x32xf32>
    %cst_45 = arith.constant dense<0.000000e+00> : vector<32x32xf32>
    %90 = tpu.matmul %87, %89, %cst_45 {dimension_numbers = #tpu.dot_dimension_numbers<[1], [0], [0], [1], [0, 0, 1, 1], [], []>} : vector<32x8xf32>, vector<8x32xf32>, vector<32x32xf32> -> vector<32x32xf32>
    %91 = arith.addf %71, %90 : vector<32x32xf32>
    %c0_46 = arith.constant 0 : index
    %c0_47 = arith.constant 0 : index
    %c0_48 = arith.constant 0 : index
    %92 = vector.load %arg8[%c0_46, %c0_47, %c0_48] : memref<1x1x32xf32, #tpu.memory_space<vmem>>, vector<1x1x32xf32>
    %93 = vector.shape_cast %92 : vector<1x1x32xf32> to vector<1x32xf32>
    %94 = vector.broadcast %93 : vector<1x32xf32> to vector<32x32xf32>
    %95 = arith.addf %91, %94 : vector<32x32xf32>
    %96 = arith.addf %3, %95 : vector<32x32xf32>
    %c0_49 = arith.constant 0 : index
    %c0_50 = arith.constant 0 : index
    %c0_51 = arith.constant 0 : index
    %97 = vector.load %arg9[%c0_49, %c0_50, %c0_51] : memref<1x1x32xf32, #tpu.memory_space<vmem>>, vector<1x1x32xf32>
    %98 = vector.shape_cast %97 : vector<1x1x32xf32> to vector<1x32xf32>
    %c0_52 = arith.constant 0 : index
    %c0_53 = arith.constant 0 : index
    %c0_54 = arith.constant 0 : index
    %99 = vector.load %arg10[%c0_52, %c0_53, %c0_54] : memref<1x1x32xf32, #tpu.memory_space<vmem>>, vector<1x1x32xf32>
    %100 = vector.shape_cast %99 : vector<1x1x32xf32> to vector<1x32xf32>
    %cst_55 = arith.constant dense<0.000000e+00> : vector<32xf32>
    %101 = vector.multi_reduction <add>, %96, %cst_55 [1] : vector<32x32xf32> to vector<32xf32>
    %102 = vector.shape_cast %101 : vector<32xf32> to vector<32x1xf32>
    %cst_56 = arith.constant 3.200000e+01 : f32
    %103 = vector.broadcast %cst_56 : f32 to vector<32x1xf32>
    %104 = arith.divf %102, %103 : vector<32x1xf32>
    %105 = vector.broadcast %104 : vector<32x1xf32> to vector<32x32xf32>
    %106 = arith.subf %96, %105 : vector<32x32xf32>
    %107 = arith.mulf %106, %106 : vector<32x32xf32>
    %cst_57 = arith.constant dense<0.000000e+00> : vector<32xf32>
    %108 = vector.multi_reduction <add>, %107, %cst_57 [1] : vector<32x32xf32> to vector<32xf32>
    %109 = vector.shape_cast %108 : vector<32xf32> to vector<32x1xf32>
    %cst_58 = arith.constant 3.200000e+01 : f32
    %110 = vector.broadcast %cst_58 : f32 to vector<32x1xf32>
    %111 = arith.divf %109, %110 : vector<32x1xf32>
    %cst_59 = arith.constant 9.99999974E-6 : f32
    %112 = vector.broadcast %cst_59 : f32 to vector<32x1xf32>
    %113 = arith.addf %111, %112 : vector<32x1xf32>
    %114 = math.rsqrt %113 : vector<32x1xf32>
    %115 = vector.broadcast %114 : vector<32x1xf32> to vector<32x32xf32>
    %116 = arith.mulf %106, %115 : vector<32x32xf32>
    %117 = vector.broadcast %98 : vector<1x32xf32> to vector<32x32xf32>
    %118 = arith.mulf %116, %117 : vector<32x32xf32>
    %119 = vector.broadcast %100 : vector<1x32xf32> to vector<32x32xf32>
    %120 = arith.addf %118, %119 : vector<32x32xf32>
    %121 = arith.truncf %120 : vector<32x32xf32> to vector<32x32xbf16>
    %c0_60 = arith.constant 0 : index
    %c0_61 = arith.constant 0 : index
    %c0_62 = arith.constant 0 : index
    %122 = vector.load %arg11[%c0_60, %c0_61, %c0_62] : memref<1x32x2048xbf16, #tpu.memory_space<vmem>>, vector<1x32x2048xbf16>
    %123 = vector.shape_cast %122 : vector<1x32x2048xbf16> to vector<32x2048xbf16>
    %cst_63 = arith.constant dense<0.000000e+00> : vector<32x2048xf32>
    %124 = tpu.matmul %121, %123, %cst_63 {dimension_numbers = #tpu.dot_dimension_numbers<[1], [0], [0], [1], [0, 0, 1, 1], [], []>} : vector<32x32xbf16>, vector<32x2048xbf16>, vector<32x2048xf32> -> vector<32x2048xf32>
    %c0_64 = arith.constant 0 : index
    %c0_65 = arith.constant 0 : index
    %c0_66 = arith.constant 0 : index
    %125 = vector.load %arg12[%c0_64, %c0_65, %c0_66] : memref<1x1x2048xf32, #tpu.memory_space<vmem>>, vector<1x1x2048xf32>
    %126 = vector.shape_cast %125 : vector<1x1x2048xf32> to vector<1x2048xf32>
    %127 = vector.broadcast %126 : vector<1x2048xf32> to vector<32x2048xf32>
    %128 = arith.addf %124, %127 : vector<32x2048xf32>
    %cst_67 = arith.constant 0.000000e+00 : f32
    %129 = vector.broadcast %cst_67 : f32 to vector<32x2048xf32>
    %130 = arith.maximumf %128, %129 : vector<32x2048xf32>
    %131 = arith.truncf %130 : vector<32x2048xf32> to vector<32x2048xbf16>
    %c0_68 = arith.constant 0 : index
    %c0_69 = arith.constant 0 : index
    %c0_70 = arith.constant 0 : index
    %132 = vector.load %arg13[%c0_68, %c0_69, %c0_70] : memref<1x2048x32xbf16, #tpu.memory_space<vmem>>, vector<1x2048x32xbf16>
    %133 = vector.shape_cast %132 : vector<1x2048x32xbf16> to vector<2048x32xbf16>
    %cst_71 = arith.constant dense<0.000000e+00> : vector<32x32xf32>
    %134 = tpu.matmul %131, %133, %cst_71 {dimension_numbers = #tpu.dot_dimension_numbers<[1], [0], [0], [1], [0, 0, 1, 1], [], []>} : vector<32x2048xbf16>, vector<2048x32xbf16>, vector<32x32xf32> -> vector<32x32xf32>
    %c0_72 = arith.constant 0 : index
    %c0_73 = arith.constant 0 : index
    %c0_74 = arith.constant 0 : index
    %135 = vector.load %arg14[%c0_72, %c0_73, %c0_74] : memref<1x1x32xf32, #tpu.memory_space<vmem>>, vector<1x1x32xf32>
    %136 = vector.shape_cast %135 : vector<1x1x32xf32> to vector<1x32xf32>
    %137 = vector.broadcast %136 : vector<1x32xf32> to vector<32x32xf32>
    %138 = arith.addf %134, %137 : vector<32x32xf32>
    %139 = arith.addf %120, %138 : vector<32x32xf32>
    %c0_75 = arith.constant 0 : index
    %c0_76 = arith.constant 0 : index
    %c0_77 = arith.constant 0 : index
    %140 = vector.load %arg15[%c0_75, %c0_76, %c0_77] : memref<1x1x32xf32, #tpu.memory_space<vmem>>, vector<1x1x32xf32>
    %141 = vector.shape_cast %140 : vector<1x1x32xf32> to vector<1x32xf32>
    %c0_78 = arith.constant 0 : index
    %c0_79 = arith.constant 0 : index
    %c0_80 = arith.constant 0 : index
    %142 = vector.load %arg16[%c0_78, %c0_79, %c0_80] : memref<1x1x32xf32, #tpu.memory_space<vmem>>, vector<1x1x32xf32>
    %143 = vector.shape_cast %142 : vector<1x1x32xf32> to vector<1x32xf32>
    %cst_81 = arith.constant dense<0.000000e+00> : vector<32xf32>
    %144 = vector.multi_reduction <add>, %139, %cst_81 [1] : vector<32x32xf32> to vector<32xf32>
    %145 = vector.shape_cast %144 : vector<32xf32> to vector<32x1xf32>
    %cst_82 = arith.constant 3.200000e+01 : f32
    %146 = vector.broadcast %cst_82 : f32 to vector<32x1xf32>
    %147 = arith.divf %145, %146 : vector<32x1xf32>
    %148 = vector.broadcast %147 : vector<32x1xf32> to vector<32x32xf32>
    %149 = arith.subf %139, %148 : vector<32x32xf32>
    %150 = arith.mulf %149, %149 : vector<32x32xf32>
    %cst_83 = arith.constant dense<0.000000e+00> : vector<32xf32>
    %151 = vector.multi_reduction <add>, %150, %cst_83 [1] : vector<32x32xf32> to vector<32xf32>
    %152 = vector.shape_cast %151 : vector<32xf32> to vector<32x1xf32>
    %cst_84 = arith.constant 3.200000e+01 : f32
    %153 = vector.broadcast %cst_84 : f32 to vector<32x1xf32>
    %154 = arith.divf %152, %153 : vector<32x1xf32>
    %cst_85 = arith.constant 9.99999974E-6 : f32
    %155 = vector.broadcast %cst_85 : f32 to vector<32x1xf32>
    %156 = arith.addf %154, %155 : vector<32x1xf32>
    %157 = math.rsqrt %156 : vector<32x1xf32>
    %158 = vector.broadcast %157 : vector<32x1xf32> to vector<32x32xf32>
    %159 = arith.mulf %149, %158 : vector<32x32xf32>
    %160 = vector.broadcast %141 : vector<1x32xf32> to vector<32x32xf32>
    %161 = arith.mulf %159, %160 : vector<32x32xf32>
    %162 = vector.broadcast %143 : vector<1x32xf32> to vector<32x32xf32>
    %163 = arith.addf %161, %162 : vector<32x32xf32>
    %c0_86 = arith.constant 0 : index
    %c0_87 = arith.constant 0 : index
    %164 = vector.load %arg21[%c0_86, %c0_87] : memref<32x32xf32, #tpu.memory_space<vmem>>, vector<32x32xf32>
    tpu.vector_store %arg21[%c0_86, %c0_87], %163 {strides = array<i32>} : memref<32x32xf32, #tpu.memory_space<vmem>>, vector<32x32xf32>,
    %c1_i32 = arith.constant 1 : i32
    %165 = arith.cmpi eq, %arg0, %c1_i32 : i32
    %166 = arith.extui %165 : i1 to i32
    %c0_i32_88 = arith.constant 0 : i32
    %167 = arith.cmpi ne, %166, %c0_i32_88 : i32
    scf.if %167 {
      %c0_89 = arith.constant 0 : index
      %c0_90 = arith.constant 0 : index
      %168 = vector.load %arg17[%c0_89, %c0_90] : memref<4x32xf32, #tpu.memory_space<vmem>>, vector<4x32xf32>
      %cst_91 = arith.constant dense<0.000000e+00> : vector<4x32xf32>
      %169 = tpu.matmul %168, %163, %cst_91 {dimension_numbers = #tpu.dot_dimension_numbers<[1], [0], [0], [1], [0, 0, 1, 1], [], []>} : vector<4x32xf32>, vector<32x32xf32>, vector<4x32xf32> -> vector<4x32xf32>
      %c0_92 = arith.constant 0 : index
      %c0_93 = arith.constant 0 : index
      %170 = vector.load %arg18[%c0_92, %c0_93] : memref<32x5xf32, #tpu.memory_space<vmem>>, vector<32x5xf32>
      %cst_94 = arith.constant dense<0.000000e+00> : vector<4x5xf32>
      %171 = tpu.matmul %169, %170, %cst_94 {dimension_numbers = #tpu.dot_dimension_numbers<[1], [0], [0], [1], [0, 0, 1, 1], [], []>} : vector<4x32xf32>, vector<32x5xf32>, vector<4x5xf32> -> vector<4x5xf32>
      %c0_95 = arith.constant 0 : index
      %c0_96 = arith.constant 0 : index
      %172 = vector.load %arg19[%c0_95, %c0_96] : memref<1x5xf32, #tpu.memory_space<vmem>>, vector<1x5xf32>
      %173 = vector.broadcast %172 : vector<1x5xf32> to vector<4x5xf32>
      %174 = arith.addf %171, %173 : vector<4x5xf32>
      %c0_97 = arith.constant 0 : index
      %c0_98 = arith.constant 0 : index
      %175 = vector.load %arg20[%c0_97, %c0_98] : memref<4x5xf32, #tpu.memory_space<vmem>>, vector<4x5xf32>
      tpu.vector_store %arg20[%c0_97, %c0_98], %174 {strides = array<i32>} : memref<4x5xf32, #tpu.memory_space<vmem>>, vector<4x5xf32>,
    } else {
    }
    return
  }
  func.func @transform_0(%arg0: i32) -> (i32, i32) {
    %c0_i32 = arith.constant 0 : i32
    %c0_i32_0 = arith.constant 0 : i32
    %c0_i32_1 = arith.constant 0 : i32
    return %c0_i32, %c0_i32_0 : i32, i32
  }
  func.func @transform_1(%arg0: i32) -> (i32, i32) {
    %c0_i32 = arith.constant 0 : i32
    %c0_i32_0 = arith.constant 0 : i32
    %c0_i32_1 = arith.constant 0 : i32
    return %c0_i32, %c0_i32_0 : i32, i32
  }
  func.func @transform_2(%arg0: i32) -> (i32, i32) {
    %c0_i32 = arith.constant 0 : i32
    %c0_i32_0 = arith.constant 0 : i32
    %c0_i32_1 = arith.constant 0 : i32
    return %c0_i32, %c0_i32_0 : i32, i32
  }
  func.func @transform_3(%arg0: i32) -> (i32, i32) {
    %c0_i32 = arith.constant 0 : i32
    %c0_i32_0 = arith.constant 0 : i32
    %c0_i32_1 = arith.constant 0 : i32
    return %c0_i32, %c0_i32_0 : i32, i32
  }
  func.func @transform_4(%arg0: i32) -> (i32, i32, i32) {
    %c0_i32 = arith.constant 0 : i32
    %c0_i32_0 = arith.constant 0 : i32
    %c0_i32_1 = arith.constant 0 : i32
    return %arg0, %c0_i32, %c0_i32_0 : i32, i32, i32
  }
  func.func @transform_5(%arg0: i32) -> (i32, i32, i32) {
    %c0_i32 = arith.constant 0 : i32
    %c0_i32_0 = arith.constant 0 : i32
    %c0_i32_1 = arith.constant 0 : i32
    return %arg0, %c0_i32, %c0_i32_0 : i32, i32, i32
  }
  func.func @transform_6(%arg0: i32) -> (i32, i32, i32) {
    %c0_i32 = arith.constant 0 : i32
    %c0_i32_0 = arith.constant 0 : i32
    %c0_i32_1 = arith.constant 0 : i32
    return %arg0, %c0_i32, %c0_i32_0 : i32, i32, i32
  }
  func.func @transform_7(%arg0: i32) -> (i32, i32, i32) {
    %c0_i32 = arith.constant 0 : i32
    %c0_i32_0 = arith.constant 0 : i32
    %c0_i32_1 = arith.constant 0 : i32
    return %arg0, %c0_i32, %c0_i32_0 : i32, i32, i32
  }
  func.func @transform_8(%arg0: i32) -> (i32, i32, i32) {
    %c0_i32 = arith.constant 0 : i32
    %c0_i32_0 = arith.constant 0 : i32
    %c0_i32_1 = arith.constant 0 : i32
    return %arg0, %c0_i32, %c0_i32_0 : i32, i32, i32
  }
  func.func @transform_9(%arg0: i32) -> (i32, i32, i32) {
    %c0_i32 = arith.constant 0 : i32
    %c0_i32_0 = arith.constant 0 : i32
    %c0_i32_1 = arith.constant 0 : i32
    return %arg0, %c0_i32, %c0_i32_0 : i32, i32, i32
  }
  func.func @transform_10(%arg0: i32) -> (i32, i32, i32) {
    %c0_i32 = arith.constant 0 : i32
    %c0_i32_0 = arith.constant 0 : i32
    %c0_i32_1 = arith.constant 0 : i32
    return %arg0, %c0_i32, %c0_i32_0 : i32, i32, i32
  }
  func.func @transform_11(%arg0: i32) -> (i32, i32, i32) {
    %c0_i32 = arith.constant 0 : i32
    %c0_i32_0 = arith.constant 0 : i32
    %c0_i32_1 = arith.constant 0 : i32
    return %arg0, %c0_i32, %c0_i32_0 : i32, i32, i32
  }
  func.func @transform_12(%arg0: i32) -> (i32, i32, i32) {
    %c0_i32 = arith.constant 0 : i32
    %c0_i32_0 = arith.constant 0 : i32
    %c0_i32_1 = arith.constant 0 : i32
    return %arg0, %c0_i32, %c0_i32_0 : i32, i32, i32
  }
  func.func @transform_13(%arg0: i32) -> (i32, i32, i32) {
    %c0_i32 = arith.constant 0 : i32
    %c0_i32_0 = arith.constant 0 : i32
    %c0_i32_1 = arith.constant 0 : i32
    return %arg0, %c0_i32, %c0_i32_0 : i32, i32, i32
  }
  func.func @transform_14(%arg0: i32) -> (i32, i32, i32) {
    %c0_i32 = arith.constant 0 : i32
    %c0_i32_0 = arith.constant 0 : i32
    %c0_i32_1 = arith.constant 0 : i32
    return %arg0, %c0_i32, %c0_i32_0 : i32, i32, i32
  }
  func.func @transform_15(%arg0: i32) -> (i32, i32, i32) {
    %c0_i32 = arith.constant 0 : i32
    %c0_i32_0 = arith.constant 0 : i32
    %c0_i32_1 = arith.constant 0 : i32
    return %arg0, %c0_i32, %c0_i32_0 : i32, i32, i32
  }
  func.func @transform_16(%arg0: i32) -> (i32, i32) {
    %c0_i32 = arith.constant 0 : i32
    %c0_i32_0 = arith.constant 0 : i32
    %c0_i32_1 = arith.constant 0 : i32
    return %c0_i32, %c0_i32_0 : i32, i32
  }
  func.func @transform_17(%arg0: i32) -> (i32, i32) {
    %c0_i32 = arith.constant 0 : i32
    %c0_i32_0 = arith.constant 0 : i32
    %c0_i32_1 = arith.constant 0 : i32
    return %c0_i32, %c0_i32_0 : i32, i32
  }
  func.func @transform_18(%arg0: i32) -> (i32, i32) {
    %c0_i32 = arith.constant 0 : i32
    %c0_i32_0 = arith.constant 0 : i32
    %c0_i32_1 = arith.constant 0 : i32
    return %c0_i32, %c0_i32_0 : i32, i32
  }
  func.func @transform_19(%arg0: i32) -> (i32, i32) {
    %c0_i32 = arith.constant 0 : i32
    %c0_i32_0 = arith.constant 0 : i32
    %c0_i32_1 = arith.constant 0 : i32
    return %c0_i32, %c0_i32_0 : i32, i32
  }
}

</mosaic_0001>

<bundles_post_ra>
// kernel: time_series_transformer.1
= control target key start
LH: loop header
LB: loop body
LE: loop exit
PB: predicated region body
PF: predicated region fallthrough
CT: control target
= control target key end

     0   :  { %s7490_s0 = inlined_call_operand.vmem [shape: f32[32,8], index: 0, kind: input, shape index: {}]   ;;  %s7491_s1 = inlined_call_operand.vmem [shape: f32[32,32], index: 1, kind: input, shape index: {}]   ;;  %s7492_s2 = inlined_call_operand.vmem [shape: f32[8,32], index: 2, kind: input, shape index: {}]   ;;  %s7493_s3 = inlined_call_operand.vmem [shape: f32[32,32], index: 3, kind: input, shape index: {}]   ;;  %s7494_s4 = inlined_call_operand.vmem [shape: f32[2,32,96], index: 4, kind: input, shape index: {}]   ;;  %s7495_s5 = inlined_call_operand.vmem [shape: f32[2,1,96], index: 5, kind: input, shape index: {}]   ;;  %s7496_s6 = inlined_call_operand.vmem [shape: f32[2,32,32], index: 6, kind: input, shape index: {}]   ;;  %s7497_s7 = inlined_call_operand.vmem [shape: f32[2,1,32], index: 7, kind: input, shape index: {}]   ;;  %s7498_s8 = inlined_call_operand.vmem [shape: f32[2,1,32], index: 8, kind: input, shape index: {}]   ;;  %s7499_s9 = inlined_call_operand.vmem [shape: f32[2,1,32], index: 9, kind: input, shape index: {}]   ;;  %s7500_s10 = inlined_call_operand.vmem [shape: bf16[2,32,2048], index: 10, kind: input, shape index: {}]   ;;  %s7501_s11 = inlined_call_operand.vmem [shape: f32[2,1,2048], index: 11, kind: input, shape index: {}]   ;;  %s7502_s12 = inlined_call_operand.vmem [shape: bf16[2,2048,32], index: 12, kind: input, shape index: {}]   ;;  %s7503_s13 = inlined_call_operand.vmem [shape: f32[2,1,32], index: 13, kind: input, shape index: {}]   ;;  %s7504_s14 = inlined_call_operand.vmem [shape: f32[2,1,32], index: 14, kind: input, shape index: {}]   ;;  %s7505_s15 = inlined_call_operand.vmem [shape: f32[2,1,32], index: 15, kind: input, shape index: {}]   ;;  %s7506_s16 = inlined_call_operand.vmem [shape: f32[4,32], index: 16, kind: input, shape index: {}]   ;;  %s7507_s17 = inlined_call_operand.vmem [shape: f32[32,5], index: 17, kind: input, shape index: {}]   ;;  %s7508_s18 = inlined_call_operand.vmem [shape: f32[1,5], index: 18, kind: input, shape index: {}]   ;;  %s7509_s19 = inlined_call_operand.hbm [shape: f32[4,5], index: 19, kind: output, shape index: {}]  }
   0x1   :  { %7516 = sst [smem:[#allocation7_spill]] %s7490_s0 }
   0x2   :  { %7517 = sst [smem:[#allocation8_spill]] %s7491_s1 }
   0x3   :  { %7518 = sst [smem:[#allocation9_spill]] %s7492_s2 }
   0x4   :  { %7519 = sst [smem:[#allocation10_spill]] %s7493_s3 }
   0x5   :  { %7520 = sst [smem:[#allocation11_spill]] %s7494_s4 }
   0x6   :  { %7521 = sst [smem:[#allocation12_spill]] %s7496_s6 }
   0x7   :  { %7522 = sst [smem:[#allocation13_spill]] %s7500_s10 }
   0x8   :  { %7523 = sst [smem:[#allocation14_spill]] %s7506_s16 }
   0x9   :  { %7524 = sst [smem:[#allocation15_spill]] %s7507_s17 }
   0xa   :  { %7525 = sst [smem:[#allocation16_spill]] %s7508_s18 }
   0xb   :  { %7526 = sst [smem:[#allocation17_spill]] %s7509_s19 }
   0xc   :  { %24 = vsyncpa [#allocation4], 0  ;;  %s6585_s0 = smov 0  }
   0xd LB: > { %7527 = sst [smem:[#allocation6_spill]] %s6467_s0  ;;  %s6591_s30 = sadd.s32 4294967295, %s6467_s0   ;;  %s6467_s0 = sphi %s6585_s0, %s30_s0  }
   0xe   : > { %p5198_p0 = scmp.ge.s32.totalorder %s6467_s0, 1  ;;  %p628_p1 = scmp.lt.s32.totalorder %s6467_s0, 3 }
  0x10   : > { %p629_p2 = pnand %p5198_p0, %p628_p1 }
  0x11   : > { %p719_p3 = scmp.lt.s32.totalorder (!%p629_p2), %s6591_s30, 1  ;;  %s7528_s4 = sld [smem:[#allocation11_spill]] (!%p629_p2) }
  0x12   : > { %632 = sbr.rel (%p629_p2) target bundleno = 4394 (0x112a), region = 96  ;;  %s7529_s6 = sld [smem:[#allocation12_spill]] (!%p629_p2) }
  0x13   : > { %s7530_s10 = sld [smem:[#allocation13_spill]] (!%p629_p2)  ;;  %p5208_p4 = scmp.ne.s32.totalorder (!%p629_p2), %s6591_s30, 0 }
  0x19   : > { %s6597_s20 = scalar_select %p719_p3, %s6591_s30, 1 }
  0x1a   : > { %768 = sbr.rel (%p5208_p4) target bundleno = 257 (0x101), region = 100  ;;  %s7531_s0 = sld [smem:[#allocation9_spill]] (!%p5208_p4)  ;;  %vm778_vm0 = vcmask (!%p5208_p4), 64512   ;;  %vm876_vm1 = vcmask (!%p5208_p4), 261120  }
  0x1b   : > { %s5472_s21 = sshll.u32 %s6597_s20, 5  ;;  %s5474_s23 = sshll.u32 %s6597_s20, 8 }
  0x1c   : > { %s6607_s25 = scalar_lea.vmem %s7528_s4, %s5472_s21  ;;  %s6612_s27 = scalar_lea.vmem %s7529_s6, %s5472_s21 }
  0x1d   : > { %s6630_s17 = scalar_lea.vmem %s7530_s10, %s5474_s23  ;;  %s5205_s21 = sshll.u32 %s6597_s20, 4 }
  0x1e   : > { %s6636_s28 = scalar_lea.vmem %s7501_s11, %s5205_s21  ;;  %s5475_s29 = sshll.u32 %s6597_s20, 10 }
  0x1f   : > { %s6642_s19 = scalar_lea.vmem %s7502_s12, %s5475_s29  ;;  %s757_s2 = scalar_lea.vmem %s7503_s13, %s6597_s20 }
  0x20   : > { %s760_s23 = scalar_lea.vmem %s7504_s14, %s6597_s20  ;;  %s763_s3 = scalar_lea.vmem %s7505_s15, %s6597_s20  ;;  %v773_v0 = vld [vmem:[%s7531_s0] sm:$0xff] (!%p5208_p4) }
  0x21   : > { %s7532_s10 = sld [smem:[#allocation7_spill]]  ;;  %5807 = vmatprep.subr.mxu0 %v773_v0  ;;  %6095 = vmatprep.subr.mxu1 %v773_v0  ;;  %s7533_s0 = sld [smem:[#allocation8_spill]] }
  0x22   : > { %5808 = vmatpush3.msra.mxu0 %v773_v0  ;;  %6096 = vmatpush3.msra.mxu1 %v773_v0 }
  0x27   : > { %v769_v1 = vld [vmem:[%s7532_s10] sm:$0xff]  ;;  %v771_v2 = vld [vmem:[%s7532_s10 + $0x10] sm:$0xff]  ;;  %v770_v3 = vld [vmem:[%s7532_s10 + $0x8] sm:$0xff]  ;;  %s7534_s29 = smov %s7533_s0 }
  0x28   : > { %v772_v4 = vld [vmem:[%s7532_s10 + $0x18] sm:$0xff]  ;;  %5809 = vmatprep.mubr.msk.f32.mxu0 %vm778_vm0, %v769_v1  ;;  %5812 = vmatprep.mubr.msk.f32.mxu1 %vm778_vm0, %v771_v2  ;;  %v775_v5 = vld [vmem:[%s7533_s0 + $0x8] sm:$0xff]  ;;  %v774_v7 = vld [vmem:[%s7534_s29] sm:$0xff] }
  0x29   : > { %5810 = vmatmul.mubr.msk.f32.vlgmr.msra.gmra.mrb[0].mxu0 %vm778_vm0, %v770_v3  ;;  %5813 = vmatmul.mubr.msk.f32.vlgmr.msra.gmra.mrb[0].mxu1 %vm778_vm0, %v772_v4  ;;  %v777_v6 = vld [vmem:[%s7534_s29 + $0x18] sm:$0xff]  ;;  %v776_v8 = vld [vmem:[%s7534_s29 + $0x10] sm:$0xff] }
  0xfc   : > { %v5811_v9 = vpop.f32.mrb[0].mxu0  ;;  %v5814_v10 = vpop.f32.mrb[0].mxu1 }
  0xfd   : > { %v863_v11 = vadd.f32 %v5811_v9, %v775_v5  ;;  %v873_v12 = vadd.f32 %v5814_v10, %v777_v6  ;;  %v857_v13 = vpop.f32.mrb[1].mxu0  ;;  %v867_v14 = vpop.f32.mrb[1].mxu1 }
  0xfe   : > { %v858_v15 = vadd.f32 %v857_v13, %v774_v7  ;;  %v868_v16 = vadd.f32 %v867_v14, %v776_v8 }
  0xff   : > { %878 = vst.msk [vmem:[#allocation2 + $0x8] sm:$0xff] %vm876_vm1, %v863_v11  ;;  %880 = vst.msk [vmem:[#allocation2 + $0x18] sm:$0xff] %vm876_vm1, %v873_v12 }
 0x100   : > { %877 = vst.msk [vmem:[#allocation2] sm:$0xff] %vm876_vm1, %v858_v15  ;;  %879 = vst.msk [vmem:[#allocation2 + $0x10] sm:$0xff] %vm876_vm1, %v868_v16 }
 0x101 PF: > { %v885_v17 = vld [vmem:[%s6607_s25] sm:$0xff]  ;;  %v886_v18 = vld [vmem:[%s6607_s25 + $0x8] sm:$0xff]  ;;  %v887_v19 = vld [vmem:[%s6607_s25 + $0x10] sm:$0xff]  ;;  %vm896_vm2 = vcmask 261120   ;;  %vm1010_vm3 = vcmask 64512   ;;  %s6469_s26 = smov 96  }
 0x102   : > { %v5995_v20 = vpack.c.bf16 %v886_v18, %v885_v17  ;;  %v888_v21 = vld [vmem:[%s6607_s25 + $0x18] sm:$0xff]  ;;  %s7535_s25 = scalar_lea.vmem %s7495_s5, %s6597_s20  ;;  %vm6719_vm4 = vmpackc.low %vm1010_vm3, %vm1010_vm3  ;;  %s7538_s1 = sld [smem:[#allocation10_spill]] }
 0x103   : > { %v5999_v23 = vpack.c.bf16 %v888_v21, %v887_v19  ;;  %v5213_v27 = vld [vmem:[%s7535_s25] ss:$0 sm:$0xff]  ;;  %s6470_s25 = smov 64   ;;  %s6472_s0 = smov 120  }
 0x104   : > { %5996 = vmatprep.subr.bf16.mxu0 %v5995_v20  ;;  %s6473_s18 = smov 80   ;;  %s6474_s22 = smov 112  }
 0x105   : > { %5998 = vmatpush3.bf16.msra.mxu0 %v5995_v20  ;;  %s6475_s6 = smov 56   ;;  %s6476_s16 = smov 72  }
 0x106   : > { %6000 = vmatprep.subr.bf16.mxu0 %v5999_v23  ;;  %v882_v24 = vld [vmem:[#allocation2 + $0x8] sm:$0xff]  ;;  %v884_v26 = vld [vmem:[#allocation2 + $0x18] sm:$0xff]  ;;  %s6477_s4 = smov 104   ;;  %s6478_s24 = smov 48  }
 0x107   : > { %v881_v22 = vld [vmem:[#allocation2] sm:$0xff]  ;;  %v883_v25 = vld [vmem:[#allocation2 + $0x10] sm:$0xff]  ;;  %s6479_s21 = smov 40   ;;  %p5464_p5 = scmp.ne.s32.totalorder %s6591_s30, 1 }
 0x108   : > { %5823 = vmatprep.mubr.msk.f32.mxu0 %vm896_vm2, %v881_v22  ;;  %v6740_v47 = vld [vmem:[%s7538_s1 + $0x8] sm:$0xff]  ;;  %v6745_v49 = vld [vmem:[%s7538_s1] sm:$0xff]  ;;  %v6753_v54 = vld [vmem:[%s7538_s1 + $0x10] sm:$0xff]  ;;  %vm6482_vm5 = vmmov (!%p5464_p5), 0   ;;  %vm5036_vm6 = vcmask (!%p5464_p5), 35840  }
 0x109   : > { %6002 = vmatpush3.bf16.msra.mxu0 %v5999_v23  ;;  %v6758_v55 = vld [vmem:[%s7538_s1 + $0x18] sm:$0xff] }
 0x10c   : > { %5824 = vmatmul.mubr.msk.f32.vlgmr.msra.gmra.mrb[0].mxu0 %vm896_vm2, %v882_v24 }
 0x10d   : > { %5826 = vmatprep.mubr.msk.f32.mxu0 %vm896_vm2, %v883_v25 }
 0x110   : > { %5827 = vmatmul.mubr.msk.f32.gmra.mrb[2].mxu0 %vm896_vm2, %v884_v26 }
 0x1df   : > { %v5825_v28 = vpop.f32.mrb[0].mxu0 }
 0x1e0   : > { %v6697_v29 = vadd.f32 %v5825_v28, %v5213_v27  ;;  %v975_v30 = vpop.f32.mrb[1].mxu0 }
 0x1e1   : > { %v6699_v31 = vadd.f32 %v5213_v27, %v975_v30 }
 0x1e3   : > { %5837 = vmatprep.mubr.msk.f32.mxu1 %vm1010_vm3, %v6699_v31  ;;  %v6705_v32 = vpack.i.bf16 %v6697_v29, %v6699_v31  ;;  %v5828_v33 = vpop.f32.mrb[2].mxu0 }
 0x1e4   : > { %v6707_v34 = vadd.f32 %v5828_v33, %v5213_v27  ;;  %v985_v35 = vpop.f32.mrb[3].mxu0 }
 0x1e5   : > { %6140 = vrot.lane.b32.xlu0 %v6705_v32, %s6469_s26  ;;  %v6710_v36 = vadd.f32 %v5213_v27, %v985_v35 }
 0x1e7   : > { %v6714_v37 = vpack.i.bf16 %v6707_v34, %v6710_v36 }
 0x1e9   : > { %6145 = vrot.lane.b32.xlu0 %v6714_v37, %s6469_s26  ;;  %s6471_s26 = smov 88  }
 0x257   : > { %v6141_v38 = vpop.permute.xlu0 %6140 }
 0x258   : > { %v6143_v39 = vunpack.i.h.bf16 %v6141_v38  ;;  %v6142_v40 = vunpack.i.l.bf16 %v6141_v38 }
 0x25a   : > { %v6003_v42 = vpack.c.bf16 %v6143_v39, %v6142_v40 }
 0x25b   : > { %v6146_v43 = vpop.permute.xlu0 %6145 }
 0x25c   : > { %6005 = vmatprep.subr.msk.bf16.mxu1 %vm6719_vm4, %v6003_v42  ;;  %v6148_v44 = vunpack.i.h.bf16 %v6146_v43  ;;  %v6147_v45 = vunpack.i.l.bf16 %v6146_v43 }
 0x25d   : > { %6008 = vmatpush3.bf16.xpose.msk.msra.mxu1 %vm6719_vm4, %v6003_v42 }
 0x25e   : > { %v6009_v46 = vpack.c.bf16 %v6148_v44, %v6147_v45 }
 0x260   : > { %6011 = vmatprep.subr.msk.bf16.mxu1 %vm6719_vm4, %v6009_v46 }
 0x265   : > { %6014 = vmatpush3.bf16.xpose.msk.msra.mxu1 %vm6719_vm4, %v6009_v46 }
 0x26c   : > { %5838 = vmatmul.mubr.msk.f32.vlgmr.msra.gmra.mrb[0].mxu1 %vm1010_vm3, %v6697_v29 }
 0x26d   : > { %5840 = vmatprep.mubr.msk.f32.mxu1 %vm1010_vm3, %v6710_v36 }
 0x270   : > { %5841 = vmatmul.mubr.msk.f32.gmra.mrb[2].mxu1 %vm1010_vm3, %v6707_v34 }
 0x33f   : > { %v5839_v48 = vpop.f32.mrb[0].mxu1 }
 0x340   : > { %v1099_v50 = vadd.f32 %v5839_v48, %v6740_v47  ;;  %v1093_v51 = vpop.f32.mrb[1].mxu1 }
 0x341   : > { %v1094_v52 = vadd.f32 %v1093_v51, %v6745_v49 }
 0x342   : > { %v1115_v53 = vsel %vm896_vm2, %v1099_v50, -inf }
 0x343   : > { %1116 = vmax.xlane.f32.xlu1 %v1115_v53  ;;  %v5842_v56 = vpop.f32.mrb[2].mxu1  ;;  %v1112_v60 = vsel %vm896_vm2, %v1094_v52, -inf }
 0x344   : > { %v1103_v57 = vpop.f32.mrb[3].mxu1  ;;  %v1109_v59 = vadd.f32 %v5842_v56, %v6758_v55 }
 0x345   : > { %v1104_v58 = vadd.f32 %v1103_v57, %v6753_v54 }
 0x346   : > { %v1121_v62 = vsel %vm896_vm2, %v1109_v59, -inf }
 0x347   : > { %1113 = vmax.xlane.f32.xlu1 %v1112_v60  ;;  %v1118_v61 = vsel %vm896_vm2, %v1104_v58, -inf }
 0x348   : > { %1119 = vmax.xlane.f32.xlu0 %v1118_v61 }
 0x34b   : > { %1122 = vmax.xlane.f32.xlu1 %v1121_v62 }
 0x35c   : > { %6150 = vrot.lane.b32.xlu1 %v6705_v32, %s6470_s25 }
 0x35e   : > { %6155 = vrot.lane.b32.xlu0 %v6714_v37, %s6470_s25 }
 0x360   : > { %6160 = vrot.lane.b32.xlu1 %v6705_v32, %s6471_s26 }
 0x362   : > { %1270 = vrot.lane.b32.xlu0 %v6710_v36, %s6472_s0 }
 0x364   : > { %6165 = vrot.lane.b32.xlu1 %v6714_v37, %s6471_s26 }
 0x366   : > { %6170 = vrot.lane.b32.xlu0 %v6705_v32, %s6473_s18 }
 0x368   : > { %1266 = vrot.lane.b32.xlu1 %v6699_v31, %s6472_s0 }
 0x36a   : > { %1731 = vrot.lane.b32.xlu0 %v6699_v31, %s6474_s22 }
 0x36e   : > { %1735 = vrot.lane.b32.xlu0 %v6710_v36, %s6474_s22 }
 0x3d0   : > { %v1117_v63 = vpop.xlane.xlu1 %1116 }
 0x3d1   : > { %v1125_v0 = vsub.f32 %v1099_v50, %v1117_v63 }
 0x3d3   : > { %v1130_v1 = vmul.f32 1.442695, %v1125_v0 }
 0x3d4   : > { %v1114_v2 = vpop.xlane.xlu1 %1113 }
 0x3d5   : > { %6347 = vpow2.f32 %v1130_v1  ;;  %v1124_v3 = vsub.f32 %v1094_v52, %v1114_v2  ;;  %v1120_v4 = vpop.xlane.xlu0 %1119 }
 0x3d6   : > { %v1126_v24 = vsub.f32 %v1104_v58, %v1120_v4 }
 0x3d7   : > { %v1128_v5 = vmul.f32 1.442695, %v1124_v3 }
 0x3d8   : > { %v1123_v6 = vpop.xlane.xlu1 %1122  ;;  %v1132_v26 = vmul.f32 1.442695, %v1126_v24 }
 0x3d9   : > { %6349 = vpow2.f32 %v1128_v5  ;;  %v6156_v7 = vpop.permute.xlu0 %6155  ;;  %v1127_v23 = vsub.f32 %v1109_v59, %v1123_v6 }
 0x3da   : > { %v6158_v9 = vunpack.i.h.bf16 %v6156_v7  ;;  %v6157_v10 = vunpack.i.l.bf16 %v6156_v7 }
 0x3db   : > { %v1134_v25 = vmul.f32 1.442695, %v1127_v23 }
 0x3dc   : > { %v6151_v8 = vpop.permute.xlu1 %6150  ;;  %v6019_v17 = vpack.c.bf16 %v6158_v9, %v6157_v10 }
 0x3dd   : > { %v6153_v11 = vunpack.i.h.bf16 %v6151_v8  ;;  %v6152_v12 = vunpack.i.l.bf16 %v6151_v8  ;;  %6351 = vpow2.f32 %v1134_v25  ;;  %v1271_v43 = vpop.permute.xlu0 %1270 }
 0x3de   : > { %6353 = vpow2.f32 %v1132_v26 }
 0x3df   : > { %v6348_v13 = vpop.eup %6347  ;;  %v6015_v14 = vpack.c.bf16 %v6153_v11, %v6152_v12 }
 0x3e0   : > { %v6161_v15 = vpop.permute.xlu1 %6160  ;;  %v1139_v16 = vsel %vm896_vm2, %v6348_v13, 0.0 }
 0x3e1   : > { %v6163_v18 = vunpack.i.h.bf16 %v6161_v15  ;;  %v6162_v19 = vunpack.i.l.bf16 %v6161_v15  ;;  %1140 = vadd.xlane.f32.xlu1 %v1139_v16  ;;  %6016 = vmatprep.subr.bf16.mxu0 %v6015_v14  ;;  %v6171_v52 = vpop.permute.xlu0 %6170 }
 0x3e2   : > { %6018 = vmatpush3.bf16.msra.mxu0 %v6015_v14  ;;  %v6173_v53 = vunpack.i.h.bf16 %v6171_v52  ;;  %v6172_v56 = vunpack.i.l.bf16 %v6171_v52 }
 0x3e3   : > { %v6350_v20 = vpop.eup %6349  ;;  %6020 = vmatprep.subr.bf16.mxu0 %v6019_v17  ;;  %v6023_v22 = vpack.c.bf16 %v6163_v18, %v6162_v19 }
 0x3e4   : > { %v1136_v21 = vsel %vm896_vm2, %v6350_v20, 0.0  ;;  %v6166_v35 = vpop.permute.xlu1 %6165  ;;  %v6043_v57 = vpack.c.bf16 %v6173_v53, %v6172_v56 }
 0x3e5   : > { %1137 = vadd.xlane.f32.xlu1 %v1136_v21  ;;  %v6168_v45 = vunpack.i.h.bf16 %v6166_v35  ;;  %v6167_v46 = vunpack.i.l.bf16 %v6166_v35  ;;  %v1732_v6 = vpop.permute.xlu0 %1731 }
 0x3e6   : > { %6022 = vmatpush3.bf16.msra.mxu0 %v6019_v17 }
 0x3e7   : > { %6025 = vmatprep.subr.msk.bf16.mxu0 %vm6719_vm4, %v6023_v22  ;;  %v6352_v27 = vpop.eup %6351  ;;  %v6029_v51 = vpack.c.bf16 %v6168_v45, %v6167_v46 }
 0x3e8   : > { %v1145_v28 = vsel %vm896_vm2, %v6352_v27, 0.0  ;;  %v6354_v30 = vpop.eup %6353  ;;  %v1267_v38 = vpop.permute.xlu1 %1266 }
 0x3e9   : > { %v1142_v33 = vsel %vm896_vm2, %v6354_v30, 0.0  ;;  %v1736_v8 = vpop.permute.xlu0 %1735 }
 0x3f6   : > { %1268 = vrot.lane.b32.xlu1 %v6697_v29, %s6472_s0 }
 0x41a   : > { %1146 = vadd.xlane.f32.xlu1 %v1145_v28 }
 0x41e   : > { %1143 = vadd.xlane.f32.xlu1 %v1142_v33 }
 0x42f   : > { %1272 = vrot.lane.b32.xlu1 %v6707_v34, %s6472_s0  ;;  %s7539_s0 = scalar_lea.vmem %s7497_s7, %s6597_s20 }
 0x433   : > { %6175 = vrot.lane.b32.xlu1 %v6714_v37, %s6473_s18 }
 0x437   : > { %1733 = vrot.lane.b32.xlu1 %v6697_v29, %s6474_s22 }
 0x43b   : > { %1737 = vrot.lane.b32.xlu1 %v6707_v34, %s6474_s22  ;;  %s7540_s22 = scalar_lea.vmem %s7498_s8, %s6597_s20 }
 0x46e   : > { %v1141_v39 = vpop.xlane.xlu1 %1140 }
 0x46f   : > { %6355 = vrcp.f32 %v1141_v39 }
 0x472   : > { %v1138_v40 = vpop.xlane.xlu1 %1137 }
 0x473   : > { %6357 = vrcp.f32 %v1138_v40 }
 0x476   : > { %v1269_v58 = vpop.permute.xlu1 %1268 }
 0x479   : > { %v6356_v42 = vpop.eup %6355 }
 0x47a   : > { %v1151_v50 = vmul.f32 %v6356_v42, %v6348_v13 }
 0x47d   : > { %v6358_v44 = vpop.eup %6357 }
 0x47e   : > { %v1149_v48 = vmul.f32 %v6358_v44, %v6350_v20 }
 0x480   : > { %5851 = vmatprep.mubr.msk.f32.mxu0 %vm896_vm2, %v1149_v48 }
 0x481   : > { %5852 = vmatmul.mubr.msk.f32.vlgmr.msra.gmra.mrb[4].mxu0 %vm896_vm2, %v1151_v50 }
 0x482   : > { %6028 = vmatpush3.bf16.xpose.msk.msra.mxu0 %vm6719_vm4, %v6023_v22 }
 0x483   : > { %6031 = vmatprep.subr.msk.bf16.mxu0 %vm6719_vm4, %v6029_v51 }
 0x48a   : > { %6034 = vmatpush3.bf16.xpose.msk.msra.mxu0 %vm6719_vm4, %v6029_v51 }
 0x48b   : > { %6045 = vmatprep.subr.msk.bf16.mxu0 %vm6719_vm4, %v6043_v57 }
 0x4a7   : > { %v1147_v59 = vpop.xlane.xlu1 %1146 }
 0x4a8   : > { %6359 = vrcp.f32 %v1147_v59 }
 0x4ab   : > { %v1144_v60 = vpop.xlane.xlu1 %1143 }
 0x4ac   : > { %6361 = vrcp.f32 %v1144_v60 }
 0x4af   : > { %v1273_v61 = vpop.permute.xlu1 %1272 }
 0x4b2   : > { %v6360_v62 = vpop.eup %6359 }
 0x4b3   : > { %v6176_v0 = vpop.permute.xlu1 %6175  ;;  %v1155_v2 = vmul.f32 %v6360_v62, %v6352_v27 }
 0x4b4   : > { %v6178_v3 = vunpack.i.h.bf16 %v6176_v0  ;;  %v6177_v4 = vunpack.i.l.bf16 %v6176_v0 }
 0x4b6   : > { %v6362_v63 = vpop.eup %6361  ;;  %v6049_v5 = vpack.c.bf16 %v6178_v3, %v6177_v4 }
 0x4b7   : > { %v1153_v1 = vmul.f32 %v6362_v63, %v6354_v30  ;;  %v1734_v7 = vpop.permute.xlu1 %1733 }
 0x4b9   : > { %5854 = vmatprep.mubr.msk.f32.mxu0 %vm896_vm2, %v1153_v1 }
 0x4ba   : > { %5855 = vmatmul.mubr.msk.f32.gmra.mrb[6].mxu0 %vm896_vm2, %v1155_v2 }
 0x4bb   : > { %5865 = vmatprep.mubr.msk.f32.mxu0 %vm1010_vm3, %v1267_v38  ;;  %v1738_v9 = vpop.permute.xlu1 %1737 }
 0x4be   : > { %5866 = vmatmul.mubr.msk.f32.vlgmr.msra.gmra.mrb[8].mxu0 %vm1010_vm3, %v1269_v58 }
 0x4bf   : > { %6048 = vmatpush3.bf16.xpose.msk.msra.mxu0 %vm6719_vm4, %v6043_v57  ;;  %5868 = vmatprep.mubr.msk.f32.mxu0 %vm1010_vm3, %v1271_v43 }
 0x4c0   : > { %6051 = vmatprep.subr.msk.bf16.mxu0 %vm6719_vm4, %v6049_v5 }
 0x4c2   : > { %5869 = vmatmul.mubr.msk.f32.gmra.mrb[10].mxu0 %vm1010_vm3, %v1273_v61 }
 0x4c3   : > { %5909 = vmatprep.mubr.msk.f32.mxu0 %vm1010_vm3, %v1732_v6 }
 0x4c7   : > { %6054 = vmatpush3.bf16.xpose.msk.msra.mxu0 %vm6719_vm4, %v6049_v5 }
 0x4ce   : > { %5910 = vmatmul.mubr.msk.f32.vlgmr.msra.gmra.mrb[12].mxu0 %vm1010_vm3, %v1734_v7 }
 0x4cf   : > { %5912 = vmatprep.mubr.msk.f32.mxu0 %vm1010_vm3, %v1736_v8 }
 0x4d2   : > { %5913 = vmatmul.mubr.msk.f32.gmra.mrb[14].mxu0 %vm1010_vm3, %v1738_v9 }
 0x554   : > { %v6821_v10 = vpop.f32.mrb[4].mxu0 }
 0x555   : > { %v6823_v11 = vpop.f32.mrb[5].mxu0 }
 0x58d   : > { %v6825_v12 = vpop.f32.mrb[6].mxu0 }
 0x58e   : > { %v6827_v13 = vpop.f32.mrb[7].mxu0 }
 0x591   : > { %v5867_v14 = vpop.f32.mrb[8].mxu0 }
 0x592   : > { %v1370_v15 = vadd.f32 %v5867_v14, %v6740_v47  ;;  %v1364_v16 = vpop.f32.mrb[9].mxu0 }
 0x593   : > { %v1365_v17 = vadd.f32 %v1364_v16, %v6745_v49 }
 0x594   : > { %v1386_v18 = vsel %vm896_vm2, %v1370_v15, -inf }
 0x595   : > { %1387 = vmax.xlane.f32.xlu1 %v1386_v18  ;;  %v5870_v19 = vpop.f32.mrb[10].mxu0  ;;  %v1383_v20 = vsel %vm896_vm2, %v1365_v17, -inf }
 0x596   : > { %v1374_v21 = vpop.f32.mrb[11].mxu0  ;;  %1384 = vmax.xlane.f32.xlu0 %v1383_v20  ;;  %v1380_v23 = vadd.f32 %v5870_v19, %v6758_v55 }
 0x597   : > { %v1375_v22 = vadd.f32 %v1374_v21, %v6753_v54 }
 0x598   : > { %v1392_v25 = vsel %vm896_vm2, %v1380_v23, -inf }
 0x599   : > { %v1389_v24 = vsel %vm896_vm2, %v1375_v22, -inf }
 0x59a   : > { %1390 = vmax.xlane.f32.xlu0 %v1389_v24 }
 0x59e   : > { %1393 = vmax.xlane.f32.xlu0 %v1392_v25 }
 0x5a1   : > { %v5911_v26 = vpop.f32.mrb[12].mxu0 }
 0x5a2   : > { %v1829_v27 = vpop.f32.mrb[13].mxu0  ;;  %v6862_v62 = vadd.f32 %v5911_v26, %v6740_v47 }
 0x5a3   : > { %v6859_v61 = vadd.f32 %v1829_v27, %v6745_v49 }
 0x5a5   : > { %v5914_v28 = vpop.f32.mrb[14].mxu0  ;;  %v1848_v0 = vsel %vm896_vm2, %v6859_v61, -inf }
 0x5a6   : > { %v1839_v30 = vpop.f32.mrb[15].mxu0 }
 0x5a7   : > { %v6865_v63 = vadd.f32 %v1839_v30, %v6753_v54 }
 0x622   : > { %v1388_v33 = vpop.xlane.xlu1 %1387 }
 0x623   : > { %v1396_v35 = vsub.f32 %v1370_v15, %v1388_v33  ;;  %v1385_v38 = vpop.xlane.xlu0 %1384 }
 0x624   : > { %v1395_v39 = vsub.f32 %v1365_v17, %v1385_v38 }
 0x625   : > { %v1401_v40 = vmul.f32 1.442695, %v1396_v35 }
 0x626   : > { %v1399_v42 = vmul.f32 1.442695, %v1395_v39 }
 0x627   : > { %6363 = vpow2.f32 %v1401_v40  ;;  %v1391_v43 = vpop.xlane.xlu0 %1390 }
 0x628   : > { %6365 = vpow2.f32 %v1399_v42  ;;  %v1397_v44 = vsub.f32 %v1375_v22, %v1391_v43 }
 0x62a   : > { %v1403_v45 = vmul.f32 1.442695, %v1397_v44 }
 0x62b   : > { %v1394_v46 = vpop.xlane.xlu0 %1393 }
 0x62c   : > { %6367 = vpow2.f32 %v1403_v45  ;;  %v1398_v48 = vsub.f32 %v1380_v23, %v1394_v46 }
 0x62e   : > { %v1405_v50 = vmul.f32 1.442695, %v1398_v48 }
 0x630   : > { %6369 = vpow2.f32 %v1405_v50 }
 0x631   : > { %v6837_v51 = vpop.eup %6363 }
 0x632   : > { %v6366_v52 = vpop.eup %6365  ;;  %v1410_v53 = vsel %vm896_vm2, %v6837_v51, 0.0 }
 0x633   : > { %1411 = vadd.xlane.f32.xlu0 %v1410_v53  ;;  %v1407_v56 = vsel %vm896_vm2, %v6366_v52, 0.0 }
 0x634   : > { %1408 = vadd.xlane.f32.xlu1 %v1407_v56 }
 0x636   : > { %v6842_v57 = vpop.eup %6367 }
 0x637   : > { %v1413_v58 = vsel %vm896_vm2, %v6842_v57, 0.0 }
 0x638   : > { %1414 = vadd.xlane.f32.xlu1 %v1413_v58 }
 0x63a   : > { %v6846_v59 = vpop.eup %6369 }
 0x63b   : > { %v1416_v60 = vsel %vm896_vm2, %v6846_v59, 0.0 }
 0x63c   : > { %1417 = vadd.xlane.f32.xlu0 %v1416_v60 }
 0x649   : > { %6180 = vrot.lane.b32.xlu1 %v6705_v32, %s6475_s6 }
 0x64d   : > { %6190 = vrot.lane.b32.xlu1 %v6705_v32, %s6476_s16 }
 0x651   : > { %6195 = vrot.lane.b32.xlu1 %v6714_v37, %s6476_s16 }
 0x652   : > { %6185 = vrot.lane.b32.xlu0 %v6714_v37, %s6475_s6 }
 0x655   : > { %2105 = vrot.lane.b32.xlu1 %v6697_v29, %s6477_s4  ;;  %v6870_v29 = vadd.f32 %v5914_v28, %v6758_v55 }
 0x656   : > { %2103 = vrot.lane.b32.xlu0 %v6699_v31, %s6477_s4  ;;  %v1851_v31 = vsel %vm896_vm2, %v6862_v62, -inf }
 0x659   : > { %2109 = vrot.lane.b32.xlu1 %v6707_v34, %s6477_s4  ;;  %v1854_v34 = vsel %vm896_vm2, %v6865_v63, -inf }
 0x65a   : > { %2107 = vrot.lane.b32.xlu0 %v6710_v36, %s6477_s4  ;;  %v1857_v36 = vsel %vm896_vm2, %v6870_v29, -inf  ;;  %s7541_s4 = scalar_lea.vmem %s7499_s9, %s6597_s20 }
 0x679   : > { %1849 = vmax.xlane.f32.xlu0 %v1848_v0 }
 0x67d   : > { %1852 = vmax.xlane.f32.xlu1 %v1851_v31  ;;  %1855 = vmax.xlane.f32.xlu0 %v1854_v34  ;;  %v1536_v34 = vld [vmem:[%s6612_s27 + $0x8] sm:$0xff] }
 0x681   : > { %1858 = vmax.xlane.f32.xlu0 %v1857_v36  ;;  %v1265_v36 = vld [vmem:[%s6612_s27] sm:$0xff] }
 0x6c0   : > { %v1412_v2 = vpop.xlane.xlu0 %1411 }
 0x6c1   : > { %v1409_v1 = vpop.xlane.xlu1 %1408 }
 0x6c2   : > { %6371 = vrcp.f32 %v1409_v1 }
 0x6c3   : > { %6373 = vrcp.f32 %v1412_v2 }
 0x6c5   : > { %v1415_v3 = vpop.xlane.xlu1 %1414 }
 0x6c6   : > { %6375 = vrcp.f32 %v1415_v3 }
 0x6c9   : > { %v6181_v4 = vpop.permute.xlu1 %6180  ;;  %v1418_v5 = vpop.xlane.xlu0 %1417 }
 0x6ca   : > { %v6183_v6 = vunpack.i.h.bf16 %v6181_v4  ;;  %v6182_v7 = vunpack.i.l.bf16 %v6181_v4  ;;  %6377 = vrcp.f32 %v1418_v5 }
 0x6cc   : > { %v6372_v8 = vpop.eup %6371  ;;  %v6035_v9 = vpack.c.bf16 %v6183_v6, %v6182_v7 }
 0x6cd   : > { %v6191_v14 = vpop.permute.xlu1 %6190  ;;  %v6186_v15 = vpop.permute.xlu0 %6185  ;;  %v1420_v16 = vmul.f32 %v6372_v8, %v6366_v52 }
 0x6ce   : > { %v6193_v17 = vunpack.i.h.bf16 %v6191_v14  ;;  %v6192_v18 = vunpack.i.l.bf16 %v6191_v14  ;;  %v6188_v19 = vunpack.i.h.bf16 %v6186_v15  ;;  %v6187_v20 = vunpack.i.l.bf16 %v6186_v15  ;;  %6036 = vmatprep.subr.bf16.mxu1 %v6035_v9  ;;  %v6374_v23 = vpop.eup %6373 }
 0x6cf   : > { %6038 = vmatpush3.bf16.msra.mxu1 %v6035_v9  ;;  %5879 = vmatprep.mubr.msk.f32.mxu1 %vm896_vm2, %v1420_v16  ;;  %v1422_v30 = vmul.f32 %v6374_v23, %v6837_v51 }
 0x6d0   : > { %v6063_v21 = vpack.c.bf16 %v6193_v17, %v6192_v18  ;;  %v6039_v22 = vpack.c.bf16 %v6188_v19, %v6187_v20  ;;  %v6376_v26 = vpop.eup %6375 }
 0x6d1   : > { %v6196_v24 = vpop.permute.xlu1 %6195  ;;  %v2104_v25 = vpop.permute.xlu0 %2103  ;;  %v1424_v38 = vmul.f32 %v6376_v26, %v6842_v57 }
 0x6d2   : > { %v6198_v27 = vunpack.i.h.bf16 %v6196_v24  ;;  %v6197_v28 = vunpack.i.l.bf16 %v6196_v24  ;;  %6040 = vmatprep.subr.bf16.mxu1 %v6039_v22  ;;  %6065 = vmatprep.subr.msk.bf16.mxu0 %vm6719_vm4, %v6063_v21 }
 0x6d3   : > { %5945 = vmatprep.mubr.msk.f32.mxu0 %vm1010_vm3, %v2104_v25  ;;  %6042 = vmatpush3.bf16.msra.mxu1 %v6039_v22 }
 0x6d4   : > { %v6069_v33 = vpack.c.bf16 %v6198_v27, %v6197_v28  ;;  %6068 = vmatpush3.bf16.xpose.msk.msra.mxu0 %vm6719_vm4, %v6063_v21  ;;  %v6378_v35 = vpop.eup %6377  ;;  %5885 = vmatprep.subr.mxu1 %v1536_v34 }
 0x6d5   : > { %v1426_v39 = vmul.f32 %v6378_v35, %v6846_v59  ;;  %v2106_v40 = vpop.permute.xlu1 %2105  ;;  %v2108_v42 = vpop.permute.xlu0 %2107 }
 0x6d6   : > { %5880 = vmatmul.mubr.msk.f32.vlgmr.msra.gmra.mrb[4].mxu1 %vm896_vm2, %v1422_v30  ;;  %6071 = vmatprep.subr.msk.bf16.mxu0 %vm6719_vm4, %v6069_v33 }
 0x6d7   : > { %5882 = vmatprep.mubr.msk.f32.mxu1 %vm896_vm2, %v1424_v38  ;;  %5886 = vmatpush3.msra.mxu1 %v1536_v34 }
 0x6d8   : > { %5893 = vmatprep.subr.mxu1 %v1265_v36 }
 0x6d9   : > { %v2110_v43 = vpop.permute.xlu1 %2109 }
 0x6da   : > { %5883 = vmatmul.mubr.msk.f32.gmra.mrb[6].mxu1 %vm896_vm2, %v1426_v39 }
 0x6dc   : > { %6074 = vmatpush3.bf16.xpose.msk.msra.mxu0 %vm6719_vm4, %v6069_v33 }
 0x6e3   : > { %5946 = vmatmul.mubr.msk.f32.vlgmr.msra.gmra.mrb[16].mxu0 %vm1010_vm3, %v2106_v40 }
 0x6e4   : > { %5948 = vmatprep.mubr.msk.f32.mxu0 %vm1010_vm3, %v2108_v42 }
 0x6e7   : > { %5949 = vmatmul.mubr.msk.f32.gmra.mrb[18].mxu0 %vm1010_vm3, %v2110_v43 }
 0x706   : > { %v1850_v44 = vpop.xlane.xlu0 %1849 }
 0x707   : > { %v1860_v45 = vsub.f32 %v6859_v61, %v1850_v44 }
 0x709   : > { %v1864_v46 = vmul.f32 1.442695, %v1860_v45 }
 0x70a   : > { %v1853_v48 = vpop.xlane.xlu1 %1852  ;;  %v1856_v50 = vpop.xlane.xlu0 %1855 }
 0x70b   : > { %6379 = vpow2.f32 %v1864_v46  ;;  %v1861_v51 = vsub.f32 %v6862_v62, %v1853_v48  ;;  %v1862_v41 = vsub.f32 %v6865_v63, %v1856_v50 }
 0x70d   : > { %v1866_v52 = vmul.f32 1.442695, %v1861_v51  ;;  %v1868_v53 = vmul.f32 1.442695, %v1862_v41 }
 0x70e   : > { %v1859_v56 = vpop.xlane.xlu0 %1858 }
 0x70f   : > { %6381 = vpow2.f32 %v1866_v52  ;;  %v1863_v57 = vsub.f32 %v6870_v29, %v1859_v56 }
 0x710   : > { %6383 = vpow2.f32 %v1868_v53 }
 0x711   : > { %v1870_v58 = vmul.f32 1.442695, %v1863_v57 }
 0x713   : > { %6385 = vpow2.f32 %v1870_v58 }
 0x715   : > { %v6380_v59 = vpop.eup %6379 }
 0x716   : > { %v1872_v60 = vsel %vm896_vm2, %v6380_v59, 0.0 }
 0x717   : > { %1873 = vadd.xlane.f32.xlu1 %v1872_v60 }
 0x719   : > { %v6382_v61 = vpop.eup %6381 }
 0x71a   : > { %v6902_v0 = vpop.eup %6383  ;;  %v1875_v62 = vsel %vm896_vm2, %v6382_v61, 0.0 }
 0x71b   : > { %1876 = vadd.xlane.f32.xlu0 %v1875_v62  ;;  %v1878_v63 = vsel %vm896_vm2, %v6902_v0, 0.0 }
 0x71c   : > { %1879 = vadd.xlane.f32.xlu1 %v1878_v63 }
 0x71d   : > { %v6907_v29 = vpop.eup %6385 }
 0x71e   : > { %v1881_v31 = vsel %vm896_vm2, %v6907_v29, 0.0 }
 0x71f   : > { %1882 = vadd.xlane.f32.xlu0 %v1881_v31 }
 0x72d   : > { %6200 = vrot.lane.b32.xlu1 %v6705_v32, %s6478_s24 }
 0x735   : > { %6205 = vrot.lane.b32.xlu0 %v6714_v37, %s6478_s24 }
 0x7a4   : > { %v1874_v1 = vpop.xlane.xlu1 %1873 }
 0x7a5   : > { %6387 = vrcp.f32 %v1874_v1 }
 0x7a8   : > { %v1877_v2 = vpop.xlane.xlu0 %1876 }
 0x7a9   : > { %v1880_v3 = vpop.xlane.xlu1 %1879  ;;  %v5881_v4 = vpop.f32.mrb[4].mxu1  ;;  %6389 = vrcp.f32 %v1877_v2 }
 0x7aa   : > { %v1517_v5 = vpop.f32.mrb[5].mxu1  ;;  %6391 = vrcp.f32 %v1880_v3 }
 0x7ab   : > { %5887 = vmatprep.mubr.msk.f32.mxu1 %vm1010_vm3, %v1517_v5 }
 0x7ac   : > { %v1883_v6 = vpop.xlane.xlu0 %1882  ;;  %5888 = vmatmul.mubr.msk.f32.vlgmr.msra.gmra.mrb[8].mxu1 %vm1010_vm3, %v5881_v4 }
 0x7ad   : > { %v6201_v7 = vpop.permute.xlu1 %6200  ;;  %v5884_v8 = vpop.f32.mrb[6].mxu1  ;;  %5894 = vmatpush3.msra.mxu1 %v1265_v36  ;;  %6393 = vrcp.f32 %v1883_v6 }
 0x7ae   : > { %v6203_v9 = vunpack.i.h.bf16 %v6201_v7  ;;  %v6202_v14 = vunpack.i.l.bf16 %v6201_v7  ;;  %v1527_v15 = vpop.f32.mrb[7].mxu1 }
 0x7af   : > { %5890 = vmatprep.mubr.msk.f32.mxu1 %vm1010_vm3, %v1527_v15  ;;  %v6388_v21 = vpop.eup %6387 }
 0x7b0   : > { %v6055_v16 = vpack.c.bf16 %v6203_v9, %v6202_v14  ;;  %v6206_v17 = vpop.permute.xlu0 %6205  ;;  %5891 = vmatmul.mubr.msk.f32.gmra.mrb[10].mxu1 %vm1010_vm3, %v5884_v8  ;;  %v1885_v26 = vmul.f32 %v6388_v21, %v6380_v59 }
 0x7b1   : > { %v6208_v18 = vunpack.i.h.bf16 %v6206_v17  ;;  %v6207_v19 = vunpack.i.l.bf16 %v6206_v17  ;;  %5895 = vmatprep.mubr.msk.f32.mxu1 %vm1010_vm3, %v6823_v11 }
 0x7b2   : > { %6056 = vmatprep.subr.bf16.mxu1 %v6055_v16 }
 0x7b3   : > { %v6059_v20 = vpack.c.bf16 %v6208_v18, %v6207_v19  ;;  %v6390_v23 = vpop.eup %6389 }
 0x7b4   : > { %5896 = vmatmul.mubr.msk.f32.vlgmr.msra.gmra.mrb[8].mxu1 %vm1010_vm3, %v6821_v10  ;;  %v6392_v27 = vpop.eup %6391  ;;  %v1887_v28 = vmul.f32 %v6390_v23, %v6382_v61 }
 0x7b5   : > { %6058 = vmatpush3.bf16.msra.mxu1 %v6055_v16  ;;  %5898 = vmatprep.mubr.msk.f32.mxu1 %vm1010_vm3, %v6827_v13 }
 0x7b6   : > { %6060 = vmatprep.subr.bf16.mxu1 %v6059_v20  ;;  %v5947_v22 = vpop.f32.mrb[16].mxu0 }
 0x7b7   : > { %v2207_v24 = vadd.f32 %v5947_v22, %v6740_v47  ;;  %v2201_v25 = vpop.f32.mrb[17].mxu0  ;;  %v6394_v47 = vpop.eup %6393  ;;  %v2373_v22 = vld [vmem:[%s6612_s27 + $0x18] sm:$0xff] }
 0x7b8   : > { %v2202_v11 = vadd.f32 %v2201_v25, %v6745_v49  ;;  %5899 = vmatmul.mubr.msk.f32.gmra.mrb[10].mxu1 %vm1010_vm3, %v6825_v12  ;;  %v1889_v49 = vmul.f32 %v6392_v27, %v6902_v0  ;;  %v1891_v40 = vmul.f32 %v6394_v47, %v6907_v29  ;;  %v5282_v27 = vld [vmem:[%s7539_s0] ss:$0 sm:$0xff] }
 0x7b9   : > { %6062 = vmatpush3.bf16.msra.mxu1 %v6059_v20  ;;  %v2223_v10 = vsel %vm896_vm2, %v2207_v24, -inf  ;;  %5923 = vmatprep.mubr.msk.f32.mxu1 %vm896_vm2, %v1885_v26 }
 0x7ba   : > { %v5950_v13 = vpop.f32.mrb[18].mxu0  ;;  %2224 = vmax.xlane.f32.xlu0 %v2223_v10  ;;  %v2220_v30 = vsel %vm896_vm2, %v2202_v11, -inf }
 0x7bb   : > { %v2217_v33 = vadd.f32 %v5950_v13, %v6758_v55  ;;  %v2211_v35 = vpop.f32.mrb[19].mxu0  ;;  %2221 = vmax.xlane.f32.xlu1 %v2220_v30  ;;  %v2001_v55 = vld [vmem:[%s6612_s27 + $0x10] sm:$0xff]  ;;  %v6427_v30 = vld [vmem:[#allocation2 + $0x8] sm:$0xff] }
 0x7bc   : > { %v2212_v12 = vadd.f32 %v2211_v35, %v6753_v54  ;;  %5924 = vmatmul.mubr.msk.f32.vlgmr.msra.gmra.mrb[12].mxu1 %vm896_vm2, %v1887_v28  ;;  %5929 = vmatprep.subr.mxu1 %v2001_v55 }
 0x7bd   : > { %v2229_v38 = vsel %vm896_vm2, %v2217_v33, -inf  ;;  %5926 = vmatprep.mubr.msk.f32.mxu1 %vm896_vm2, %v1889_v49  ;;  %5930 = vmatpush3.msra.mxu1 %v2001_v55 }
 0x7be   : > { %2230 = vmax.xlane.f32.xlu0 %v2229_v38  ;;  %v2226_v39 = vsel %vm896_vm2, %v2212_v12, -inf }
 0x7bf   : > { %2227 = vmax.xlane.f32.xlu1 %v2226_v39 }
 0x7c0   : > { %5927 = vmatmul.mubr.msk.f32.gmra.mrb[14].mxu1 %vm896_vm2, %v1891_v40 }
 0x847   : > { %v2225_v42 = vpop.xlane.xlu0 %2224 }
 0x848   : > { %v2233_v43 = vsub.f32 %v2207_v24, %v2225_v42  ;;  %v2222_v54 = vpop.xlane.xlu1 %2221  ;;  %v6429_v42 = vld [vmem:[#allocation2 + $0x18] sm:$0xff] }
 0x849   : > { %v2232_v44 = vsub.f32 %v2202_v11, %v2222_v54  ;;  %v6430_v54 = vld [vmem:[#allocation2 + $0x10] sm:$0xff] }
 0x84a   : > { %v2238_v45 = vmul.f32 1.442695, %v2233_v43 }
 0x84b   : > { %v2236_v46 = vmul.f32 1.442695, %v2232_v44  ;;  %v2231_v52 = vpop.xlane.xlu0 %2230 }
 0x84c   : > { %6395 = vpow2.f32 %v2238_v45  ;;  %v2228_v53 = vpop.xlane.xlu1 %2227  ;;  %v2235_v56 = vsub.f32 %v2217_v33, %v2231_v52  ;;  %v6428_v33 = vld [vmem:[#allocation2] sm:$0xff] }
 0x84d   : > { %6397 = vpow2.f32 %v2236_v46  ;;  %v2234_v57 = vsub.f32 %v2212_v12, %v2228_v53 }
 0x84e   : > { %v2242_v58 = vmul.f32 1.442695, %v2235_v56 }
 0x84f   : > { %v2240_v59 = vmul.f32 1.442695, %v2234_v57 }
 0x850   : > { %6399 = vpow2.f32 %v2242_v58 }
 0x851   : > { %6401 = vpow2.f32 %v2240_v59 }
 0x856   : > { %v6396_v48 = vpop.eup %6395 }
 0x857   : > { %v6398_v50 = vpop.eup %6397  ;;  %v2247_v51 = vsel %vm896_vm2, %v6396_v48, 0.0 }
 0x858   : > { %2248 = vadd.xlane.f32.xlu0 %v2247_v51  ;;  %v2244_v41 = vsel %vm896_vm2, %v6398_v50, 0.0 }
 0x859   : > { %2245 = vadd.xlane.f32.xlu1 %v2244_v41 }
 0x85a   : > { %v6400_v60 = vpop.eup %6399 }
 0x85b   : > { %v6402_v61 = vpop.eup %6401  ;;  %v2253_v0 = vsel %vm896_vm2, %v6400_v60, 0.0 }
 0x85c   : > { %v2250_v62 = vsel %vm896_vm2, %v6402_v61, 0.0 }
 0x86a   : > { %6210 = vrot.lane.b32.xlu1 %v6705_v32, %s6479_s21 }
 0x86e   : > { %6215 = vrot.lane.b32.xlu0 %v6714_v37, %s6479_s21 }
 0x88d   : > { %2254 = vadd.xlane.f32.xlu0 %v2253_v0  ;;  %v2568_v0 = vld [vmem:[%s6630_s17 + $0x8] sm:$0xff] }
 0x88e   : > { %2251 = vadd.xlane.f32.xlu1 %v2250_v62 }
 0x88f   : > { %v5925_v63 = vpop.f32.mrb[12].mxu1 }
 0x890   : > { %v1982_v32 = vpop.f32.mrb[13].mxu1 }
 0x891   : > { %5931 = vmatprep.mubr.msk.f32.mxu1 %vm1010_vm3, %v1982_v32 }
 0x892   : > { %5932 = vmatmul.mubr.msk.f32.vlgmr.msra.gmra.mrb[8].mxu1 %vm1010_vm3, %v5925_v63  ;;  %v2576_v63 = vld [vmem:[%s6630_s17 + $0x48] sm:$0xff] }
 0x893   : > { %v5928_v37 = vpop.f32.mrb[14].mxu1 }
 0x894   : > { %v1992_v29 = vpop.f32.mrb[15].mxu1 }
 0x895   : > { %5934 = vmatprep.mubr.msk.f32.mxu1 %vm1010_vm3, %v1992_v29  ;;  %v5288_v29 = vcombine.high %v2568_v0, %v2576_v63 }
 0x896   : > { %5935 = vmatmul.mubr.msk.f32.gmra.mrb[10].mxu1 %vm1010_vm3, %v5928_v37  ;;  %v5287_v37 = vcombine.low %v2568_v0, %v2576_v63 }
 0x8e5   : > { %v2249_v31 = vpop.xlane.xlu0 %2248 }
 0x8e6   : > { %v2246_v34 = vpop.xlane.xlu1 %2245 }
 0x8e7   : > { %6403 = vrcp.f32 %v2246_v34  ;;  %v2591_v34 = vld [vmem:[%s6630_s17 + $0xc0] sm:$0xff] }
 0x8e8   : > { %6405 = vrcp.f32 %v2249_v31  ;;  %v2583_v31 = vld [vmem:[%s6630_s17 + $0x80] sm:$0xff] }
 0x8e9   : > { %v6216_v36 = vpop.permute.xlu0 %6215 }
 0x8ea   : > { %v6211_v1 = vpop.permute.xlu1 %6210  ;;  %v6218_v2 = vunpack.i.h.bf16 %v6216_v36  ;;  %v6217_v3 = vunpack.i.l.bf16 %v6216_v36  ;;  %v2584_v36 = vld [vmem:[%s6630_s17 + $0x88] sm:$0xff] }
 0x8eb   : > { %v6213_v4 = vunpack.i.h.bf16 %v6211_v1  ;;  %v6212_v5 = vunpack.i.l.bf16 %v6211_v1  ;;  %v5302_v1 = vcombine.high %v2583_v31, %v2591_v34 }
 0x8ec   : > { %v6079_v7 = vpack.c.bf16 %v6218_v2, %v6217_v3  ;;  %v2592_v2 = vld [vmem:[%s6630_s17 + $0xc8] sm:$0xff]  ;;  %v5301_v3 = vcombine.low %v2583_v31, %v2591_v34 }
 0x8ed   : > { %v6075_v6 = vpack.c.bf16 %v6213_v4, %v6212_v5  ;;  %v5303_v4 = vcombine.low %v2584_v36, %v2592_v2  ;;  %v5304_v5 = vcombine.high %v2584_v36, %v2592_v2 }
 0x8ef   : > { %6076 = vmatprep.subr.bf16.mxu1 %v6075_v6 }
 0x8f0   : > { %6078 = vmatpush3.bf16.msra.mxu1 %v6075_v6  ;;  %v6480_v6 = vmov 0  }
 0x8f1   : > { %v6404_v8 = vpop.eup %6403  ;;  %6080 = vmatprep.subr.bf16.mxu1 %v6079_v7  ;;  %2881 = vmatprep.mubr.bf16.mxu0 %v6480_v6 }
 0x8f2   : > { %v6406_v9 = vpop.eup %6405  ;;  %v2257_v14 = vmul.f32 %v6404_v8, %v6398_v50 }
 0x8f3   : > { %v2259_v15 = vmul.f32 %v6406_v9, %v6396_v48 }
 0x8f4   : > { %6082 = vmatpush3.bf16.msra.mxu1 %v6079_v7  ;;  %5959 = vmatprep.mubr.msk.f32.mxu1 %vm896_vm2, %v2257_v14 }
 0x8f5   : > { %5965 = vmatprep.subr.mxu1 %v2373_v22 }
 0x8f7   : > { %5960 = vmatmul.mubr.msk.f32.vlgmr.msra.gmra.mrb[16].mxu1 %vm896_vm2, %v2259_v15 }
 0x8f8   : > { %5966 = vmatpush3.msra.mxu1 %v2373_v22  ;;  %v2577_v22 = vld [vmem:[%s6630_s17 + $0x50] sm:$0xff] }
 0x8f9   : > { %2902 = vmatprep.subr.bf16.mxu1 %v5288_v29 }
 0x91a   : > { %v2255_v16 = vpop.xlane.xlu0 %2254 }
 0x91b   : > { %6407 = vrcp.f32 %v2255_v16  ;;  %v2252_v17 = vpop.xlane.xlu1 %2251 }
 0x91c   : > { %6409 = vrcp.f32 %v2252_v17 }
 0x925   : > { %v6408_v18 = vpop.eup %6407 }
 0x926   : > { %v6410_v19 = vpop.eup %6409  ;;  %v2263_v21 = vmul.f32 %v6408_v18, %v6400_v60  ;;  %v2567_v60 = vld [vmem:[%s6630_s17] sm:$0xff] }
 0x927   : > { %v2261_v20 = vmul.f32 %v6410_v19, %v6402_v61  ;;  %v2575_v61 = vld [vmem:[%s6630_s17 + $0x40] sm:$0xff] }
 0x928   : > { %v5286_v62 = vcombine.high %v2567_v60, %v2575_v61  ;;  %v5285_v32 = vcombine.low %v2567_v60, %v2575_v61 }
 0x929   : > { %5962 = vmatprep.mubr.msk.f32.mxu1 %vm896_vm2, %v2261_v20 }
 0x92a   : > { %5963 = vmatmul.mubr.msk.f32.gmra.mrb[18].mxu1 %vm896_vm2, %v2263_v21  ;;  %2849 = vmatprep.subr.bf16.mxu0 %v5286_v62  ;;  %v2569_v21 = vld [vmem:[%s6630_s17 + $0x10] sm:$0xff] }
 0x92b   : > { %2850 = vmatpush1.bf16.msra.mxu0 %v5285_v32 }
 0x92c   : > { %2851 = vmatprep.subr.bf16.mxu0 %v5302_v1 }
 0x92f   : > { %2852 = vmatpush1.bf16.msra.mxu0 %v5301_v3 }
 0x9ca   : > { %v5961_v23 = vpop.f32.mrb[16].mxu1 }
 0x9cb   : > { %v2354_v24 = vpop.f32.mrb[17].mxu1 }
 0x9cc   : > { %5967 = vmatprep.mubr.msk.f32.mxu1 %vm1010_vm3, %v2354_v24  ;;  %v5289_v24 = vcombine.low %v2569_v21, %v2577_v22 }
 0x9cd   : > { %5968 = vmatmul.mubr.msk.f32.vlgmr.msra.gmra.mrb[8].mxu1 %vm1010_vm3, %v5961_v23  ;;  %v2570_v23 = vld [vmem:[%s6630_s17 + $0x18] sm:$0xff] }
 0x9ce   : > { %2903 = vmatpush1.bf16.msra.mxu1 %v5287_v37 }
 0x9cf   : > { %2904 = vmatprep.subr.bf16.mxu1 %v5304_v5 }
 0x9d2   : > { %2905 = vmatpush1.bf16.msra.mxu1 %v5303_v4 }
 0x9fd   : > { %v5964_v25 = vpop.f32.mrb[18].mxu1 }
 0x9fe   : > { %v2364_v26 = vpop.f32.mrb[19].mxu1 }
 0x9ff   : > { %5970 = vmatprep.mubr.msk.f32.mxu1 %vm1010_vm3, %v2364_v26  ;;  %v2578_v26 = vld [vmem:[%s6630_s17 + $0x58] sm:$0xff] }
 0xa00   : > { %5971 = vmatmul.mubr.msk.f32.gmra.mrb[10].mxu1 %vm1010_vm3, %v5964_v25  ;;  %v5290_v25 = vcombine.high %v2569_v21, %v2577_v22  ;;  %v2581_v21 = vld [vmem:[%s6630_s17 + $0x70] sm:$0xff]  ;;  %v2574_v22 = vld [vmem:[%s6630_s17 + $0x38] sm:$0xff] }
 0xa01   : > { %2934 = vmatprep.mubr.bf16.mxu1 %v6480_v6 }
 0xa02   : > { %2955 = vmatprep.subr.bf16.mxu0 %v5290_v25 }
 0xaa0   : > { %v5969_v11 = vpop.f32.mrb[8].mxu1 }
 0xaa1   : > { %v2483_v10 = vadd.f32 %v5969_v11, %v5282_v27  ;;  %v2452_v28 = vpop.f32.mrb[9].mxu1  ;;  %v5292_v11 = vcombine.high %v2570_v23, %v2578_v26 }
 0xaa2   : > { %v2482_v13 = vadd.f32 %v5282_v27, %v2452_v28 }
 0xaa3   : > { %v2487_v47 = vadd.f32 %v6427_v30, %v2483_v10  ;;  %3008 = vmatprep.subr.bf16.mxu1 %v5292_v11  ;;  %v2589_v11 = vld [vmem:[%s6630_s17 + $0xb0] sm:$0xff] }
 0xaa4   : > { %v2486_v35 = vadd.f32 %v6428_v33, %v2482_v13 }
 0xaa5   : > { %v2495_v49 = vsel %vm896_vm2, %v2487_v47, 0.0 }
 0xaa6   : > { %2496 = vadd.xlane.f32.xlu0 %v2495_v49  ;;  %v2492_v12 = vsel %vm896_vm2, %v2486_v35, 0.0  ;;  %v5283_v49 = vld [vmem:[%s7540_s22] ss:$0 sm:$0xff] }
 0xaa7   : > { %2493 = vadd.xlane.f32.xlu1 %v2492_v12 }
 0xad3   : > { %v5972_v38 = vpop.f32.mrb[10].mxu1 }
 0xad4   : > { %v2485_v39 = vadd.f32 %v5972_v38, %v5282_v27  ;;  %v2462_v40 = vpop.f32.mrb[11].mxu1 }
 0xad5   : > { %v2484_v55 = vadd.f32 %v5282_v27, %v2462_v40  ;;  %v5291_v27 = vcombine.low %v2570_v23, %v2578_v26  ;;  %v2582_v23 = vld [vmem:[%s6630_s17 + $0x78] sm:$0xff] }
 0xad6   : > { %v2489_v43 = vadd.f32 %v6429_v42, %v2485_v39  ;;  %v5284_v39 = vld [vmem:[%s7541_s4] ss:$0 sm:$0xff]  ;;  %s7543_s4 = sld [smem:[#allocation14_spill]] (!%p5464_p5) }
 0xad7   : > { %v2488_v44 = vadd.f32 %v6430_v54, %v2484_v55  ;;  %v2585_v54 = vld [vmem:[%s6630_s17 + $0x90] sm:$0xff] }
 0xad8   : > { %v2501_v45 = vsel %vm896_vm2, %v2489_v43, 0.0 }
 0xad9   : > { %2502 = vadd.xlane.f32.xlu0 %v2501_v45  ;;  %v2498_v46 = vsel %vm896_vm2, %v2488_v44, 0.0  ;;  %v2593_v45 = vld [vmem:[%s6630_s17 + $0xd0] sm:$0xff] }
 0xada   : > { %2499 = vadd.xlane.f32.xlu1 %v2498_v46  ;;  %v2586_v46 = vld [vmem:[%s6630_s17 + $0x98] sm:$0xff] }
 0xb33   : > { %v2497_v48 = vpop.xlane.xlu0 %2496 }
 0xb34   : > { %v2506_v50 = vmul.f32 0.03125, %v2497_v48  ;;  %v2494_v51 = vpop.xlane.xlu1 %2493  ;;  %v2594_v48 = vld [vmem:[%s6630_s17 + $0xd8] sm:$0xff] }
 0xb35   : > { %v2505_v41 = vmul.f32 0.03125, %v2494_v51  ;;  %v2571_v51 = vld [vmem:[%s6630_s17 + $0x20] sm:$0xff] }
 0xb36   : > { %v6970_v52 = vsub.f32 %v2487_v47, %v2506_v50 }
 0xb37   : > { %v6972_v53 = vsub.f32 %v2486_v35, %v2505_v41  ;;  %v5306_v41 = vcombine.high %v2585_v54, %v2593_v45 }
 0xb38   : > { %v2514_v56 = vmul.f32 %v6970_v52, %v6970_v52 }
 0xb39   : > { %v2513_v57 = vmul.f32 %v6972_v53, %v6972_v53 }
 0xb3a   : > { %v2520_v58 = vsel %vm896_vm2, %v2514_v56, 0.0  ;;  %v2579_v56 = vld [vmem:[%s6630_s17 + $0x60] sm:$0xff] }
 0xb3b   : > { %2521 = vadd.xlane.f32.xlu0 %v2520_v58  ;;  %v2517_v59 = vsel %vm896_vm2, %v2513_v57, 0.0  ;;  %v2572_v57 = vld [vmem:[%s6630_s17 + $0x28] sm:$0xff]  ;;  %v5305_v58 = vcombine.low %v2585_v54, %v2593_v45  ;;  %v5294_v60 = vcombine.high %v2571_v51, %v2579_v56 }
 0xb3c   : > { %2518 = vadd.xlane.f32.xlu1 %v2517_v59  ;;  %v5307_v59 = vcombine.low %v2586_v46, %v2594_v48  ;;  %v6224_v54 = vld [vmem:[%s6642_s19 + $0xc8] sm:$0xff]  }
 0xb3d   : > { %v6225_v45 = vld [vmem:[%s6642_s19 + $0x8] sm:$0xff]  }
 0xb66   : > { %v2503_v7 = vpop.xlane.xlu0 %2502 }
 0xb67   : > { %v2508_v8 = vmul.f32 0.03125, %v2503_v7  ;;  %v2500_v9 = vpop.xlane.xlu1 %2499 }
 0xb68   : > { %v2507_v14 = vmul.f32 0.03125, %v2500_v9  ;;  %v2595_v9 = vld [vmem:[%s6630_s17 + $0xe0] sm:$0xff] }
 0xb69   : > { %v6990_v15 = vsub.f32 %v2489_v43, %v2508_v8  ;;  %v2587_v8 = vld [vmem:[%s6630_s17 + $0xa0] sm:$0xff] }
 0xb6a   : > { %v6992_v16 = vsub.f32 %v2488_v44, %v2507_v14  ;;  %v2588_v14 = vld [vmem:[%s6630_s17 + $0xa8] sm:$0xff] }
 0xb6b   : > { %v2516_v17 = vmul.f32 %v6990_v15, %v6990_v15 }
 0xb6c   : > { %v2515_v18 = vmul.f32 %v6992_v16, %v6992_v16 }
 0xb6d   : > { %v2526_v19 = vsel %vm896_vm2, %v2516_v17, 0.0 }
 0xb6e   : > { %2527 = vadd.xlane.f32.xlu0 %v2526_v19  ;;  %v2523_v20 = vsel %vm896_vm2, %v2515_v18, 0.0  ;;  %v5310_v18 = vcombine.high %v2587_v8, %v2595_v9 }
 0xb6f   : > { %2524 = vadd.xlane.f32.xlu1 %v2523_v20  ;;  %v2573_v20 = vld [vmem:[%s6630_s17 + $0x30] sm:$0xff] }
 0xb70   : > { %v5298_v26 = vcombine.high %v2573_v20, %v2581_v21 }
 0xbc8   : > { %v2522_v10 = vpop.xlane.xlu0 %2521 }
 0xbc9   : > { %v2530_v28 = vmul.f32 0.03125, %v2522_v10  ;;  %v2519_v13 = vpop.xlane.xlu1 %2518  ;;  %v2597_v10 = vld [vmem:[%s6630_s17 + $0xf0] sm:$0xff] }
 0xbca   : > { %v2529_v30 = vmul.f32 0.03125, %v2519_v13  ;;  %v2598_v13 = vld [vmem:[%s6630_s17 + $0xf8] sm:$0xff] }
 0xbcb   : > { %v2534_v47 = vadd.f32 1e-05, %v2530_v28  ;;  %v2590_v28 = vld [vmem:[%s6630_s17 + $0xb8] sm:$0xff] }
 0xbcc   : > { %v2533_v33 = vadd.f32 1e-05, %v2529_v30  ;;  %v5297_v30 = vcombine.low %v2573_v20, %v2581_v21 }
 0xbcd   : > { %6411 = vrsqrt.f32 %v2534_v47  ;;  %v5299_v47 = vcombine.low %v2574_v22, %v2582_v23 }
 0xbce   : > { %6413 = vrsqrt.f32 %v2533_v33  ;;  %v5314_v33 = vcombine.high %v2589_v11, %v2597_v10 }
 0xbd7   : > { %v6412_v35 = vpop.eup %6411 }
 0xbd8   : > { %v6414_v12 = vpop.eup %6413  ;;  %v2542_v38 = vmul.f32 %v6412_v35, %v6970_v52  ;;  %v5308_v52 = vcombine.high %v2586_v46, %v2594_v48  ;;  %v5316_v35 = vcombine.high %v2590_v28, %v2598_v13  ;;  %v6226_v46 = vld [vmem:[%s6642_s19 + $0x88] sm:$0xff]   ;;  %v6227_v48 = vld [vmem:[%s6642_s19 + $0x50] sm:$0xff]  }
 0xbd9   : > { %v2541_v40 = vmul.f32 %v6414_v12, %v6972_v53  ;;  %v2580_v53 = vld [vmem:[%s6630_s17 + $0x68] sm:$0xff]  ;;  %v5315_v12 = vcombine.low %v2590_v28, %v2598_v13 }
 0xbda   : > { %v2552_v55 = vmul.f32 %v5283_v49, %v2542_v38  ;;  %v5296_v61 = vcombine.high %v2572_v57, %v2580_v53  ;;  %v5295_v17 = vcombine.low %v2572_v57, %v2580_v53  ;;  %v6219_v38 = vld [vmem:[%s6642_s19 + $0x40] sm:$0xff]   ;;  %v6234_v57 = vld [vmem:[%s6642_s19 + $0x98] sm:$0xff]  }
 0xbdb   : > { %v2551_v42 = vmul.f32 %v5283_v49, %v2541_v40  ;;  %v6221_v40 = vld [vmem:[%s6642_s19] sm:$0xff]  }
 0xbdc   : > { %v7016_v43 = vadd.f32 %v5284_v39, %v2552_v55  ;;  %v6222_v55 = vld [vmem:[%s6642_s19 + $0x80] sm:$0xff]  }
 0xbdd   : > { %v7019_v44 = vadd.f32 %v5284_v39, %v2551_v42  ;;  %v6223_v42 = vld [vmem:[%s6642_s19 + $0x48] sm:$0xff]   ;;  %v6235_v53 = vld [vmem:[%s6642_s19 + $0x60] sm:$0xff]  }
 0xbdf   : > { %v7026_v50 = vpack.c.bf16 %v7016_v43, %v7019_v44 }
 0xbe1   : > { %5317 = vmatmul.mubr.msk.bf16.vlgmr.msra.gmra.mrb[20].mxu0 %vm896_vm2, %v7026_v50  ;;  %5319 = vmatmul.mubr.msk.bf16.vlgmr.msra.gmra.mrb[20].mxu1 %vm896_vm2, %v7026_v50 }
 0xbe2   : > { %2956 = vmatpush1.bf16.msra.mxu0 %v5289_v24  ;;  %3009 = vmatpush1.bf16.msra.mxu1 %v5291_v27  ;;  %v5309_v24 = vcombine.low %v2587_v8, %v2595_v9  ;;  %v5300_v27 = vcombine.high %v2574_v22, %v2582_v23  ;;  %v2603_v8 = vlaneseq }
 0xbe3   : > { %2891 = vmatprep.mubr.bf16.mxu0 %v6480_v6  ;;  %2944 = vmatprep.mubr.bf16.mxu1 %v6480_v6 }
 0xbe4   : > { %2957 = vmatprep.subr.bf16.mxu0 %v5306_v41  ;;  %3010 = vmatprep.subr.bf16.mxu1 %v5308_v52  ;;  %v6230_v41 = vld [vmem:[%s6642_s19 + $0x90] sm:$0xff]   ;;  %v6232_v52 = vld [vmem:[%s6642_s19 + $0xd8] sm:$0xff]   ;;  %v7134_v9 = vshrl.u32 %v2603_v8, 7  ;;  %v6274_v8 = vld [vmem:[%s6642_s19 + $0x1a8] sm:$0xff]  }
 0xbe6   : > { %2958 = vmatpush1.bf16.msra.mxu0 %v5305_v58  ;;  %3011 = vmatpush1.bf16.msra.mxu1 %v5307_v59  ;;  %v6236_v58 = vld [vmem:[%s6642_s19 + $0xe0] sm:$0xff]  }
 0xbe7   : > { %3061 = vmatprep.subr.bf16.mxu0 %v5294_v60  ;;  %3114 = vmatprep.subr.bf16.mxu1 %v5296_v61  ;;  %v6237_v59 = vld [vmem:[%s6642_s19 + $0x20] sm:$0xff]   ;;  %v6239_v61 = vld [vmem:[%s6642_s19 + $0x68] sm:$0xff]  }
 0xbe8   : > { %v6238_v60 = vld [vmem:[%s6642_s19 + $0xa0] sm:$0xff]  }
 0xbfb   : > { %v2528_v0 = vpop.xlane.xlu0 %2527 }
 0xbfc   : > { %v2532_v62 = vmul.f32 0.03125, %v2528_v0  ;;  %v2525_v63 = vpop.xlane.xlu1 %2524  ;;  %v6240_v0 = vld [vmem:[%s6642_s19 + $0xe8] sm:$0xff]  }
 0xbfd   : > { %v2531_v32 = vmul.f32 0.03125, %v2525_v63  ;;  %v6242_v63 = vld [vmem:[%s6642_s19 + $0xa8] sm:$0xff]  }
 0xbfe   : > { %v2536_v37 = vadd.f32 1e-05, %v2532_v62  ;;  %v6241_v62 = vld [vmem:[%s6642_s19 + $0x28] sm:$0xff]  }
 0xbff   : > { %v2535_v29 = vadd.f32 1e-05, %v2531_v32  ;;  %v6243_v32 = vld [vmem:[%s6642_s19 + $0x70] sm:$0xff]  }
 0xc00   : > { %6415 = vrsqrt.f32 %v2536_v37  ;;  %v6244_v37 = vld [vmem:[%s6642_s19 + $0xf0] sm:$0xff]  }
 0xc01   : > { %6417 = vrsqrt.f32 %v2535_v29  ;;  %v6245_v29 = vld [vmem:[%s6642_s19 + $0x30] sm:$0xff]  }
 0xc0a   : > { %v6416_v31 = vpop.eup %6415 }
 0xc0b   : > { %v6418_v34 = vpop.eup %6417  ;;  %v2544_v36 = vmul.f32 %v6416_v31, %v6990_v15  ;;  %v2596_v15 = vld [vmem:[%s6630_s17 + $0xe8] sm:$0xff]  ;;  %v6246_v31 = vld [vmem:[%s6642_s19 + $0xb0] sm:$0xff]  }
 0xc0c   : > { %v2543_v1 = vmul.f32 %v6418_v34, %v6992_v16  ;;  %v5293_v16 = vcombine.low %v2571_v51, %v2579_v56  ;;  %v5312_v19 = vcombine.high %v2588_v14, %v2596_v15  ;;  %v5311_v25 = vcombine.low %v2588_v14, %v2596_v15  ;;  %v6228_v51 = vld [vmem:[%s6642_s19 + $0xd0] sm:$0xff]   ;;  %v6233_v56 = vld [vmem:[%s6642_s19 + $0x18] sm:$0xff]  }
 0xc0d   : > { %v2554_v2 = vmul.f32 %v5283_v49, %v2544_v36  ;;  %v6247_v34 = vld [vmem:[%s6642_s19 + $0x78] sm:$0xff]   ;;  %v2605_v14 = vsub.s32 0, %v7134_v9  ;;  %v2613_v15 = vsub.s32 2, %v7134_v9 }
 0xc0e   : > { %v2553_v3 = vmul.f32 %v5283_v49, %v2543_v1  ;;  %v5313_v49 = vcombine.low %v2589_v11, %v2597_v10  ;;  %v6248_v36 = vld [vmem:[%s6642_s19 + $0xf8] sm:$0xff]  }
 0xc0f   : > { %v7040_v4 = vadd.f32 %v5284_v39, %v2554_v2  ;;  %v6249_v1 = vld [vmem:[%s6642_s19 + $0x38] sm:$0xff]  }
 0xc10   : > { %v7042_v5 = vadd.f32 %v5284_v39, %v2553_v3  ;;  %v6220_v39 = vld [vmem:[%s6642_s19 + $0xc0] sm:$0xff]   ;;  %v6250_v2 = vld [vmem:[%s6642_s19 + $0xb8] sm:$0xff]  }
 0xc11   : > { %v6251_v3 = vld [vmem:[%s6642_s19 + $0x140] sm:$0xff]  }
 0xc12   : > { %v7046_v7 = vpack.c.bf16 %v7040_v4, %v7042_v5 }
 0xc14   : > { %5318 = vmatmul.mubr.msk.bf16.gmra.mrb[24].mxu0 %vm896_vm2, %v7046_v7  ;;  %5320 = vmatmul.mubr.msk.bf16.gmra.mrb[24].mxu1 %vm896_vm2, %v7046_v7 }
 0xc15   : > { %2987 = vmatprep.mubr.bf16.mxu0 %v6480_v6  ;;  %3040 = vmatprep.mubr.bf16.mxu1 %v6480_v6 }
 0xc1c   : > { %5321 = vmatmul.mubr.msk.bf16.vlgmr.msra.gmra.mrb[28].mxu0 %vm896_vm2, %v7026_v50  ;;  %5323 = vmatmul.mubr.msk.bf16.vlgmr.msra.gmra.mrb[28].mxu1 %vm896_vm2, %v7026_v50 }
 0xc1d   : > { %2997 = vmatprep.mubr.bf16.mxu0 %v6480_v6  ;;  %3050 = vmatprep.mubr.bf16.mxu1 %v6480_v6 }
 0xc1e   : > { %3062 = vmatpush1.bf16.msra.mxu0 %v5293_v16  ;;  %3115 = vmatpush1.bf16.msra.mxu1 %v5295_v17  ;;  %v7139_v16 = vld [vmem:[%s6636_s28] sm:$0xff]  ;;  %v2609_v17 = vsub.s32 1, %v7134_v9 }
 0xc1f   : > { %3063 = vmatprep.subr.bf16.mxu0 %v5310_v18  ;;  %3116 = vmatprep.subr.bf16.mxu1 %v5312_v19  ;;  %v2617_v18 = vsub.s32 3, %v7134_v9  ;;  %v7146_v19 = vrot.slane %v7139_v16, %v2605_v14  ;;  %v7151_v20 = vrot.slane %v7139_v16, %v2613_v15 }
 0xc20   : > { %v7156_v21 = vrot.slane %v7139_v16, %v2609_v17 }
 0xc21   : > { %v7161_v22 = vrot.slane %v7139_v16, %v2617_v18 }
 0xc22   : > { %3064 = vmatpush1.bf16.msra.mxu0 %v5309_v24  ;;  %3117 = vmatpush1.bf16.msra.mxu1 %v5311_v25 }
 0xc23   : > { %3167 = vmatprep.subr.bf16.mxu0 %v5298_v26  ;;  %3220 = vmatprep.subr.bf16.mxu1 %v5300_v27 }
 0xc24   : > { %5322 = vmatmul.mubr.msk.bf16.gmra.mrb[32].mxu0 %vm896_vm2, %v7046_v7  ;;  %5324 = vmatmul.mubr.msk.bf16.gmra.mrb[32].mxu1 %vm896_vm2, %v7046_v7 }
 0xc25   : > { %3093 = vmatprep.mubr.bf16.mxu0 %v6480_v6  ;;  %3146 = vmatprep.mubr.bf16.mxu1 %v6480_v6 }
 0xc2c   : > { %5325 = vmatmul.mubr.msk.bf16.vlgmr.msra.gmra.mrb[36].mxu0 %vm896_vm2, %v7026_v50  ;;  %5327 = vmatmul.mubr.msk.bf16.vlgmr.msra.gmra.mrb[36].mxu1 %vm896_vm2, %v7026_v50 }
 0xc2d   : > { %3103 = vmatprep.mubr.bf16.mxu0 %v6480_v6  ;;  %3156 = vmatprep.mubr.bf16.mxu1 %v6480_v6 }
 0xc2e   : > { %3168 = vmatpush1.bf16.msra.mxu0 %v5297_v30  ;;  %3221 = vmatpush1.bf16.msra.mxu1 %v5299_v47 }
 0xc2f   : > { %3169 = vmatprep.subr.bf16.mxu0 %v5314_v33  ;;  %3222 = vmatprep.subr.bf16.mxu1 %v5316_v35 }
 0xc32   : > { %3170 = vmatpush1.bf16.msra.mxu0 %v5313_v49  ;;  %3223 = vmatpush1.bf16.msra.mxu1 %v5315_v12 }
 0xc33   : > { %5573 = vmatprep.subr.bf16.mxu0 %v6219_v38  ;;  %5601 = vmatprep.subr.bf16.mxu1 %v6220_v39 }
 0xc34   : > { %5326 = vmatmul.mubr.msk.bf16.gmra.mrb[40].mxu0 %vm896_vm2, %v7046_v7  ;;  %5328 = vmatmul.mubr.msk.bf16.gmra.mrb[40].mxu1 %vm896_vm2, %v7046_v7 }
 0xc35   : > { %3199 = vmatprep.mubr.bf16.mxu0 %v6480_v6  ;;  %3252 = vmatprep.mubr.bf16.mxu1 %v6480_v6 }
 0xc3c   : > { %5329 = vmatmul.mubr.msk.bf16.vlgmr.msra.gmra.mrb[44].mxu0 %vm896_vm2, %v7026_v50  ;;  %5331 = vmatmul.mubr.msk.bf16.vlgmr.msra.gmra.mrb[44].mxu1 %vm896_vm2, %v7026_v50  ;;  %v6229_v50 = vld [vmem:[%s6642_s19 + $0x10] sm:$0xff]  }
 0xc3d   : > { %3209 = vmatprep.mubr.bf16.mxu0 %v6480_v6  ;;  %3262 = vmatprep.mubr.bf16.mxu1 %v6480_v6  ;;  %v6231_v6 = vld [vmem:[%s6642_s19 + $0x58] sm:$0xff]  }
 0xc3e   : > { %5574 = vmatpush3.bf16.msra.mxu0 %v6221_v40  ;;  %5602 = vmatpush3.bf16.msra.mxu1 %v6222_v55 }
 0xc3f   : > { %5575 = vmatprep.subr.bf16.mxu0 %v6223_v42  ;;  %5603 = vmatprep.subr.bf16.mxu1 %v6224_v54 }
 0xc42   : > { %5576 = vmatpush3.bf16.msra.mxu0 %v6225_v45  ;;  %5604 = vmatpush3.bf16.msra.mxu1 %v6226_v46 }
 0xc43   : > { %5577 = vmatprep.subr.bf16.mxu0 %v6227_v48  ;;  %5605 = vmatprep.subr.bf16.mxu1 %v6228_v51 }
 0xc44   : > { %5330 = vmatmul.mubr.msk.bf16.gmra.mrb[48].mxu0 %vm896_vm2, %v7046_v7  ;;  %5332 = vmatmul.mubr.msk.bf16.gmra.mrb[48].mxu1 %vm896_vm2, %v7046_v7  ;;  %v6252_v7 = vld [vmem:[%s6642_s19 + $0x1c0] sm:$0xff]  }
 0xc46   : > { %5578 = vmatpush3.bf16.msra.mxu0 %v6229_v50  ;;  %5606 = vmatpush3.bf16.msra.mxu1 %v6230_v41 }
 0xc47   : > { %5579 = vmatprep.subr.bf16.mxu0 %v6231_v6  ;;  %5607 = vmatprep.subr.bf16.mxu1 %v6232_v52  ;;  %v6253_v52 = vld [vmem:[%s6642_s19 + $0x100] sm:$0xff]  }
 0xc4a   : > { %5580 = vmatpush3.bf16.msra.mxu0 %v6233_v56  ;;  %5608 = vmatpush3.bf16.msra.mxu1 %v6234_v57  ;;  %v6254_v56 = vld [vmem:[%s6642_s19 + $0x180] sm:$0xff]   ;;  %v6255_v57 = vld [vmem:[%s6642_s19 + $0x148] sm:$0xff]  }
 0xc4b   : > { %5581 = vmatprep.subr.bf16.mxu0 %v6235_v53  ;;  %5609 = vmatprep.subr.bf16.mxu1 %v6236_v58  ;;  %v6256_v53 = vld [vmem:[%s6642_s19 + $0x1c8] sm:$0xff]  }
 0xc4c   : > { %v6257_v58 = vld [vmem:[%s6642_s19 + $0x108] sm:$0xff]  }
 0xc4e   : > { %5582 = vmatpush3.bf16.msra.mxu0 %v6237_v59  ;;  %5610 = vmatpush3.bf16.msra.mxu1 %v6238_v60  ;;  %v6258_v59 = vld [vmem:[%s6642_s19 + $0x188] sm:$0xff]   ;;  %v6259_v60 = vld [vmem:[%s6642_s19 + $0x150] sm:$0xff]  }
 0xc4f   : > { %5583 = vmatprep.subr.bf16.mxu0 %v6239_v61  ;;  %5611 = vmatprep.subr.bf16.mxu1 %v6240_v0  ;;  %v6260_v61 = vld [vmem:[%s6642_s19 + $0x1d0] sm:$0xff]  }
 0xc50   : > { %v6261_v0 = vld [vmem:[%s6642_s19 + $0x110] sm:$0xff]  }
 0xc52   : > { %5584 = vmatpush3.bf16.msra.mxu0 %v6241_v62  ;;  %5612 = vmatpush3.bf16.msra.mxu1 %v6242_v63  ;;  %v6262_v62 = vld [vmem:[%s6642_s19 + $0x190] sm:$0xff]   ;;  %v6263_v63 = vld [vmem:[%s6642_s19 + $0x158] sm:$0xff]  }
 0xc53   : > { %5585 = vmatprep.subr.bf16.mxu0 %v6243_v32  ;;  %5613 = vmatprep.subr.bf16.mxu1 %v6244_v37  ;;  %v6264_v32 = vld [vmem:[%s6642_s19 + $0x1d8] sm:$0xff]  }
 0xc54   : > { %v6265_v37 = vld [vmem:[%s6642_s19 + $0x118] sm:$0xff]  }
 0xc56   : > { %5586 = vmatpush3.bf16.msra.mxu0 %v6245_v29  ;;  %5614 = vmatpush3.bf16.msra.mxu1 %v6246_v31  ;;  %v6266_v29 = vld [vmem:[%s6642_s19 + $0x198] sm:$0xff]   ;;  %v6267_v31 = vld [vmem:[%s6642_s19 + $0x160] sm:$0xff]  }
 0xc57   : > { %5587 = vmatprep.subr.bf16.mxu0 %v6247_v34  ;;  %5615 = vmatprep.subr.bf16.mxu1 %v6248_v36  ;;  %v6268_v34 = vld [vmem:[%s6642_s19 + $0x1e0] sm:$0xff]  }
 0xc58   : > { %v6269_v36 = vld [vmem:[%s6642_s19 + $0x120] sm:$0xff]  }
 0xc5a   : > { %5588 = vmatpush3.bf16.msra.mxu0 %v6249_v1  ;;  %5616 = vmatpush3.bf16.msra.mxu1 %v6250_v2  ;;  %v6270_v1 = vld [vmem:[%s6642_s19 + $0x1a0] sm:$0xff]   ;;  %v6271_v2 = vld [vmem:[%s6642_s19 + $0x168] sm:$0xff]  }
 0xc5b   : > { %5629 = vmatprep.subr.bf16.mxu0 %v6251_v3  ;;  %5657 = vmatprep.subr.bf16.mxu1 %v6252_v7  ;;  %v6272_v3 = vld [vmem:[%s6642_s19 + $0x1e8] sm:$0xff]  }
 0xc5c   : > { %v6273_v7 = vld [vmem:[%s6642_s19 + $0x128] sm:$0xff]  }
 0xcb4   : > { %v2883_v23 = vpop.f32.mrb[20].mxu0  ;;  %v2936_v24 = vpop.f32.mrb[20].mxu1 }
 0xcb5   : > { %v2884_v25 = vadd.f32 %v2883_v23, %v7146_v19  ;;  %v2937_v26 = vadd.f32 %v2936_v24, %v7151_v20  ;;  %v2885_v27 = vpop.f32.mrb[21].mxu0  ;;  %v2938_v11 = vpop.f32.mrb[21].mxu1  ;;  %v6275_v23 = vld [vmem:[%s6642_s19 + $0x170] sm:$0xff]  }
 0xcb6   : > { %v2886_v10 = vadd.f32 %v2885_v27, %v7156_v21  ;;  %v2939_v28 = vadd.f32 %v2938_v11, %v7161_v22  ;;  %v2887_v13 = vpop.f32.mrb[22].mxu0  ;;  %v2940_v30 = vpop.f32.mrb[22].mxu1  ;;  %v6276_v24 = vld [vmem:[%s6642_s19 + $0x1f0] sm:$0xff]   ;;  %v6279_v27 = vld [vmem:[%s6642_s19 + $0x178] sm:$0xff]  }
 0xcb7   : > { %v2888_v47 = vadd.f32 %v2887_v13, %v7146_v19  ;;  %v2941_v33 = vadd.f32 %v2940_v30, %v7151_v20  ;;  %v2889_v35 = vpop.f32.mrb[23].mxu0  ;;  %v2942_v49 = vpop.f32.mrb[23].mxu1  ;;  %v3273_v39 = vmax.f32 %v2884_v25, 0.0  ;;  %v3275_v40 = vmax.f32 %v2937_v26, 0.0  ;;  %v6277_v25 = vld [vmem:[%s6642_s19 + $0x130] sm:$0xff]   ;;  %v6280_v11 = vld [vmem:[%s6642_s19 + $0x1f8] sm:$0xff]  }
 0xcb8   : > { %v2890_v12 = vadd.f32 %v2889_v35, %v7156_v21  ;;  %v2943_v38 = vadd.f32 %v2942_v49, %v7161_v22  ;;  %v3274_v54 = vmax.f32 %v2886_v10, 0.0  ;;  %v3276_v45 = vmax.f32 %v2939_v28, 0.0  ;;  %v6278_v26 = vld [vmem:[%s6642_s19 + $0x1b0] sm:$0xff]   ;;  %v6281_v10 = vld [vmem:[%s6642_s19 + $0x138] sm:$0xff]   ;;  %v6283_v13 = vld [vmem:[%s6642_s19 + $0x240] sm:$0xff]  }
 0xcb9   : > { %v3289_v55 = vmax.f32 %v2888_v47, 0.0  ;;  %v3291_v42 = vmax.f32 %v2941_v33, 0.0  ;;  %v6282_v28 = vld [vmem:[%s6642_s19 + $0x1b8] sm:$0xff]   ;;  %v6284_v30 = vld [vmem:[%s6642_s19 + $0x2c0] sm:$0xff]   ;;  %v2621_v47 = vsub.s32 4, %v7134_v9  ;;  %v2629_v33 = vsub.s32 6, %v7134_v9 }
 0xcba   : > { %v3290_v46 = vmax.f32 %v2890_v12, 0.0  ;;  %v3292_v48 = vmax.f32 %v2943_v38, 0.0  ;;  %v2625_v12 = vsub.s32 5, %v7134_v9  ;;  %v2633_v38 = vsub.s32 7, %v7134_v9 }
 0xcbb   : > { %v3337_v51 = vpack.c.bf16 %v3289_v55, %v3273_v39  ;;  %v3339_v50 = vpack.c.bf16 %v3291_v42, %v3275_v40 }
 0xcbc   : > { %v3338_v41 = vpack.c.bf16 %v3290_v46, %v3274_v54  ;;  %v3340_v6 = vpack.c.bf16 %v3292_v48, %v3276_v45 }
 0xcbe   : > { %4432 = vmatprep.mubr.bf16.mxu0 %v3338_v41  ;;  %4481 = vmatprep.mubr.bf16.mxu1 %v3340_v6 }
 0xcbf   : > { %4433 = vmatmul.mubr.bf16.vlgmr.msra.gmra.mrb[52].mxu0 %v3337_v51  ;;  %4482 = vmatmul.mubr.bf16.vlgmr.msra.gmra.mrb[52].mxu1 %v3339_v50 }
 0xcc0   : > { %5630 = vmatpush3.bf16.msra.mxu0 %v6253_v52  ;;  %5658 = vmatpush3.bf16.msra.mxu1 %v6254_v56  ;;  %v7216_v52 = vrot.slane %v7139_v16, %v2621_v47  ;;  %v7221_v56 = vrot.slane %v7139_v16, %v2629_v33 }
 0xcc1   : > { %5631 = vmatprep.subr.bf16.mxu0 %v6255_v57  ;;  %5659 = vmatprep.subr.bf16.mxu1 %v6256_v53 }
 0xcc4   : > { %5632 = vmatpush3.bf16.msra.mxu0 %v6257_v58  ;;  %5660 = vmatpush3.bf16.msra.mxu1 %v6258_v59 }
 0xcc5   : > { %5633 = vmatprep.subr.bf16.mxu0 %v6259_v60  ;;  %5661 = vmatprep.subr.bf16.mxu1 %v6260_v61 }
 0xcc8   : > { %5634 = vmatpush3.bf16.msra.mxu0 %v6261_v0  ;;  %5662 = vmatpush3.bf16.msra.mxu1 %v6262_v62 }
 0xcc9   : > { %5635 = vmatprep.subr.bf16.mxu0 %v6263_v63  ;;  %5663 = vmatprep.subr.bf16.mxu1 %v6264_v32 }
 0xccc   : > { %5636 = vmatpush3.bf16.msra.mxu0 %v6265_v37  ;;  %5664 = vmatpush3.bf16.msra.mxu1 %v6266_v29 }
 0xccd   : > { %5637 = vmatprep.subr.bf16.mxu0 %v6267_v31  ;;  %5665 = vmatprep.subr.bf16.mxu1 %v6268_v34 }
 0xcd0   : > { %5638 = vmatpush3.bf16.msra.mxu0 %v6269_v36  ;;  %5666 = vmatpush3.bf16.msra.mxu1 %v6270_v1 }
 0xcd1   : > { %5639 = vmatprep.subr.bf16.mxu0 %v6271_v2  ;;  %5667 = vmatprep.subr.bf16.mxu1 %v6272_v3 }
 0xcd4   : > { %5640 = vmatpush3.bf16.msra.mxu0 %v6273_v7  ;;  %5668 = vmatpush3.bf16.msra.mxu1 %v6274_v8 }
 0xcd5   : > { %5641 = vmatprep.subr.bf16.mxu0 %v6275_v23  ;;  %5669 = vmatprep.subr.bf16.mxu1 %v6276_v24 }
 0xcd8   : > { %5642 = vmatpush3.bf16.msra.mxu0 %v6277_v25  ;;  %5670 = vmatpush3.bf16.msra.mxu1 %v6278_v26 }
 0xcd9   : > { %5643 = vmatprep.subr.bf16.mxu0 %v6279_v27  ;;  %5671 = vmatprep.subr.bf16.mxu1 %v6280_v11 }
 0xcdc   : > { %5644 = vmatpush3.bf16.msra.mxu0 %v6281_v10  ;;  %5672 = vmatpush3.bf16.msra.mxu1 %v6282_v28 }
 0xcdd   : > { %5685 = vmatprep.subr.bf16.mxu0 %v6283_v13  ;;  %5713 = vmatprep.subr.bf16.mxu1 %v6284_v30 }
 0xce7   : > { %v2893_v35 = vpop.f32.mrb[24].mxu0  ;;  %v2946_v49 = vpop.f32.mrb[24].mxu1 }
 0xce8   : > { %v2894_v39 = vadd.f32 %v2893_v35, %v7146_v19  ;;  %v2947_v40 = vadd.f32 %v2946_v49, %v7151_v20  ;;  %v2895_v55 = vpop.f32.mrb[25].mxu0  ;;  %v2948_v42 = vpop.f32.mrb[25].mxu1 }
 0xce9   : > { %v2896_v54 = vadd.f32 %v2895_v55, %v7156_v21  ;;  %v2949_v45 = vadd.f32 %v2948_v42, %v7161_v22  ;;  %v2897_v46 = vpop.f32.mrb[26].mxu0  ;;  %v2950_v48 = vpop.f32.mrb[26].mxu1  ;;  %v7244_v42 = vld [vmem:[%s6636_s28 + $0x8] sm:$0xff] }
 0xcea   : > { %v2898_v51 = vadd.f32 %v2897_v46, %v7146_v19  ;;  %v2951_v50 = vadd.f32 %v2950_v48, %v7151_v20  ;;  %v2899_v41 = vpop.f32.mrb[27].mxu0  ;;  %v2952_v6 = vpop.f32.mrb[27].mxu1  ;;  %v7228_v19 = vrot.slane %v7139_v16, %v2625_v12  ;;  %v7233_v20 = vrot.slane %v7139_v16, %v2633_v38 }
 0xceb   : > { %v2900_v57 = vadd.f32 %v2899_v41, %v7156_v21  ;;  %v2953_v53 = vadd.f32 %v2952_v6, %v7161_v22  ;;  %v3305_v58 = vmax.f32 %v2894_v39, 0.0  ;;  %v3307_v59 = vmax.f32 %v2947_v40, 0.0  ;;  %v6285_v41 = vld [vmem:[%s6642_s19 + $0x200] sm:$0xff]  }
 0xcec   : > { %v3321_v60 = vmax.f32 %v2898_v51, 0.0  ;;  %v3323_v61 = vmax.f32 %v2951_v50, 0.0  ;;  %v3306_v0 = vmax.f32 %v2896_v54, 0.0  ;;  %v3308_v62 = vmax.f32 %v2949_v45, 0.0  ;;  %v6286_v6 = vld [vmem:[%s6642_s19 + $0x280] sm:$0xff]  }
 0xced   : > { %v3322_v63 = vmax.f32 %v2900_v57, 0.0  ;;  %v3324_v21 = vmax.f32 %v2953_v53, 0.0 }
 0xcee   : > { %v3353_v32 = vpack.c.bf16 %v3321_v60, %v3305_v58  ;;  %v3355_v22 = vpack.c.bf16 %v3323_v61, %v3307_v59  ;;  %v6287_v60 = vld [vmem:[%s6642_s19 + $0x248] sm:$0xff]  }
 0xcef   : > { %v3354_v37 = vpack.c.bf16 %v3322_v63, %v3306_v0  ;;  %v3356_v29 = vpack.c.bf16 %v3324_v21, %v3308_v62  ;;  %v2989_v31 = vpop.f32.mrb[28].mxu0  ;;  %v3042_v34 = vpop.f32.mrb[28].mxu1  ;;  %v6288_v61 = vld [vmem:[%s6642_s19 + $0x2c8] sm:$0xff]   ;;  %v7255_v0 = vrot.slane %v7244_v42, %v2605_v14 }
 0xcf0   : > { %v2990_v36 = vadd.f32 %v2989_v31, %v7216_v52  ;;  %v3043_v1 = vadd.f32 %v3042_v34, %v7221_v56  ;;  %v2991_v16 = vpop.f32.mrb[29].mxu0  ;;  %v3044_v2 = vpop.f32.mrb[29].mxu1  ;;  %v7269_v34 = vrot.slane %v7244_v42, %v2609_v17  ;;  %v6291_v17 = vld [vmem:[%s6642_s19 + $0x250] sm:$0xff]  }
 0xcf1   : > { %v2992_v3 = vadd.f32 %v2991_v16, %v7228_v19  ;;  %v3045_v7 = vadd.f32 %v3044_v2, %v7233_v20  ;;  %v2993_v8 = vpop.f32.mrb[30].mxu0  ;;  %v3046_v23 = vpop.f32.mrb[30].mxu1  ;;  %4440 = vmatprep.mubr.bf16.mxu0 %v3354_v37  ;;  %4489 = vmatprep.mubr.bf16.mxu1 %v3356_v29 }
 0xcf2   : > { %v2994_v24 = vadd.f32 %v2993_v8, %v7216_v52  ;;  %v3047_v25 = vadd.f32 %v3046_v23, %v7221_v56  ;;  %v2995_v26 = vpop.f32.mrb[31].mxu0  ;;  %v3048_v27 = vpop.f32.mrb[31].mxu1  ;;  %4441 = vmatmul.mubr.bf16.gmra.mrb[56].mxu0 %v3353_v32  ;;  %4490 = vmatmul.mubr.bf16.gmra.mrb[56].mxu1 %v3355_v22  ;;  %v3277_v28 = vmax.f32 %v2990_v36, 0.0  ;;  %v3279_v13 = vmax.f32 %v3043_v1, 0.0  ;;  %v6290_v1 = vld [vmem:[%s6642_s19 + $0x288] sm:$0xff]  }
 0xcf3   : > { %v2996_v11 = vadd.f32 %v2995_v26, %v7228_v19  ;;  %v3049_v10 = vadd.f32 %v3048_v27, %v7233_v20  ;;  %v3278_v49 = vmax.f32 %v2992_v3, 0.0  ;;  %v3280_v39 = vmax.f32 %v3045_v7, 0.0 }
 0xcf4   : > { %v3293_v30 = vmax.f32 %v2994_v24, 0.0  ;;  %v3295_v35 = vmax.f32 %v3047_v25, 0.0  ;;  %v7262_v22 = vrot.slane %v7244_v42, %v2613_v15 }
 0xcf5   : > { %v3294_v40 = vmax.f32 %v2996_v11, 0.0  ;;  %v3296_v55 = vmax.f32 %v3049_v10, 0.0 }
 0xcf6   : > { %v3341_v54 = vpack.c.bf16 %v3293_v30, %v3277_v28  ;;  %v3343_v45 = vpack.c.bf16 %v3295_v35, %v3279_v13  ;;  %v6293_v28 = vld [vmem:[%s6642_s19 + $0x210] sm:$0xff]  }
 0xcf7   : > { %v3342_v46 = vpack.c.bf16 %v3294_v40, %v3278_v49  ;;  %v3344_v48 = vpack.c.bf16 %v3296_v55, %v3280_v39  ;;  %v2999_v51 = vpop.f32.mrb[32].mxu0  ;;  %v3052_v50 = vpop.f32.mrb[32].mxu1  ;;  %v6294_v13 = vld [vmem:[%s6642_s19 + $0x290] sm:$0xff]   ;;  %v6295_v40 = vld [vmem:[%s6642_s19 + $0x258] sm:$0xff]  }
 0xcf8   : > { %v3000_v57 = vadd.f32 %v2999_v51, %v7216_v52  ;;  %v3053_v53 = vadd.f32 %v3052_v50, %v7221_v56  ;;  %v3001_v58 = vpop.f32.mrb[33].mxu0  ;;  %v3054_v59 = vpop.f32.mrb[33].mxu1  ;;  %v6296_v55 = vld [vmem:[%s6642_s19 + $0x2d8] sm:$0xff]  }
 0xcf9   : > { %v3002_v62 = vadd.f32 %v3001_v58, %v7228_v19  ;;  %v3055_v63 = vadd.f32 %v3054_v59, %v7233_v20  ;;  %v3003_v21 = vpop.f32.mrb[34].mxu0  ;;  %v3056_v32 = vpop.f32.mrb[34].mxu1  ;;  %4530 = vmatprep.mubr.bf16.mxu0 %v3342_v46  ;;  %4579 = vmatprep.mubr.bf16.mxu1 %v3344_v48  ;;  %v6297_v58 = vld [vmem:[%s6642_s19 + $0x218] sm:$0xff]  }
 0xcfa   : > { %v3004_v37 = vadd.f32 %v3003_v21, %v7216_v52  ;;  %v3057_v14 = vadd.f32 %v3056_v32, %v7221_v56  ;;  %v3005_v29 = vpop.f32.mrb[35].mxu0  ;;  %v3058_v31 = vpop.f32.mrb[35].mxu1  ;;  %4531 = vmatmul.mubr.bf16.vlgmr.msra.gmra.mrb[60].mxu0 %v3341_v54  ;;  %4580 = vmatmul.mubr.bf16.vlgmr.msra.gmra.mrb[60].mxu1 %v3343_v45  ;;  %v6289_v52 = vld [vmem:[%s6642_s19 + $0x208] sm:$0xff]   ;;  %v7278_v56 = vrot.slane %v7244_v42, %v2617_v18  ;;  %v3309_v16 = vmax.f32 %v3000_v57, 0.0  ;;  %v6298_v59 = vld [vmem:[%s6642_s19 + $0x298] sm:$0xff]   ;;  %v6299_v21 = vld [vmem:[%s6642_s19 + $0x260] sm:$0xff]  }
 0xcfb   : > { %v3006_v36 = vadd.f32 %v3005_v29, %v7228_v19  ;;  %v3059_v15 = vadd.f32 %v3058_v31, %v7233_v20  ;;  %5686 = vmatpush3.bf16.msra.mxu0 %v6285_v41  ;;  %5714 = vmatpush3.bf16.msra.mxu1 %v6286_v6  ;;  %v3311_v2 = vmax.f32 %v3053_v53, 0.0  ;;  %v6292_v19 = vld [vmem:[%s6642_s19 + $0x2d0] sm:$0xff]   ;;  %v3310_v20 = vmax.f32 %v3002_v62, 0.0  ;;  %v6300_v32 = vld [vmem:[%s6642_s19 + $0x2e0] sm:$0xff]  }
 0xcfc   : > { %v3325_v3 = vmax.f32 %v3004_v37, 0.0  ;;  %v3327_v7 = vmax.f32 %v3057_v14, 0.0  ;;  %5687 = vmatprep.subr.bf16.mxu0 %v6287_v60  ;;  %5715 = vmatprep.subr.bf16.mxu1 %v6288_v61  ;;  %v3312_v8 = vmax.f32 %v3055_v63, 0.0 }
 0xcfd   : > { %v3326_v23 = vmax.f32 %v3006_v36, 0.0  ;;  %v3328_v24 = vmax.f32 %v3059_v15, 0.0 }
 0xcfe   : > { %v3357_v25 = vpack.c.bf16 %v3325_v3, %v3309_v16  ;;  %v3359_v26 = vpack.c.bf16 %v3327_v7, %v3311_v2  ;;  %v6301_v3 = vld [vmem:[%s6642_s19 + $0x220] sm:$0xff]  }
 0xcff   : > { %v3358_v18 = vpack.c.bf16 %v3326_v23, %v3310_v20  ;;  %v3360_v27 = vpack.c.bf16 %v3328_v24, %v3312_v8  ;;  %5688 = vmatpush3.bf16.msra.mxu0 %v6289_v52  ;;  %5716 = vmatpush3.bf16.msra.mxu1 %v6290_v1  ;;  %v3095_v11 = vpop.f32.mrb[36].mxu0  ;;  %v3148_v10 = vpop.f32.mrb[36].mxu1  ;;  %v6302_v7 = vld [vmem:[%s6642_s19 + $0x2a0] sm:$0xff]   ;;  %v6303_v23 = vld [vmem:[%s6642_s19 + $0x268] sm:$0xff]  }
 0xd00   : > { %v3096_v30 = vadd.f32 %v3095_v11, %v7255_v0  ;;  %v3149_v35 = vadd.f32 %v3148_v10, %v7262_v22  ;;  %v3097_v49 = vpop.f32.mrb[37].mxu0  ;;  %v3150_v39 = vpop.f32.mrb[37].mxu1  ;;  %5689 = vmatprep.subr.bf16.mxu0 %v6291_v17  ;;  %5717 = vmatprep.subr.bf16.mxu1 %v6292_v19  ;;  %v6304_v24 = vld [vmem:[%s6642_s19 + $0x2e8] sm:$0xff]   ;;  %v7313_v11 = vrot.slane %v7244_v42, %v2621_v47 }
 0xd01   : > { %v3098_v54 = vadd.f32 %v3097_v49, %v7269_v34  ;;  %v3151_v45 = vadd.f32 %v3150_v39, %v7278_v56  ;;  %v3099_v46 = vpop.f32.mrb[38].mxu0  ;;  %v3152_v48 = vpop.f32.mrb[38].mxu1  ;;  %4538 = vmatprep.mubr.bf16.mxu0 %v3358_v18  ;;  %4587 = vmatprep.mubr.bf16.mxu1 %v3360_v27  ;;  %v7325_v49 = vrot.slane %v7244_v42, %v2625_v12  ;;  %v6306_v39 = vld [vmem:[%s6642_s19 + $0x2a8] sm:$0xff]   ;;  %v6307_v12 = vld [vmem:[%s6642_s19 + $0x270] sm:$0xff]  }
 0xd02   : > { %v3100_v51 = vadd.f32 %v3099_v46, %v7255_v0  ;;  %v3153_v50 = vadd.f32 %v3152_v48, %v7262_v22  ;;  %v3101_v41 = vpop.f32.mrb[39].mxu0  ;;  %v3154_v6 = vpop.f32.mrb[39].mxu1  ;;  %4539 = vmatmul.mubr.bf16.gmra.mrb[64].mxu0 %v3357_v25  ;;  %4588 = vmatmul.mubr.bf16.gmra.mrb[64].mxu1 %v3359_v26  ;;  %v3281_v60 = vmax.f32 %v3096_v30, 0.0  ;;  %v3283_v61 = vmax.f32 %v3149_v35, 0.0 }
 0xd03   : > { %v3102_v57 = vadd.f32 %v3101_v41, %v7269_v34  ;;  %v3155_v53 = vadd.f32 %v3154_v6, %v7278_v56  ;;  %5690 = vmatpush3.bf16.msra.mxu0 %v6293_v28  ;;  %5718 = vmatpush3.bf16.msra.mxu1 %v6294_v13  ;;  %v3282_v37 = vmax.f32 %v3098_v54, 0.0  ;;  %v3284_v14 = vmax.f32 %v3151_v45, 0.0 }
 0xd04   : > { %v3297_v62 = vmax.f32 %v3100_v51, 0.0  ;;  %v3299_v63 = vmax.f32 %v3153_v50, 0.0  ;;  %5691 = vmatprep.subr.bf16.mxu0 %v6295_v40  ;;  %5719 = vmatprep.subr.bf16.mxu1 %v6296_v55  ;;  %v7320_v35 = vrot.slane %v7244_v42, %v2629_v33  ;;  %v7334_v40 = vrot.slane %v7244_v42, %v2633_v38 }
 0xd05   : > { %v3298_v29 = vmax.f32 %v3102_v57, 0.0  ;;  %v3300_v31 = vmax.f32 %v3155_v53, 0.0  ;;  %v6309_v57 = vld [vmem:[%s6642_s19 + $0x230] sm:$0xff]  }
 0xd06   : > { %v7298_v36 = vpack.c.bf16 %v3297_v62, %v3281_v60  ;;  %v7300_v15 = vpack.c.bf16 %v3299_v63, %v3283_v61  ;;  %v6310_v53 = vld [vmem:[%s6642_s19 + $0x2b0] sm:$0xff]   ;;  %v6311_v62 = vld [vmem:[%s6642_s19 + $0x278] sm:$0xff]  }
 0xd07   : > { %v3346_v52 = vpack.c.bf16 %v3298_v29, %v3282_v37  ;;  %v3348_v1 = vpack.c.bf16 %v3300_v31, %v3284_v14  ;;  %5692 = vmatpush3.bf16.msra.mxu0 %v6297_v58  ;;  %5720 = vmatpush3.bf16.msra.mxu1 %v6298_v59  ;;  %v3105_v16 = vpop.f32.mrb[40].mxu0  ;;  %v3158_v2 = vpop.f32.mrb[40].mxu1  ;;  %v6312_v63 = vld [vmem:[%s6642_s19 + $0x2f8] sm:$0xff]  }
 0xd08   : > { %v3106_v17 = vadd.f32 %v3105_v16, %v7255_v0  ;;  %v3159_v19 = vadd.f32 %v3158_v2, %v7262_v22  ;;  %v3107_v20 = vpop.f32.mrb[41].mxu0  ;;  %v3160_v8 = vpop.f32.mrb[41].mxu1  ;;  %5693 = vmatprep.subr.bf16.mxu0 %v6299_v21  ;;  %5721 = vmatprep.subr.bf16.mxu1 %v6300_v32 }
 0xd09   : > { %v3108_v25 = vadd.f32 %v3107_v20, %v7269_v34  ;;  %v3161_v26 = vadd.f32 %v3160_v8, %v7278_v56  ;;  %v3109_v18 = vpop.f32.mrb[42].mxu0  ;;  %v3162_v27 = vpop.f32.mrb[42].mxu1  ;;  %4628 = vmatprep.mubr.bf16.mxu0 %v3346_v52  ;;  %4677 = vmatprep.mubr.bf16.mxu1 %v3348_v1 }
 0xd0a   : > { %v3110_v10 = vadd.f32 %v3109_v18, %v7255_v0  ;;  %v3163_v28 = vadd.f32 %v3162_v27, %v7262_v22  ;;  %v3111_v13 = vpop.f32.mrb[43].mxu0  ;;  %v3164_v30 = vpop.f32.mrb[43].mxu1  ;;  %v6305_v22 = vld [vmem:[%s6642_s19 + $0x228] sm:$0xff]   ;;  %v3313_v33 = vmax.f32 %v3106_v17, 0.0  ;;  %v3315_v55 = vmax.f32 %v3159_v19, 0.0 }
 0xd0b   : > { %v3112_v47 = vadd.f32 %v3111_v13, %v7269_v34  ;;  %v3165_v0 = vadd.f32 %v3164_v30, %v7278_v56  ;;  %5694 = vmatpush3.bf16.msra.mxu0 %v6301_v3  ;;  %5722 = vmatpush3.bf16.msra.mxu1 %v6302_v7  ;;  %v6308_v34 = vld [vmem:[%s6642_s19 + $0x2f0] sm:$0xff]   ;;  %v3314_v56 = vmax.f32 %v3108_v25, 0.0  ;;  %v3316_v46 = vmax.f32 %v3161_v26, 0.0  ;;  %v6313_v3 = vld [vmem:[%s6642_s19 + $0x238] sm:$0xff]  }
 0xd0c   : > { %v3329_v54 = vmax.f32 %v3110_v10, 0.0  ;;  %v3331_v45 = vmax.f32 %v3163_v28, 0.0  ;;  %5695 = vmatprep.subr.bf16.mxu0 %v6303_v23  ;;  %5723 = vmatprep.subr.bf16.mxu1 %v6304_v24  ;;  %v6314_v7 = vld [vmem:[%s6642_s19 + $0x2b8] sm:$0xff]   ;;  %v6315_v23 = vld [vmem:[%s6642_s19 + $0x340] sm:$0xff]  }
 0xd0d   : > { %v3330_v48 = vmax.f32 %v3112_v47, 0.0  ;;  %v3332_v51 = vmax.f32 %v3165_v0, 0.0  ;;  %v6316_v24 = vld [vmem:[%s6642_s19 + $0x3c0] sm:$0xff]  }
 0xd0e   : > { %v7338_v50 = vpack.c.bf16 %v3329_v54, %v3313_v33  ;;  %v7340_v9 = vpack.c.bf16 %v3331_v45, %v3315_v55  ;;  %v6317_v54 = vld [vmem:[%s6642_s19 + $0x300] sm:$0xff]  }
 0xd0f   : > { %v7342_v38 = vpack.c.bf16 %v3330_v48, %v3314_v56  ;;  %v7344_v42 = vpack.c.bf16 %v3332_v51, %v3316_v46  ;;  %5696 = vmatpush3.bf16.msra.mxu0 %v6305_v22  ;;  %5724 = vmatpush3.bf16.msra.mxu1 %v6306_v39  ;;  %v3201_v41 = vpop.f32.mrb[44].mxu0  ;;  %v3254_v6 = vpop.f32.mrb[44].mxu1  ;;  %v6318_v45 = vld [vmem:[%s6642_s19 + $0x380] sm:$0xff]   ;;  %v6319_v48 = vld [vmem:[%s6642_s19 + $0x348] sm:$0xff]  }
 0xd10   : > { %v3202_v58 = vadd.f32 %v3201_v41, %v7313_v11  ;;  %v3255_v59 = vadd.f32 %v3254_v6, %v7320_v35  ;;  %v3203_v60 = vpop.f32.mrb[45].mxu0  ;;  %v3256_v61 = vpop.f32.mrb[45].mxu1  ;;  %5697 = vmatprep.subr.bf16.mxu0 %v6307_v12  ;;  %5725 = vmatprep.subr.bf16.mxu1 %v6308_v34  ;;  %v6320_v51 = vld [vmem:[%s6642_s19 + $0x3c8] sm:$0xff]  }
 0xd11   : > { %v3204_v21 = vadd.f32 %v3203_v60, %v7325_v49  ;;  %v3257_v32 = vadd.f32 %v3256_v61, %v7334_v40  ;;  %v3205_v37 = vpop.f32.mrb[46].mxu0  ;;  %v3258_v14 = vpop.f32.mrb[46].mxu1 }
 0xd12   : > { %v3206_v29 = vadd.f32 %v3205_v37, %v7313_v11  ;;  %v3259_v31 = vadd.f32 %v3258_v14, %v7320_v35  ;;  %v3207_v52 = vpop.f32.mrb[47].mxu0  ;;  %v3260_v1 = vpop.f32.mrb[47].mxu1  ;;  %v3285_v17 = vmax.f32 %v3202_v58, 0.0  ;;  %v3287_v19 = vmax.f32 %v3255_v59, 0.0 }
 0xd13   : > { %v3208_v16 = vadd.f32 %v3207_v52, %v7325_v49  ;;  %v3261_v2 = vadd.f32 %v3260_v1, %v7334_v40  ;;  %5698 = vmatpush3.bf16.msra.mxu0 %v6309_v57  ;;  %5726 = vmatpush3.bf16.msra.mxu1 %v6310_v53  ;;  %v3286_v25 = vmax.f32 %v3204_v21, 0.0  ;;  %v3288_v26 = vmax.f32 %v3257_v32, 0.0  ;;  %v6327_v52 = vld [vmem:[%s6642_s19 + $0x358] sm:$0xff]  }
 0xd14   : > { %v3301_v20 = vmax.f32 %v3206_v29, 0.0  ;;  %v3303_v8 = vmax.f32 %v3259_v31, 0.0  ;;  %5699 = vmatprep.subr.bf16.mxu0 %v6311_v62  ;;  %5727 = vmatprep.subr.bf16.mxu1 %v6312_v63  ;;  %v6325_v29 = vld [vmem:[%s6642_s19 + $0x310] sm:$0xff]   ;;  %v6328_v1 = vld [vmem:[%s6642_s19 + $0x3d8] sm:$0xff]  }
 0xd15   : > { %v3302_v18 = vmax.f32 %v3208_v16, 0.0  ;;  %v3304_v27 = vmax.f32 %v3261_v2, 0.0  ;;  %v6326_v31 = vld [vmem:[%s6642_s19 + $0x390] sm:$0xff]   ;;  %v6329_v16 = vld [vmem:[%s6642_s19 + $0x318] sm:$0xff]  }
 0xd16   : > { %v7362_v10 = vpack.c.bf16 %v3301_v20, %v3285_v17  ;;  %v7364_v28 = vpack.c.bf16 %v3303_v8, %v3287_v19  ;;  %v6330_v2 = vld [vmem:[%s6642_s19 + $0x398] sm:$0xff]   ;;  %v6335_v17 = vld [vmem:[%s6642_s19 + $0x368] sm:$0xff]  }
 0xd17   : > { %v3350_v13 = vpack.c.bf16 %v3302_v18, %v3286_v25  ;;  %v3352_v30 = vpack.c.bf16 %v3304_v27, %v3288_v26  ;;  %5700 = vmatpush3.bf16.msra.mxu0 %v6313_v3  ;;  %5728 = vmatpush3.bf16.msra.mxu1 %v6314_v7  ;;  %v3211_v47 = vpop.f32.mrb[48].mxu0  ;;  %v3264_v0 = vpop.f32.mrb[48].mxu1  ;;  %v6331_v3 = vld [vmem:[%s6642_s19 + $0x360] sm:$0xff]   ;;  %v6336_v19 = vld [vmem:[%s6642_s19 + $0x3e8] sm:$0xff]   ;;  %v6341_v25 = vld [vmem:[%s6642_s19 + $0x330] sm:$0xff]  }
 0xd18   : > { %v3212_v22 = vadd.f32 %v3211_v47, %v7313_v11  ;;  %v3265_v39 = vadd.f32 %v3264_v0, %v7320_v35  ;;  %v3213_v33 = vpop.f32.mrb[49].mxu0  ;;  %v3266_v55 = vpop.f32.mrb[49].mxu1  ;;  %5741 = vmatprep.subr.bf16.mxu0 %v6315_v23  ;;  %5769 = vmatprep.subr.bf16.mxu1 %v6316_v24  ;;  %v6332_v7 = vld [vmem:[%s6642_s19 + $0x3e0] sm:$0xff]   ;;  %v6337_v20 = vld [vmem:[%s6642_s19 + $0x328] sm:$0xff]   ;;  %v6339_v23 = vld [vmem:[%s6642_s19 + $0x370] sm:$0xff]  }
 0xd19   : > { %v3214_v12 = vadd.f32 %v3213_v33, %v7325_v49  ;;  %v3267_v34 = vadd.f32 %v3266_v55, %v7334_v40  ;;  %v3215_v56 = vpop.f32.mrb[50].mxu0  ;;  %v3268_v46 = vpop.f32.mrb[50].mxu1  ;;  %v6338_v8 = vld [vmem:[%s6642_s19 + $0x3a8] sm:$0xff]   ;;  %v6340_v24 = vld [vmem:[%s6642_s19 + $0x3f0] sm:$0xff]   ;;  %v6343_v18 = vld [vmem:[%s6642_s19 + $0x378] sm:$0xff]  }
 0xd1a   : > { %v3216_v41 = vadd.f32 %v3215_v56, %v7313_v11  ;;  %v3269_v6 = vadd.f32 %v3268_v46, %v7320_v35  ;;  %4629 = vmatmul.mubr.bf16.vlgmr.msra.gmra.mrb[68].mxu0 %v7298_v36  ;;  %4678 = vmatmul.mubr.bf16.vlgmr.msra.gmra.mrb[68].mxu1 %v7300_v15  ;;  %v3217_v57 = vpop.f32.mrb[51].mxu0  ;;  %v3270_v53 = vpop.f32.mrb[51].mxu1  ;;  %v3317_v11 = vmax.f32 %v3212_v22, 0.0  ;;  %v3319_v60 = vmax.f32 %v3265_v39, 0.0  ;;  %v6321_v36 = vld [vmem:[%s6642_s19 + $0x308] sm:$0xff]   ;;  %v6342_v26 = vld [vmem:[%s6642_s19 + $0x3b0] sm:$0xff]  }
 0xd1b   : > { %v3218_v58 = vadd.f32 %v3217_v57, %v7325_v49  ;;  %v3271_v59 = vadd.f32 %v3270_v53, %v7334_v40  ;;  %4636 = vmatprep.mubr.bf16.mxu0 %v7342_v38  ;;  %4685 = vmatprep.mubr.bf16.mxu1 %v7344_v42  ;;  %v6322_v15 = vld [vmem:[%s6642_s19 + $0x388] sm:$0xff]   ;;  %v3318_v62 = vmax.f32 %v3214_v12, 0.0  ;;  %v3320_v49 = vmax.f32 %v3267_v34, 0.0  ;;  %v6323_v38 = vld [vmem:[%s6642_s19 + $0x350] sm:$0xff]   ;;  %v6344_v27 = vld [vmem:[%s6642_s19 + $0x3f8] sm:$0xff]  }
 0xd1c   : > { %v3333_v35 = vmax.f32 %v3216_v41, 0.0  ;;  %v3335_v61 = vmax.f32 %v3269_v6, 0.0  ;;  %5742 = vmatpush3.bf16.msra.mxu0 %v6317_v54  ;;  %5770 = vmatpush3.bf16.msra.mxu1 %v6318_v45  ;;  %v6324_v42 = vld [vmem:[%s6642_s19 + $0x3d0] sm:$0xff]   ;;  %v5333_v22 = vld [vmem:[%s757_s2] ss:$0 sm:$0xff]  ;;  %s7544_s2 = sld [smem:[#allocation16_spill]] (!%p5464_p5) }
 0xd1d   : > { %v3334_v63 = vmax.f32 %v3218_v58, 0.0  ;;  %v3336_v40 = vmax.f32 %v3271_v59, 0.0  ;;  %5743 = vmatprep.subr.bf16.mxu0 %v6319_v48  ;;  %5771 = vmatprep.subr.bf16.mxu1 %v6320_v51 }
 0xd1e   : > { %v3365_v21 = vpack.c.bf16 %v3333_v35, %v3317_v11  ;;  %v3367_v32 = vpack.c.bf16 %v3335_v61, %v3319_v60 }
 0xd1f   : > { %v3366_v37 = vpack.c.bf16 %v3334_v63, %v3318_v62  ;;  %v3368_v14 = vpack.c.bf16 %v3336_v40, %v3320_v49 }
 0xd20   : > { %5744 = vmatpush3.bf16.msra.mxu0 %v6321_v36  ;;  %5772 = vmatpush3.bf16.msra.mxu1 %v6322_v15 }
 0xd21   : > { %5745 = vmatprep.subr.bf16.mxu0 %v6323_v38  ;;  %5773 = vmatprep.subr.bf16.mxu1 %v6324_v42 }
 0xd22   : > { %4637 = vmatmul.mubr.bf16.gmra.mrb[72].mxu0 %v7338_v50  ;;  %4686 = vmatmul.mubr.bf16.gmra.mrb[72].mxu1 %v7340_v9  ;;  %v6333_v50 = vld [vmem:[%s6642_s19 + $0x320] sm:$0xff]  }
 0xd23   : > { %4726 = vmatprep.mubr.bf16.mxu0 %v3350_v13  ;;  %4775 = vmatprep.mubr.bf16.mxu1 %v3352_v30  ;;  %v6334_v9 = vld [vmem:[%s6642_s19 + $0x3a0] sm:$0xff]   ;;  %v6345_v13 = vld [vmem:[%s6642_s19 + $0x338] sm:$0xff]  }
 0xd24   : > { %5746 = vmatpush3.bf16.msra.mxu0 %v6325_v29  ;;  %5774 = vmatpush3.bf16.msra.mxu1 %v6326_v31  ;;  %v6346_v30 = vld [vmem:[%s6642_s19 + $0x3b8] sm:$0xff]  }
 0xd25   : > { %5747 = vmatprep.subr.bf16.mxu0 %v6327_v52  ;;  %5775 = vmatprep.subr.bf16.mxu1 %v6328_v1 }
 0xd28   : > { %5748 = vmatpush3.bf16.msra.mxu0 %v6329_v16  ;;  %5776 = vmatpush3.bf16.msra.mxu1 %v6330_v2 }
 0xd29   : > { %5749 = vmatprep.subr.bf16.mxu0 %v6331_v3  ;;  %5777 = vmatprep.subr.bf16.mxu1 %v6332_v7 }
 0xd2c   : > { %5750 = vmatpush3.bf16.msra.mxu0 %v6333_v50  ;;  %5778 = vmatpush3.bf16.msra.mxu1 %v6334_v9 }
 0xd2d   : > { %5751 = vmatprep.subr.bf16.mxu0 %v6335_v17  ;;  %5779 = vmatprep.subr.bf16.mxu1 %v6336_v19 }
 0xd30   : > { %5752 = vmatpush3.bf16.msra.mxu0 %v6337_v20  ;;  %5780 = vmatpush3.bf16.msra.mxu1 %v6338_v8 }
 0xd31   : > { %5753 = vmatprep.subr.bf16.mxu0 %v6339_v23  ;;  %5781 = vmatprep.subr.bf16.mxu1 %v6340_v24 }
 0xd34   : > { %5754 = vmatpush3.bf16.msra.mxu0 %v6341_v25  ;;  %5782 = vmatpush3.bf16.msra.mxu1 %v6342_v26 }
 0xd35   : > { %5755 = vmatprep.subr.bf16.mxu0 %v6343_v18  ;;  %5783 = vmatprep.subr.bf16.mxu1 %v6344_v27 }
 0xd38   : > { %5756 = vmatpush3.bf16.msra.mxu0 %v6345_v13  ;;  %5784 = vmatpush3.bf16.msra.mxu1 %v6346_v30 }
 0xd3b   : > { %4727 = vmatmul.mubr.bf16.vlgmr.msra.gmra.mrb[76].mxu0 %v7362_v10  ;;  %4776 = vmatmul.mubr.bf16.vlgmr.msra.gmra.mrb[76].mxu1 %v7364_v28 }
 0xd3c   : > { %4734 = vmatprep.mubr.bf16.mxu0 %v3366_v37  ;;  %4783 = vmatprep.mubr.bf16.mxu1 %v3368_v14 }
 0xd43   : > { %4735 = vmatmul.mubr.bf16.gmra.mrb[80].mxu0 %v3365_v21  ;;  %4784 = vmatmul.mubr.bf16.gmra.mrb[80].mxu1 %v3367_v32 }
 0xd92   : > { %v5589_v47 = vpop.f32.mrb[52].mxu0  ;;  %v5617_v0 = vpop.f32.mrb[52].mxu1 }
 0xd93   : > { %v5590_v39 = vpop.f32.mrb[53].mxu0  ;;  %v5618_v33 = vpop.f32.mrb[53].mxu1 }
 0xd94   : > { %v5591_v55 = vadd.f32 %v5590_v39, %v5589_v47  ;;  %v5619_v54 = vadd.f32 %v5618_v33, %v5617_v0  ;;  %v5592_v45 = vpop.f32.mrb[54].mxu0  ;;  %v5620_v12 = vpop.f32.mrb[54].mxu1 }
 0xd95   : > { %v5593_v10 = vpop.f32.mrb[55].mxu0  ;;  %v5621_v34 = vpop.f32.mrb[55].mxu1 }
 0xd96   : > { %v4435_v28 = vadd.f32 %v5591_v55, %v5333_v22  ;;  %v5594_v56 = vadd.f32 %v5593_v10, %v5592_v45  ;;  %v5622_v46 = vadd.f32 %v5621_v34, %v5620_v12 }
 0xd98   : > { %v4484_v48 = vadd.f32 %v5619_v54, %v4435_v28  ;;  %v4438_v51 = vadd.f32 %v5594_v56, %v5333_v22 }
 0xd9a   : > { %v4487_v41 = vadd.f32 %v5622_v46, %v4438_v51 }
 0xdc5   : > { %v5595_v6 = vpop.f32.mrb[56].mxu0  ;;  %v5623_v57 = vpop.f32.mrb[56].mxu1 }
 0xdc6   : > { %v5596_v53 = vpop.f32.mrb[57].mxu0  ;;  %v5624_v58 = vpop.f32.mrb[57].mxu1 }
 0xdc7   : > { %v5597_v59 = vadd.f32 %v5596_v53, %v5595_v6  ;;  %v5625_v11 = vadd.f32 %v5624_v58, %v5623_v57  ;;  %v5598_v60 = vpop.f32.mrb[58].mxu0  ;;  %v5626_v35 = vpop.f32.mrb[58].mxu1 }
 0xdc8   : > { %v5599_v61 = vpop.f32.mrb[59].mxu0  ;;  %v5627_v36 = vpop.f32.mrb[59].mxu1 }
 0xdc9   : > { %v4443_v15 = vadd.f32 %v5597_v59, %v5333_v22  ;;  %v5600_v62 = vadd.f32 %v5599_v61, %v5598_v60  ;;  %v5628_v49 = vadd.f32 %v5627_v36, %v5626_v35 }
 0xdcb   : > { %v4492_v63 = vadd.f32 %v5625_v11, %v4443_v15  ;;  %v4446_v40 = vadd.f32 %v5600_v62, %v5333_v22 }
 0xdcd   : > { %v4495_v38 = vadd.f32 %v5628_v49, %v4446_v40  ;;  %v5645_v42 = vpop.f32.mrb[60].mxu0  ;;  %v5673_v21 = vpop.f32.mrb[60].mxu1 }
 0xdce   : > { %v5646_v32 = vpop.f32.mrb[61].mxu0  ;;  %v5674_v37 = vpop.f32.mrb[61].mxu1 }
 0xdcf   : > { %v5647_v14 = vadd.f32 %v5646_v32, %v5645_v42  ;;  %v5675_v29 = vadd.f32 %v5674_v37, %v5673_v21  ;;  %v5648_v31 = vpop.f32.mrb[62].mxu0  ;;  %v5676_v52 = vpop.f32.mrb[62].mxu1 }
 0xdd0   : > { %v5649_v1 = vpop.f32.mrb[63].mxu0  ;;  %v5677_v16 = vpop.f32.mrb[63].mxu1 }
 0xdd1   : > { %v4533_v2 = vadd.f32 %v5647_v14, %v4484_v48  ;;  %v5650_v3 = vadd.f32 %v5649_v1, %v5648_v31  ;;  %v5678_v7 = vadd.f32 %v5677_v16, %v5676_v52 }
 0xdd3   : > { %v4582_v50 = vadd.f32 %v5675_v29, %v4533_v2  ;;  %v4536_v9 = vadd.f32 %v5650_v3, %v4487_v41 }
 0xdd5   : > { %v4585_v17 = vadd.f32 %v5678_v7, %v4536_v9  ;;  %v5651_v19 = vpop.f32.mrb[64].mxu0  ;;  %v5679_v20 = vpop.f32.mrb[64].mxu1 }
 0xdd6   : > { %v5652_v8 = vpop.f32.mrb[65].mxu0  ;;  %v5680_v23 = vpop.f32.mrb[65].mxu1 }
 0xdd7   : > { %v5653_v24 = vadd.f32 %v5652_v8, %v5651_v19  ;;  %v5681_v25 = vadd.f32 %v5680_v23, %v5679_v20  ;;  %v5654_v26 = vpop.f32.mrb[66].mxu0  ;;  %v5682_v18 = vpop.f32.mrb[66].mxu1 }
 0xdd8   : > { %v5655_v27 = vpop.f32.mrb[67].mxu0  ;;  %v5683_v13 = vpop.f32.mrb[67].mxu1 }
 0xdd9   : > { %v4541_v30 = vadd.f32 %v5653_v24, %v4492_v63  ;;  %v5656_v47 = vadd.f32 %v5655_v27, %v5654_v26  ;;  %v5684_v0 = vadd.f32 %v5683_v13, %v5682_v18 }
 0xddb   : > { %v4590_v22 = vadd.f32 %v5681_v25, %v4541_v30  ;;  %v4544_v39 = vadd.f32 %v5656_v47, %v4495_v38 }
 0xddd   : > { %v4593_v33 = vadd.f32 %v5684_v0, %v4544_v39 }
 0xded   : > { %v5701_v55 = vpop.f32.mrb[68].mxu0  ;;  %v5729_v54 = vpop.f32.mrb[68].mxu1 }
 0xdee   : > { %v5702_v45 = vpop.f32.mrb[69].mxu0  ;;  %v5730_v12 = vpop.f32.mrb[69].mxu1 }
 0xdef   : > { %v5703_v10 = vadd.f32 %v5702_v45, %v5701_v55  ;;  %v5731_v34 = vadd.f32 %v5730_v12, %v5729_v54  ;;  %v5704_v28 = vpop.f32.mrb[70].mxu0  ;;  %v5732_v56 = vpop.f32.mrb[70].mxu1 }
 0xdf0   : > { %v5705_v46 = vpop.f32.mrb[71].mxu0  ;;  %v5733_v48 = vpop.f32.mrb[71].mxu1 }
 0xdf1   : > { %v4631_v51 = vadd.f32 %v5703_v10, %v4582_v50  ;;  %v5706_v41 = vadd.f32 %v5705_v46, %v5704_v28  ;;  %v5734_v6 = vadd.f32 %v5733_v48, %v5732_v56 }
 0xdf3   : > { %v4680_v57 = vadd.f32 %v5731_v34, %v4631_v51  ;;  %v4634_v53 = vadd.f32 %v5706_v41, %v4585_v17 }
 0xdf5   : > { %v4683_v58 = vadd.f32 %v5734_v6, %v4634_v53  ;;  %v5707_v59 = vpop.f32.mrb[72].mxu0  ;;  %v5735_v11 = vpop.f32.mrb[72].mxu1 }
 0xdf6   : > { %v5708_v60 = vpop.f32.mrb[73].mxu0  ;;  %v5736_v35 = vpop.f32.mrb[73].mxu1 }
 0xdf7   : > { %v5709_v61 = vadd.f32 %v5708_v60, %v5707_v59  ;;  %v5737_v36 = vadd.f32 %v5736_v35, %v5735_v11  ;;  %v5710_v15 = vpop.f32.mrb[74].mxu0  ;;  %v5738_v62 = vpop.f32.mrb[74].mxu1 }
 0xdf8   : > { %v5711_v49 = vpop.f32.mrb[75].mxu0  ;;  %v5739_v63 = vpop.f32.mrb[75].mxu1 }
 0xdf9   : > { %v4639_v40 = vadd.f32 %v5709_v61, %v4590_v22  ;;  %v5712_v38 = vadd.f32 %v5711_v49, %v5710_v15  ;;  %v5740_v42 = vadd.f32 %v5739_v63, %v5738_v62 }
 0xdfb   : > { %v4688_v21 = vadd.f32 %v5737_v36, %v4639_v40  ;;  %v4642_v32 = vadd.f32 %v5712_v38, %v4593_v33 }
 0xdfd   : > { %v4691_v37 = vadd.f32 %v5740_v42, %v4642_v32 }
 0xe0e   : > { %v5757_v14 = vpop.f32.mrb[76].mxu0  ;;  %v5785_v29 = vpop.f32.mrb[76].mxu1 }
 0xe0f   : > { %v5758_v31 = vpop.f32.mrb[77].mxu0  ;;  %v5786_v52 = vpop.f32.mrb[77].mxu1 }
 0xe10   : > { %v5759_v1 = vadd.f32 %v5758_v31, %v5757_v14  ;;  %v5787_v16 = vadd.f32 %v5786_v52, %v5785_v29  ;;  %v5760_v2 = vpop.f32.mrb[78].mxu0  ;;  %v5788_v3 = vpop.f32.mrb[78].mxu1 }
 0xe11   : > { %v5761_v7 = vpop.f32.mrb[79].mxu0  ;;  %v5789_v50 = vpop.f32.mrb[79].mxu1 }
 0xe12   : > { %v4729_v9 = vadd.f32 %v5759_v1, %v4680_v57  ;;  %v5762_v17 = vadd.f32 %v5761_v7, %v5760_v2  ;;  %v5790_v19 = vadd.f32 %v5789_v50, %v5788_v3  ;;  %v5462_v50 = vld [vmem:[%s760_s23] ss:$0 sm:$0xff] }
 0xe14   : > { %v4778_v20 = vadd.f32 %v5787_v16, %v4729_v9  ;;  %v4732_v8 = vadd.f32 %v5762_v17, %v4683_v58 }
 0xe16   : > { %v4781_v23 = vadd.f32 %v5790_v19, %v4732_v8  ;;  %v5763_v24 = vpop.f32.mrb[80].mxu0  ;;  %v5791_v25 = vpop.f32.mrb[80].mxu1  ;;  %v4792_v26 = vadd.f32 %v4778_v20, %v7019_v44  ;;  %v5463_v19 = vld [vmem:[%s763_s3] ss:$0 sm:$0xff]  ;;  %s7542_s3 = sld [smem:[#allocation15_spill]] (!%p5464_p5) }
 0xe17   : > { %v5764_v18 = vpop.f32.mrb[81].mxu0  ;;  %v5792_v27 = vpop.f32.mrb[81].mxu1 }
 0xe18   : > { %v5765_v13 = vadd.f32 %v5764_v18, %v5763_v24  ;;  %v5793_v30 = vadd.f32 %v5792_v27, %v5791_v25  ;;  %v5766_v47 = vpop.f32.mrb[82].mxu0  ;;  %v5794_v0 = vpop.f32.mrb[82].mxu1  ;;  %v4798_v22 = vsel %vm896_vm2, %v4792_v26, 0.0  ;;  %v4793_v39 = vadd.f32 %v4781_v23, %v7016_v43 }
 0xe19   : > { %v5767_v33 = vpop.f32.mrb[83].mxu0  ;;  %v5795_v55 = vpop.f32.mrb[83].mxu1  ;;  %4799 = vadd.xlane.f32.xlu1 %v4798_v22 }
 0xe1a   : > { %v4737_v54 = vadd.f32 %v5765_v13, %v4688_v21  ;;  %v5768_v45 = vadd.f32 %v5767_v33, %v5766_v47  ;;  %v5796_v12 = vadd.f32 %v5795_v55, %v5794_v0  ;;  %v4801_v10 = vsel %vm896_vm2, %v4793_v39, 0.0 }
 0xe1b   : > { %4802 = vadd.xlane.f32.xlu0 %v4801_v10 }
 0xe1c   : > { %v4786_v44 = vadd.f32 %v5793_v30, %v4737_v54  ;;  %v4740_v34 = vadd.f32 %v5768_v45, %v4691_v37  ;;  %v4952_v33 = vld [vmem:[%s7542_s3] sm:$0xff] (!%p5464_p5)  ;;  %v4953_v55 = vld [vmem:[%s7542_s3 + $0x8] sm:$0xff] (!%p5464_p5)  ;;  %v6481_v54 = vmov (!%p5464_p5), 0.0|0.0   ;;  %v4955_v10 = vld [vmem:[%s7542_s3 + $0x18] sm:$0xff] (!%p5464_p5) }
 0xe1d   : > { %6083 = vmatprep.subr.bf16.mxu0 (!%p5464_p5), %v6481_v54  ;;  %6089 = vmatprep.subr.bf16.mxu1 (!%p5464_p5), %v6481_v54  ;;  %v6090_v45 = vpack.c.bf16 (!%p5464_p5), %v4953_v55, %v4952_v33 }
 0xe1e   : > { %v4789_v28 = vadd.f32 %v5796_v12, %v4740_v34  ;;  %v4794_v56 = vadd.f32 %v4786_v44, %v7042_v5  ;;  %v4954_v12 = vld [vmem:[%s7542_s3 + $0x10] sm:$0xff] (!%p5464_p5)  ;;  %v6483_v34 = vmov (!%p5464_p5), 0.0  }
 0xe1f   : > { %5981 = vmatprep.mubr.msk.f32.mxu0 (!%p5464_p5), %vm6482_vm5, %v6483_v34  ;;  %6091 = vmatpush3.bf16.msra.mxu1 (!%p5464_p5), %v6090_v45 }
 0xe20   : > { %v4804_v46 = vsel %vm896_vm2, %v4794_v56, 0.0  ;;  %v4795_v48 = vadd.f32 %v4789_v28, %v7040_v4  ;;  %v6093_v28 = vpack.c.bf16 (!%p5464_p5), %v4955_v10, %v4954_v12  ;;  %6092 = vmatprep.subr.bf16.mxu1 (!%p5464_p5), %v6481_v54  ;;  %5992 = vmatprep.mubr.msk.f32.mxu1 (!%p5464_p5), %vm6482_vm5, %v6483_v34 }
 0xe21   : > { %4805 = vadd.xlane.f32.xlu1 %v4804_v46 }
 0xe22   : > { %v4807_v43 = vsel %vm896_vm2, %v4795_v48, 0.0 }
 0xe23   : > { %4808 = vadd.xlane.f32.xlu0 %v4807_v43  ;;  %6094 = vmatpush3.bf16.msra.mxu1 (!%p5464_p5), %v6093_v28  ;;  %v5466_v43 = vld [vmem:[%s7544_s2] ss:$0 sm:$0xff] (!%p5464_p5) }
 0xea6   : > { %v4800_v51 = vpop.xlane.xlu1 %4799 }
 0xea7   : > { %v4810_v41 = vmul.f32 0.03125, %v4800_v51 }
 0xea8   : > { %v4803_v6 = vpop.xlane.xlu0 %4802 }
 0xea9   : > { %v4814_v57 = vsub.f32 %v4792_v26, %v4810_v41  ;;  %v4811_v53 = vmul.f32 0.03125, %v4803_v6 }
 0xeab   : > { %v4815_v58 = vsub.f32 %v4793_v39, %v4811_v53  ;;  %v4818_v59 = vmul.f32 %v4814_v57, %v4814_v57 }
 0xead   : > { %v4822_v11 = vsel %vm896_vm2, %v4818_v59, 0.0  ;;  %v4819_v60 = vmul.f32 %v4815_v58, %v4815_v58 }
 0xeae   : > { %4823 = vadd.xlane.f32.xlu1 %v4822_v11  ;;  %v4806_v5 = vpop.xlane.xlu1 %4805 }
 0xeaf   : > { %v4812_v35 = vmul.f32 0.03125, %v4806_v5  ;;  %v4825_v61 = vsel %vm896_vm2, %v4819_v60, 0.0 }
 0xeb0   : > { %4826 = vadd.xlane.f32.xlu0 %v4825_v61  ;;  %v4809_v4 = vpop.xlane.xlu0 %4808 }
 0xeb1   : > { %v4816_v36 = vsub.f32 %v4794_v56, %v4812_v35  ;;  %v4813_v15 = vmul.f32 0.03125, %v4809_v4  ;;  %v4878_v56 = vld [vmem:[%s7543_s4] sm:$0xf] (!%p5464_p5) }
 0xeb3   : > { %v4817_v62 = vsub.f32 %v4795_v48, %v4813_v15  ;;  %v4820_v49 = vmul.f32 %v4816_v36, %v4816_v36 }
 0xeb5   : > { %v4828_v63 = vsel %vm896_vm2, %v4820_v49, 0.0  ;;  %v4821_v40 = vmul.f32 %v4817_v62, %v4817_v62 }
 0xeb6   : > { %4829 = vadd.xlane.f32.xlu1 %v4828_v63 }
 0xeb7   : > { %v4831_v38 = vsel %vm896_vm2, %v4821_v40, 0.0 }
 0xeb8   : > { %4832 = vadd.xlane.f32.xlu0 %v4831_v38 }
 0xf3b   : > { %v4824_v42 = vpop.xlane.xlu1 %4823 }
 0xf3c   : > { %v4834_v21 = vmul.f32 0.03125, %v4824_v42 }
 0xf3d   : > { %v4827_v32 = vpop.xlane.xlu0 %4826 }
 0xf3e   : > { %v4838_v37 = vadd.f32 1e-05, %v4834_v21  ;;  %v4835_v14 = vmul.f32 0.03125, %v4827_v32 }
 0xf40   : > { %6419 = vrsqrt.f32 %v4838_v37  ;;  %v4839_v29 = vadd.f32 1e-05, %v4835_v14 }
 0xf42   : > { %6421 = vrsqrt.f32 %v4839_v29 }
 0xf43   : > { %v4830_v31 = vpop.xlane.xlu1 %4829 }
 0xf44   : > { %v4836_v52 = vmul.f32 0.03125, %v4830_v31 }
 0xf45   : > { %v4833_v1 = vpop.xlane.xlu0 %4832 }
 0xf46   : > { %v4840_v16 = vadd.f32 1e-05, %v4836_v52  ;;  %v4837_v2 = vmul.f32 0.03125, %v4833_v1 }
 0xf48   : > { %6423 = vrsqrt.f32 %v4840_v16  ;;  %v4841_v3 = vadd.f32 1e-05, %v4837_v2 }
 0xf4a   : > { %v6420_v7 = vpop.eup %6419  ;;  %6425 = vrsqrt.f32 %v4841_v3 }
 0xf4b   : > { %v4846_v9 = vmul.f32 %v6420_v7, %v4814_v57 }
 0xf4c   : > { %v6422_v17 = vpop.eup %6421 }
 0xf4d   : > { %v4856_v20 = vmul.f32 %v5462_v50, %v4846_v9  ;;  %v4847_v8 = vmul.f32 %v6422_v17, %v4815_v58 }
 0xf4f   : > { %v4866_v23 = vadd.f32 %v5463_v19, %v4856_v20  ;;  %v4857_v24 = vmul.f32 %v5462_v50, %v4847_v8 }
 0xf51   : > { %4870 = vst.msk [vmem:[#allocation2] sm:$0xff] %vm896_vm2, %v4866_v23  ;;  %v4867_v25 = vadd.f32 %v5463_v19, %v4857_v24 }
 0xf52   : > { %v6424_v26 = vpop.eup %6423 }
 0xf53   : > { %4871 = vst.msk [vmem:[#allocation2 + $0x8] sm:$0xff] %vm896_vm2, %v4867_v25  ;;  %v4848_v18 = vmul.f32 %v6424_v26, %v4816_v36  ;;  %v6084_v39 = vpack.c.bf16 (!%p5464_p5), %v4867_v25, %v4866_v23 }
 0xf54   : > { %v6426_v27 = vpop.eup %6425 }
 0xf55   : > { %v4858_v13 = vmul.f32 %v5462_v50, %v4848_v18  ;;  %v4849_v30 = vmul.f32 %v6426_v27, %v4817_v62  ;;  %4877 = sbr.rel (%p5464_p5) target bundleno = 4363 (0x110b), region = 104  ;;  %6085 = vmatpush3.bf16.msra.mxu0 (!%p5464_p5), %v6084_v39 }
 0xf56   : > { %6086 = vmatprep.subr.bf16.mxu0 (!%p5464_p5), %v6481_v54 }
 0xf57   : > { %v4868_v47 = vadd.f32 %v5463_v19, %v4858_v13  ;;  %v4859_v0 = vmul.f32 %v5462_v50, %v4849_v30 }
 0xf59   : > { %4872 = vst.msk [vmem:[#allocation2 + $0x10] sm:$0xff] %vm896_vm2, %v4868_v47  ;;  %v4869_v22 = vadd.f32 %v5463_v19, %v4859_v0 }
 0xf5b   : > { %4873 = vst.msk [vmem:[#allocation2 + $0x18] sm:$0xff] %vm896_vm2, %v4869_v22  ;;  %v6087_v44 = vpack.c.bf16 (!%p5464_p5), %v4869_v22, %v4868_v47 }
 0xf5d   : > { %6088 = vmatpush3.bf16.msra.mxu0 %v6087_v44 }
 0xf60   : > { %5982 = vmatmul.mubr.msk.f32.vlgmr.msra.gmra.mrb[0].mxu0 %vm896_vm2, %v4878_v56 }
0x1033   : > { %v4948_v46 = vpop.f32.mrb[0].mxu0 }
0x1034   : > { %v5983_v48 = vpop.f32.mrb[1].mxu0  ;;  %5993 = vmatmul.mubr.msk.f32.vlgmr.msra.gmra.mrb[0].mxu1 %vm896_vm2, %v4948_v46 }
0x1107   : > { %v5032_v51 = vpop.f32.mrb[0].mxu1 }
0x1108   : > { %v5033_v41 = vadd.f32 %v5466_v43, %v5032_v51  ;;  %v5994_v6 = vpop.f32.mrb[1].mxu1 }
0x110a   : > { %5037 = vst.msk [vmem:[#allocation3] sm:$0xf] %vm5036_vm6, %v5033_v41 }
0x110b PF: > { %p6113_p6 = scmp.eq.s32.totalorder %s6591_s30, 1  ;;  %s6484_s19 = smov [#allocation3]  }
0x110c   : > { %s5045_s24 = sshll.u32 %s6484_s19, 4  ;;  %s5046_s24 = int_to_ptr.vmem [resolvable:$true] %s5045_s24 }
0x110d   : > { %s6431_s21 = scalar_lea.vmem %s5046_s24, 64  ;;  %p6438_p10 = scmp.lt.s32.totalorder %s5046_s24, %s5046_s24 }
0x110e   : > { %p6432_p7 = scmp.ne.s32.totalorder %s5046_s24, %s6431_s21  ;;  %p6439_p11 = scmp.lt.s32.totalorder %s6431_s21, %s6431_s21 }
0x1110   : > { %p6433_p8 = pnand %p6432_p7, %p6113_p6  ;;  %p6440_p12 = por %p6439_p11, %p6438_p10 }
0x1112   : > { %p6434_p9 = pneg %p6433_p8 }
0x1114   : > { %p6441_p13 = pnand %p6440_p12, %p6434_p9 }
0x1116   : > { %6444 = shalt.err (!%p6441_p13)
}
0x1117   : > { %s7545_s25 = sld [smem:[#allocation17_spill]] }
0x111d   : > { %s6445_s26 = scalar_lea.hbm %s7545_s25, 64 }
0x111e   : > { %p6446_p0 = scmp.ne.s32.totalorder %s7545_s25, %s6445_s26  ;;  %p6451_p3 = scmp.lt.u32.totalorder %s6445_s26, %s7545_s25 }
0x1120   : > { %p6447_p1 = pnand %p6446_p0, %p6113_p6 }
0x1122   : > { %p6448_p2 = pneg %p6447_p1 }
0x1124   : > { %p6453_p4 = pnand %p6451_p3, %p6448_p2 }
0x1126   : > { %6456 = shalt.err (!%p6453_p4)
}
0x1127   : > { %6110 = dma.vmem_to_hbm [thread:$0]  (%p6113_p6), %s5046_s24, 64, %s7545_s25, [#allocation4]  }
0x1128   : > { %6462 = dma.done.wait (%p6113_p6), [#allocation4], 64  }
0x1129   : > { %6464 = vsyncadd (%p6113_p6), [#allocation4], 4294967232 }
0x112a PF: > { %s7546_s4 = sld [smem:[#allocation6_spill]] }
0x1130   : > { %s30_s0 = sadd.s32 1, %s7546_s4  }
0x1131   : > { %p27_p5 = scmp.ge.s32.totalorder %s30_s0, 4  }
0x1133   :  { %29 = sbr.rel (!%p27_p5) target bundleno = 13 (0xd), region = 164 }
0x113a   :  { %5058 = vsyncpa [#allocation4], 1 }
0x113b   :  { %5060 = vsyncpa [#allocation4 + $0x1], 1 }

</bundles_post_ra>
